<compile_context>
chip_gen: v7x
topology: tpu7x:2x2x1
jax: 0.10.0
libtpu: 0.0.40
codegen_flags: <defaults>
</compile_context>

<pallas_src>
import functools

import jax
import jax.numpy as jnp
import numpy as np
from jax.experimental import pallas as pl
from jax.experimental.pallas import tpu as pltpu

BN_EPS = 1e-5
LANES = 128


def _round_up(x, m):
    return (x + m - 1) // m * m


def _pick_tile_h(h):
    """Row-tile height: a divisor of h, multiple of 8, modest size."""
    if h <= 8 or h % 8 != 0:
        return h
    for th in (32, 24, 16, 8):
        if th < h and h % th == 0:
            return th
    return h


# ---------------------------------------------------------------------------
# Pallas kernels
# ---------------------------------------------------------------------------
def _conv_im2col_kernel(p_ref, w_ref, b_ref, y_ref, st_ref):
    """3x3 conv as ONE MXU GEMM over precomputed im2col patches (9*Cin <= 128).

    p_ref : (TH, W, K)        bf16 patches (K = 9*Cin padded to 128)
    w_ref : (K, Cout_p)       bf16
    b_ref : (1, Cout_p)       f32
    y_ref : (TH, WP, Cout_p)  bf16  (data in cols [0, W), zeros in [W, WP))
    st_ref: (2, Cout_p)       f32 per-tile [sum, sum_of_squares]
    """
    th, w, kdim = p_ref.shape
    wp = y_ref.shape[1]
    cout = w_ref.shape[-1]
    acc = jnp.dot(p_ref[...].reshape(th * w, kdim), w_ref[...],
                  preferred_element_type=jnp.float32) + b_ref[...]
    y_ref[:, :w, :] = acc.reshape(th, w, cout).astype(y_ref.dtype)
    y_ref[:, w:, :] = jnp.zeros((th, wp - w, cout), y_ref.dtype)
    st_ref[...] = jnp.concatenate(
        [jnp.sum(acc, axis=0, keepdims=True),
         jnp.sum(acc * acc, axis=0, keepdims=True)], axis=0)


def _conv3x3_rows_kernel(*refs, w_out, fuse_bn_relu):
    """3x3 same-padding conv of one row tile as 9 contiguous-tap MXU GEMMs.

    refs: top(1,WP,C) body(TH,WP,C) bot(1,WP,C) w(9,C,Co) b(1,Co)
          [scale(1,C) shift(1,C)]  ->  y(TH,WP,Co) stats(2,Co)
    """
    if fuse_bn_relu:
        (top_ref, x_ref, bot_ref, w_ref, b_ref,
         sc_ref, sh_ref, y_ref, st_ref) = refs
    else:
        top_ref, x_ref, bot_ref, w_ref, b_ref, y_ref, st_ref = refs

    th, wp, cin = x_ref.shape
    cout = w_ref.shape[-1]
    i = pl.program_id(1)
    nh = pl.num_programs(1)

    def act(v):
        # Fused BN-apply + ReLU of the previous stage (stage-2 call only).
        if fuse_bn_relu:
            v = jnp.maximum(v.astype(jnp.float32) * sc_ref[...] + sh_ref[...],
                            0.0).astype(jnp.bfloat16)
        return v

    body = act(x_ref[...])
    top = act(top_ref[...])
    top = jnp.where(i > 0, top, jnp.zeros_like(top))         # image top border
    bot = act(bot_ref[...])
    bot = jnp.where(i < nh - 1, bot, jnp.zeros_like(bot))    # image bottom border

    zrow = jnp.zeros((1, wp, cin), body.dtype)
    rows = jnp.concatenate([zrow, top, body, bot, zrow], axis=0)  # (TH+4,WP,C)
    # Zero the width-pad columns (post-activation); in the flat layout below
    # they double as the left/right zero halo of the convolution.
    col = jax.lax.broadcasted_iota(jnp.int32, rows.shape, 1)
    rows = jnp.where(col < w_out, rows, jnp.zeros_like(rows))

    # Flatten once (WP % 8 == 0 -> layout-aligned, no relayout); each tap is a
    # contiguous slice feeding one accumulating GEMM (bf16 in, f32 acc).
    flat = rows.reshape((th + 4) * wp, cin)
    m = th * wp
    acc = jnp.zeros((m, cout), jnp.float32)
    for ky in range(3):                                  # static: 9 MXU GEMMs
        for kx in range(3):
            off = (ky + 1) * wp + (kx - 1)
            acc = acc + jnp.dot(flat[off:off + m, :], w_ref[ky * 3 + kx],
                                preferred_element_type=jnp.float32)
    acc = acc + b_ref[...]

    y = acc.reshape(th, wp, cout)[:, :w_out, :]          # drop garbage columns
    y_ref[:, :w_out, :] = y.astype(y_ref.dtype)
    y_ref[:, w_out:, :] = jnp.zeros((th, wp - w_out, cout), y_ref.dtype)
    yf = y.reshape(th * w_out, cout)
    st_ref[...] = jnp.concatenate(
        [jnp.sum(yf, axis=0, keepdims=True),
         jnp.sum(yf * yf, axis=0, keepdims=True)], axis=0)


def _bn_skip_relu_kernel(y2_ref, x_ref, wsk_ref, bsk_ref, sc_ref, sh_ref,
                         o_ref):
    """BN2-apply + 1x1 skip conv + residual add + final ReLU for one row tile."""
    th, w, cout = y2_ref.shape
    cpin = x_ref.shape[-1]
    skip = jnp.dot(x_ref[...].reshape(th * w, cpin), wsk_ref[...],
                   preferred_element_type=jnp.float32) + bsk_ref[...]
    y = (y2_ref[...].astype(jnp.float32).reshape(th * w, cout)
         * sc_ref[...] + sh_ref[...])
    o_ref[...] = jnp.maximum(y + skip, 0.0).reshape(th, w, cout).astype(
        o_ref.dtype)


# ---------------------------------------------------------------------------
# JAX-side helpers (layout glue + tiny BN-stat folding)
# ---------------------------------------------------------------------------
def _bn_scale_shift(stats, gamma, beta, count):
    """Fold per-tile [sum, sumsq] partials into BN scale/shift vectors."""
    c = stats.shape[-1]
    s = stats.reshape(-1, 2, c)
    mean = jnp.sum(s[:, 0, :], axis=0) / count
    var = jnp.maximum(jnp.sum(s[:, 1, :], axis=0) / count - mean * mean, 0.0)
    scale = gamma.reshape(-1) * jax.lax.rsqrt(var + BN_EPS)
    shift = beta.reshape(-1) - mean * scale
    return scale.reshape(1, -1), shift.reshape(1, -1)


def _conv3_weight(wt, cpi, cpo):
    """(Cout, Cin, 3, 3) -> (9, Cin_p, Cout_p) bf16, tap-major (ky*3+kx)."""
    cout, cin = wt.shape[0], wt.shape[1]
    wm = jnp.transpose(wt, (2, 3, 1, 0))                       # (3,3,cin,cout)
    wm = jnp.pad(wm, ((0, 0), (0, 0), (0, cpi - cin), (0, cpo - cout)))
    return wm.reshape(9, cpi, cpo).astype(jnp.bfloat16)


def _conv3x3_rows(x_pad, w9, bias, scale, shift, *, w_real, tile_h,
                  fuse_bn_relu):
    """pallas_call wrapper for _conv3x3_rows_kernel over a (N, H//TH) grid."""
    n, h, wp, cin_p = x_pad.shape
    cout_p = w9.shape[-1]
    nh = h // tile_h

    body = pl.BlockSpec((None, tile_h, wp, cin_p),
                        lambda b_, i: (b_, i, 0, 0))
    top = pl.BlockSpec((None, 1, wp, cin_p),
                       lambda b_, i: (b_, jnp.maximum(i * tile_h - 1, 0), 0, 0))
    bot = pl.BlockSpec((None, 1, wp, cin_p),
                       lambda b_, i: (b_,
                                      jnp.minimum(i * tile_h + tile_h, h - 1),
                                      0, 0))
    wspec = pl.BlockSpec((9, cin_p, cout_p), lambda b_, i: (0, 0, 0))
    vspec = pl.BlockSpec((1, cout_p), lambda b_, i: (0, 0))

    in_specs = [top, body, bot, wspec, vspec]
    args = [x_pad, x_pad, x_pad, w9, bias]
    if fuse_bn_relu:
        in_specs += [vspec, vspec]
        args += [scale, shift]

    return pl.pallas_call(
        functools.partial(_conv3x3_rows_kernel, w_out=w_real,
                          fuse_bn_relu=fuse_bn_relu),
        grid=(n, nh),
        in_specs=in_specs,
        out_specs=(pl.BlockSpec((None, tile_h, wp, cout_p),
                                lambda b_, i: (b_, i, 0, 0)),
                   pl.BlockSpec((None, None, 2, cout_p),
                                lambda b_, i: (b_, i, 0, 0))),
        out_shape=(jax.ShapeDtypeStruct((n, h, wp, cout_p), jnp.bfloat16),
                   jax.ShapeDtypeStruct((n, nh, 2, cout_p), jnp.float32)),
        compiler_params=pltpu.CompilerParams(
            dimension_semantics=("parallel", "parallel")),
    )(*args)


def init_params(key, cin, cout):
    """Deterministic parameters with PyTorch-default-style init."""
    ks = jax.random.split(key, 6)

    def uinit(k, shape, fan_in):
        bound = 1.0 / np.sqrt(fan_in)
        return jax.random.uniform(k, shape, jnp.float32, -bound, bound)

    return dict(
        w1=uinit(ks[0], (cout, cin, 3, 3), cin * 9),
        b1=uinit(ks[1], (cout,), cin * 9),
        w2=uinit(ks[2], (cout, cout, 3, 3), cout * 9),
        b2=uinit(ks[3], (cout,), cout * 9),
        wsk=uinit(ks[4], (cout, cin, 1, 1), cin),
        bsk=uinit(ks[5], (cout,), cin),
        gamma=jnp.ones((cout,), jnp.float32),   # BatchNorm2d default weight
        beta=jnp.zeros((cout,), jnp.float32),   # BatchNorm2d default bias
    )


@jax.jit
def identity_block_forward(x_nchw, params):
    n, cin, h, w = x_nchw.shape
    cout = params["w1"].shape[0]
    cpin = _round_up(cin, LANES)
    cpout = _round_up(cout, LANES)
    wp = _round_up(w + 2, 8)        # conv width incl. halo, sublane-aligned
    tile_h = _pick_tile_h(h)
    nh = h // tile_h
    count = n * h * w

    # ---- layout prep (pure XLA glue over the small input) -----------------
    x_nhwc = jnp.transpose(x_nchw, (0, 2, 3, 1)).astype(jnp.float32)
    # Channel-padded (lane-dense) + width-padded input: lhs of the 1x1 skip
    # conv and, in the general path, of conv1.
    x_p = jnp.pad(x_nhwc, ((0, 0), (0, 0), (0, wp - w),
                           (0, cpin - cin))).astype(jnp.bfloat16)

    def vec(v):
        return jnp.pad(v.astype(jnp.float32),
                       (0, cpout - cout)).reshape(1, cpout)

    b1, b2, bsk = vec(params["b1"]), vec(params["b2"]), vec(params["bsk"])
    gamma, beta = vec(params["gamma"]), vec(params["beta"])
    wsk = jnp.pad(params["wsk"][:, :, 0, 0].T,
                  ((0, cpin - cin), (0, cpout - cout))).astype(jnp.bfloat16)

    cparams = pltpu.CompilerParams(
        dimension_semantics=("parallel", "parallel"))
    vec_spec = pl.BlockSpec((1, cpout), lambda b_, i: (0, 0))

    # ---- stage 1: conv1 (3x3, pad 1) + per-channel [sum, sumsq] -----------
    if 9 * cin <= LANES:
        # Small Cin: ONE im2col GEMM with K = 9*Cin (padded to 128) instead of
        # 9 GEMMs each with K padded from Cin to 128.  The patches tensor is
        # no bigger than the channel-padded input would have been.
        kdim = LANES
        xsp = jnp.pad(x_nhwc, ((0, 0), (1, 1), (1, 1), (0, 0)))
        pats = jnp.concatenate(
            [xsp[:, ky:ky + h, kx:kx + w, :]
             for ky in range(3) for kx in range(3)], axis=-1)
        pats = jnp.pad(pats, ((0, 0), (0, 0), (0, 0),
                              (0, kdim - 9 * cin))).astype(jnp.bfloat16)
        w1m = jnp.transpose(params["w1"], (2, 3, 1, 0)).reshape(9 * cin, cout)
        w1m = jnp.pad(w1m, ((0, kdim - 9 * cin),
                            (0, cpout - cout))).astype(jnp.bfloat16)
        y1, stats1 = pl.pallas_call(
            _conv_im2col_kernel,
            grid=(n, nh),
            in_specs=[pl.BlockSpec((None, tile_h, w, kdim),
                                   lambda b_, i: (b_, i, 0, 0)),
                      pl.BlockSpec((kdim, cpout), lambda b_, i: (0, 0)),
                      vec_spec],
            out_specs=(pl.BlockSpec((None, tile_h, wp, cpout),
                                    lambda b_, i: (b_, i, 0, 0)),
                       pl.BlockSpec((None, None, 2, cpout),
                                    lambda b_, i: (b_, i, 0, 0))),
            out_shape=(jax.ShapeDtypeStruct((n, h, wp, cpout), jnp.bfloat16),
                       jax.ShapeDtypeStruct((n, nh, 2, cpout), jnp.float32)),
            compiler_params=cparams,
        )(pats, w1m, b1)
    else:
        w1r = _conv3_weight(params["w1"], cpin, cpout)
        y1, stats1 = _conv3x3_rows(x_p, w1r, b1, None, None, w_real=w,
                                   tile_h=tile_h, fuse_bn_relu=False)

    scale1, shift1 = _bn_scale_shift(stats1, gamma, beta, count)

    # ---- stage 2: BN1-apply + ReLU fused into conv2 (3x3, pad 1) ----------
    w2r = _conv3_weight(params["w2"], cpout, cpout)
    y2, stats2 = _conv3x3_rows(y1, w2r, b2, scale1, shift1, w_real=w,
                               tile_h=tile_h, fuse_bn_relu=True)
    scale2, shift2 = _bn_scale_shift(stats2, gamma, beta, count)

    # ---- stage 3: BN2-apply + 1x1 skip conv + residual add + final ReLU ---
    out_p = pl.pallas_call(
        _bn_skip_relu_kernel,
        grid=(n, nh),
        in_specs=[pl.BlockSpec((None, tile_h, w, cpout),
                               lambda b_, i: (b_, i, 0, 0)),   # y2 (WP-wide src)
                  pl.BlockSpec((None, tile_h, w, cpin),
                               lambda b_, i: (b_, i, 0, 0)),   # x  (WP-wide src)
                  pl.BlockSpec((cpin, cpout), lambda b_, i: (0, 0)),
                  vec_spec, vec_spec, vec_spec],
        out_specs=pl.BlockSpec((None, tile_h, w, cpout),
                               lambda b_, i: (b_, i, 0, 0)),
        out_shape=jax.ShapeDtypeStruct((n, h, w, cpout), jnp.bfloat16),
        compiler_params=cparams,
    )(y2, x_p, wsk, bsk, scale2, shift2)

    # Drop channel padding; slice + f32 cast + NCHW transpose fuse into one
    # XLA pass over the bf16 output.
    return jnp.transpose(out_p[..., :cout].astype(jnp.float32), (0, 3, 1, 2))


# ---------------------------------------------------------------------------
# Pure-JAX reference (correctness check only)
# ---------------------------------------------------------------------------
def reference_forward(x, p):
    def conv(x, w, b, pad):
        y = jax.lax.conv_general_dilated(
            x, w, (1, 1), [(pad, pad), (pad, pad)],
            dimension_numbers=("NCHW", "OIHW", "NCHW"))
        return y + b.reshape(1, -1, 1, 1)

    def bn(x, g, bt):
        mean = jnp.mean(x, axis=(0, 2, 3), keepdims=True)
        var = jnp.mean(jnp.square(x - mean), axis=(0, 2, 3), keepdims=True)
        return (x - mean) * jax.lax.rsqrt(var + BN_EPS) * g.reshape(1, -1, 1, 1) \
            + bt.reshape(1, -1, 1, 1)

    y = conv(x, p["w1"], p["b1"], 1)
    y = jnp.maximum(bn(y, p["gamma"], p["beta"]), 0.0)
    y = conv(y, p["w2"], p["b2"], 1)
    y = bn(y, p["gamma"], p["beta"])
    skip = conv(x, p["wsk"], p["bsk"], 0)
    return jnp.maximum(y + skip, 0.0)


if __name__ == "__main__":
    key = jax.random.PRNGKey(0)
    kx, kp = jax.random.split(key)

    N, CIN, COUT, H, W = 2, 4, 8, 16, 16
    x = jax.random.normal(kx, (N, CIN, H, W), jnp.float32)
    params = init_params(kp, CIN, COUT)

    out = jax.block_until_ready(identity_block_forward(x, params))
    assert out.shape == (N, COUT, H, W)

    ref = reference_forward(x, params)
    # bf16 MXU operands / bf16 inter-stage activations with f32 accumulation
    # and f32 BN statistics -> small rounding error vs. the f32 reference.
    np.testing.assert_allclose(np.asarray(out), np.asarray(ref),
                               atol=3e-2, rtol=3e-2)

    print("KERNEL_OK")
</pallas_src>

<mosaic_0001>
module attributes {stable_mosaic.version = 11 : i64} {
  func.func @_conv_im2col_kernel(%arg0: i32, %arg1: i32, %arg2: memref<1x8x16x128xbf16, #tpu.memory_space<vmem>>, %arg3: memref<128x128xbf16, #tpu.memory_space<vmem>>, %arg4: memref<1x128xf32, #tpu.memory_space<vmem>>, %arg5: memref<1x8x24x128xbf16, #tpu.memory_space<vmem>>, %arg6: memref<1x1x2x128xf32, #tpu.memory_space<vmem>>) attributes {dimension_semantics = [#tpu.dimension_semantics<parallel>, #tpu.dimension_semantics<parallel>], iteration_bounds = array<i64: 2, 2>, scalar_prefetch = 0 : i64, scratch_operands = 0 : i64, tpu.core_type = #tpu.core_type<tc>, window_params = [{transform_indices = @transform_0, window_bounds = array<i64: 1, 8, 16, 128>}, {pipeline_mode = #tpu.pipeline_mode<synchronous>, transform_indices = @transform_1, window_bounds = array<i64: 128, 128>}, {pipeline_mode = #tpu.pipeline_mode<synchronous>, transform_indices = @transform_2, window_bounds = array<i64: 1, 128>}, {transform_indices = @transform_3, window_bounds = array<i64: 1, 8, 24, 128>}, {transform_indices = @transform_4, window_bounds = array<i64: 1, 1, 2, 128>}]} {
    %c0 = arith.constant 0 : index
    %c0_0 = arith.constant 0 : index
    %c0_1 = arith.constant 0 : index
    %c0_2 = arith.constant 0 : index
    %0 = vector.load %arg2[%c0, %c0_0, %c0_1, %c0_2] : memref<1x8x16x128xbf16, #tpu.memory_space<vmem>>, vector<1x8x16x128xbf16>
    %1 = vector.shape_cast %0 : vector<1x8x16x128xbf16> to vector<8x16x128xbf16>
    %2 = vector.shape_cast %1 : vector<8x16x128xbf16> to vector<128x128xbf16>
    %c0_3 = arith.constant 0 : index
    %c0_4 = arith.constant 0 : index
    %3 = vector.load %arg3[%c0_3, %c0_4] : memref<128x128xbf16, #tpu.memory_space<vmem>>, vector<128x128xbf16>
    %cst = arith.constant dense<0.000000e+00> : vector<128x128xf32>
    %4 = tpu.matmul %2, %3, %cst {dimension_numbers = #tpu.dot_dimension_numbers<[1], [0], [0], [1], [0, 0, 1, 1], [], []>} : vector<128x128xbf16>, vector<128x128xbf16>, vector<128x128xf32> -> vector<128x128xf32>
    %c0_5 = arith.constant 0 : index
    %c0_6 = arith.constant 0 : index
    %5 = vector.load %arg4[%c0_5, %c0_6] : memref<1x128xf32, #tpu.memory_space<vmem>>, vector<1x128xf32>
    %6 = vector.broadcast %5 : vector<1x128xf32> to vector<128x128xf32>
    %7 = arith.addf %4, %6 : vector<128x128xf32>
    %8 = vector.shape_cast %7 : vector<128x128xf32> to vector<8x16x128xf32>
    %9 = arith.truncf %8 : vector<8x16x128xf32> to vector<8x16x128xbf16>
    %c0_7 = arith.constant 0 : index
    %c0_8 = arith.constant 0 : index
    %c0_9 = arith.constant 0 : index
    %c0_10 = arith.constant 0 : index
    %10 = vector.load %arg5[%c0_7, %c0_8, %c0_9, %c0_10] : memref<1x8x24x128xbf16, #tpu.memory_space<vmem>>, vector<1x8x16x128xbf16>
    %11 = vector.shape_cast %10 : vector<1x8x16x128xbf16> to vector<8x16x128xbf16>
    %12 = vector.shape_cast %9 : vector<8x16x128xbf16> to vector<1x8x16x128xbf16>
    tpu.vector_store %arg5[%c0_7, %c0_8, %c0_9, %c0_10], %12 {strides = array<i32>} : memref<1x8x24x128xbf16, #tpu.memory_space<vmem>>, vector<1x8x16x128xbf16>,
    %cst_11 = arith.constant 0.000000e+00 : bf16
    %13 = vector.broadcast %cst_11 : bf16 to vector<8x8x128xbf16>
    %c0_12 = arith.constant 0 : index
    %c0_13 = arith.constant 0 : index
    %c16 = arith.constant 16 : index
    %c0_14 = arith.constant 0 : index
    %14 = vector.load %arg5[%c0_12, %c0_13, %c16, %c0_14] : memref<1x8x24x128xbf16, #tpu.memory_space<vmem>>, vector<1x8x8x128xbf16>
    %15 = vector.shape_cast %14 : vector<1x8x8x128xbf16> to vector<8x8x128xbf16>
    %16 = vector.shape_cast %13 : vector<8x8x128xbf16> to vector<1x8x8x128xbf16>
    tpu.vector_store %arg5[%c0_12, %c0_13, %c16, %c0_14], %16 {strides = array<i32>} : memref<1x8x24x128xbf16, #tpu.memory_space<vmem>>, vector<1x8x8x128xbf16>,
    %cst_15 = arith.constant dense<0.000000e+00> : vector<128xf32>
    %17 = vector.multi_reduction <add>, %7, %cst_15 [0] : vector<128x128xf32> to vector<128xf32>
    %18 = vector.shape_cast %17 : vector<128xf32> to vector<1x128xf32>
    %19 = arith.mulf %7, %7 : vector<128x128xf32>
    %cst_16 = arith.constant dense<0.000000e+00> : vector<128xf32>
    %20 = vector.multi_reduction <add>, %19, %cst_16 [0] : vector<128x128xf32> to vector<128xf32>
    %21 = vector.shape_cast %20 : vector<128xf32> to vector<1x128xf32>
    %22 = tpu.concatenate %18, %21 in 0 : vector<1x128xf32>, vector<1x128xf32> -> vector<2x128xf32>
    %c0_17 = arith.constant 0 : index
    %c0_18 = arith.constant 0 : index
    %c0_19 = arith.constant 0 : index
    %c0_20 = arith.constant 0 : index
    %23 = vector.load %arg6[%c0_17, %c0_18, %c0_19, %c0_20] : memref<1x1x2x128xf32, #tpu.memory_space<vmem>>, vector<1x1x2x128xf32>
    %24 = vector.shape_cast %23 : vector<1x1x2x128xf32> to vector<2x128xf32>
    %25 = vector.shape_cast %22 : vector<2x128xf32> to vector<1x1x2x128xf32>
    tpu.vector_store %arg6[%c0_17, %c0_18, %c0_19, %c0_20], %25 {strides = array<i32>} : memref<1x1x2x128xf32, #tpu.memory_space<vmem>>, vector<1x1x2x128xf32>,
    return
  }
  func.func @transform_0(%arg0: i32, %arg1: i32) -> (i32, i32, i32, i32) {
    %c0_i32 = arith.constant 0 : i32
    %c0_i32_0 = arith.constant 0 : i32
    %c0_i32_1 = arith.constant 0 : i32
    return %arg0, %arg1, %c0_i32, %c0_i32_0 : i32, i32, i32, i32
  }
  func.func @transform_1(%arg0: i32, %arg1: i32) -> (i32, i32) {
    %c0_i32 = arith.constant 0 : i32
    %c0_i32_0 = arith.constant 0 : i32
    %c0_i32_1 = arith.constant 0 : i32
    return %c0_i32, %c0_i32_0 : i32, i32
  }
  func.func @transform_2(%arg0: i32, %arg1: i32) -> (i32, i32) {
    %c0_i32 = arith.constant 0 : i32
    %c0_i32_0 = arith.constant 0 : i32
    %c0_i32_1 = arith.constant 0 : i32
    return %c0_i32, %c0_i32_0 : i32, i32
  }
  func.func @transform_3(%arg0: i32, %arg1: i32) -> (i32, i32, i32, i32) {
    %c0_i32 = arith.constant 0 : i32
    %c0_i32_0 = arith.constant 0 : i32
    %c0_i32_1 = arith.constant 0 : i32
    return %arg0, %arg1, %c0_i32, %c0_i32_0 : i32, i32, i32, i32
  }
  func.func @transform_4(%arg0: i32, %arg1: i32) -> (i32, i32, i32, i32) {
    %c0_i32 = arith.constant 0 : i32
    %c0_i32_0 = arith.constant 0 : i32
    %c0_i32_1 = arith.constant 0 : i32
    return %arg0, %arg1, %c0_i32, %c0_i32_0 : i32, i32, i32, i32
  }
}

module attributes {stable_mosaic.version = 11 : i64} {
  func.func @_conv3x3_rows_kernel(%arg0: i32, %arg1: i32, %arg2: memref<1x1x24x128xbf16, #tpu.memory_space<vmem>>, %arg3: memref<1x8x24x128xbf16, #tpu.memory_space<vmem>>, %arg4: memref<1x1x24x128xbf16, #tpu.memory_space<vmem>>, %arg5: memref<9x128x128xbf16, #tpu.memory_space<vmem>>, %arg6: memref<1x128xf32, #tpu.memory_space<vmem>>, %arg7: memref<1x128xf32, #tpu.memory_space<vmem>>, %arg8: memref<1x128xf32, #tpu.memory_space<vmem>>, %arg9: memref<1x8x24x128xbf16, #tpu.memory_space<vmem>>, %arg10: memref<1x1x2x128xf32, #tpu.memory_space<vmem>>) attributes {dimension_semantics = [#tpu.dimension_semantics<parallel>, #tpu.dimension_semantics<parallel>], iteration_bounds = array<i64: 2, 2>, scalar_prefetch = 0 : i64, scratch_operands = 0 : i64, tpu.core_type = #tpu.core_type<tc>, window_params = [{transform_indices = @transform_0, window_bounds = array<i64: 1, 1, 24, 128>}, {transform_indices = @transform_1, window_bounds = array<i64: 1, 8, 24, 128>}, {transform_indices = @transform_2, window_bounds = array<i64: 1, 1, 24, 128>}, {pipeline_mode = #tpu.pipeline_mode<synchronous>, transform_indices = @transform_3, window_bounds = array<i64: 9, 128, 128>}, {pipeline_mode = #tpu.pipeline_mode<synchronous>, transform_indices = @transform_4, window_bounds = array<i64: 1, 128>}, {pipeline_mode = #tpu.pipeline_mode<synchronous>, transform_indices = @transform_5, window_bounds = array<i64: 1, 128>}, {pipeline_mode = #tpu.pipeline_mode<synchronous>, transform_indices = @transform_6, window_bounds = array<i64: 1, 128>}, {transform_indices = @transform_7, window_bounds = array<i64: 1, 8, 24, 128>}, {transform_indices = @transform_8, window_bounds = array<i64: 1, 1, 2, 128>}]} {
    %c0 = arith.constant 0 : index
    %c0_0 = arith.constant 0 : index
    %c0_1 = arith.constant 0 : index
    %c0_2 = arith.constant 0 : index
    %0 = vector.load %arg3[%c0, %c0_0, %c0_1, %c0_2] : memref<1x8x24x128xbf16, #tpu.memory_space<vmem>>, vector<1x8x24x128xbf16>
    %1 = vector.shape_cast %0 : vector<1x8x24x128xbf16> to vector<8x24x128xbf16>
    %2 = arith.extf %1 : vector<8x24x128xbf16> to vector<8x24x128xf32>
    %c0_3 = arith.constant 0 : index
    %c0_4 = arith.constant 0 : index
    %3 = vector.load %arg7[%c0_3, %c0_4] : memref<1x128xf32, #tpu.memory_space<vmem>>, vector<1x128xf32>
    %4 = vector.shape_cast %3 : vector<1x128xf32> to vector<1x1x128xf32>
    %5 = vector.broadcast %4 : vector<1x1x128xf32> to vector<8x24x128xf32>
    %6 = arith.mulf %2, %5 : vector<8x24x128xf32>
    %c0_5 = arith.constant 0 : index
    %c0_6 = arith.constant 0 : index
    %7 = vector.load %arg8[%c0_5, %c0_6] : memref<1x128xf32, #tpu.memory_space<vmem>>, vector<1x128xf32>
    %8 = vector.shape_cast %7 : vector<1x128xf32> to vector<1x1x128xf32>
    %9 = vector.broadcast %8 : vector<1x1x128xf32> to vector<8x24x128xf32>
    %10 = arith.addf %6, %9 : vector<8x24x128xf32>
    %cst = arith.constant 0.000000e+00 : f32
    %11 = vector.broadcast %cst : f32 to vector<8x24x128xf32>
    %12 = arith.maximumf %10, %11 : vector<8x24x128xf32>
    %13 = arith.truncf %12 : vector<8x24x128xf32> to vector<8x24x128xbf16>
    %c0_7 = arith.constant 0 : index
    %c0_8 = arith.constant 0 : index
    %c0_9 = arith.constant 0 : index
    %c0_10 = arith.constant 0 : index
    %14 = vector.load %arg2[%c0_7, %c0_8, %c0_9, %c0_10] : memref<1x1x24x128xbf16, #tpu.memory_space<vmem>>, vector<1x1x24x128xbf16>
    %15 = vector.shape_cast %14 : vector<1x1x24x128xbf16> to vector<1x24x128xbf16>
    %16 = arith.extf %15 : vector<1x24x128xbf16> to vector<1x24x128xf32>
    %c0_11 = arith.constant 0 : index
    %c0_12 = arith.constant 0 : index
    %17 = vector.load %arg7[%c0_11, %c0_12] : memref<1x128xf32, #tpu.memory_space<vmem>>, vector<1x128xf32>
    %18 = vector.shape_cast %17 : vector<1x128xf32> to vector<1x1x128xf32>
    %19 = vector.broadcast %18 : vector<1x1x128xf32> to vector<1x24x128xf32>
    %20 = arith.mulf %16, %19 : vector<1x24x128xf32>
    %c0_13 = arith.constant 0 : index
    %c0_14 = arith.constant 0 : index
    %21 = vector.load %arg8[%c0_13, %c0_14] : memref<1x128xf32, #tpu.memory_space<vmem>>, vector<1x128xf32>
    %22 = vector.shape_cast %21 : vector<1x128xf32> to vector<1x1x128xf32>
    %23 = vector.broadcast %22 : vector<1x1x128xf32> to vector<1x24x128xf32>
    %24 = arith.addf %20, %23 : vector<1x24x128xf32>
    %cst_15 = arith.constant 0.000000e+00 : f32
    %25 = vector.broadcast %cst_15 : f32 to vector<1x24x128xf32>
    %26 = arith.maximumf %24, %25 : vector<1x24x128xf32>
    %27 = arith.truncf %26 : vector<1x24x128xf32> to vector<1x24x128xbf16>
    %c0_i32 = arith.constant 0 : i32
    %28 = arith.cmpi sgt, %arg1, %c0_i32 : i32
    %cst_16 = arith.constant 0.000000e+00 : bf16
    %29 = vector.broadcast %cst_16 : bf16 to vector<1x24x128xbf16>
    %30 = arith.select %28, %27, %29 : vector<1x24x128xbf16>
    %c0_17 = arith.constant 0 : index
    %c0_18 = arith.constant 0 : index
    %c0_19 = arith.constant 0 : index
    %c0_20 = arith.constant 0 : index
    %31 = vector.load %arg4[%c0_17, %c0_18, %c0_19, %c0_20] : memref<1x1x24x128xbf16, #tpu.memory_space<vmem>>, vector<1x1x24x128xbf16>
    %32 = vector.shape_cast %31 : vector<1x1x24x128xbf16> to vector<1x24x128xbf16>
    %33 = arith.extf %32 : vector<1x24x128xbf16> to vector<1x24x128xf32>
    %c0_21 = arith.constant 0 : index
    %c0_22 = arith.constant 0 : index
    %34 = vector.load %arg7[%c0_21, %c0_22] : memref<1x128xf32, #tpu.memory_space<vmem>>, vector<1x128xf32>
    %35 = vector.shape_cast %34 : vector<1x128xf32> to vector<1x1x128xf32>
    %36 = vector.broadcast %35 : vector<1x1x128xf32> to vector<1x24x128xf32>
    %37 = arith.mulf %33, %36 : vector<1x24x128xf32>
    %c0_23 = arith.constant 0 : index
    %c0_24 = arith.constant 0 : index
    %38 = vector.load %arg8[%c0_23, %c0_24] : memref<1x128xf32, #tpu.memory_space<vmem>>, vector<1x128xf32>
    %39 = vector.shape_cast %38 : vector<1x128xf32> to vector<1x1x128xf32>
    %40 = vector.broadcast %39 : vector<1x1x128xf32> to vector<1x24x128xf32>
    %41 = arith.addf %37, %40 : vector<1x24x128xf32>
    %cst_25 = arith.constant 0.000000e+00 : f32
    %42 = vector.broadcast %cst_25 : f32 to vector<1x24x128xf32>
    %43 = arith.maximumf %41, %42 : vector<1x24x128xf32>
    %44 = arith.truncf %43 : vector<1x24x128xf32> to vector<1x24x128xbf16>
    %c1_i32 = arith.constant 1 : i32
    %45 = arith.cmpi slt, %arg1, %c1_i32 : i32
    %cst_26 = arith.constant 0.000000e+00 : bf16
    %46 = vector.broadcast %cst_26 : bf16 to vector<1x24x128xbf16>
    %47 = arith.select %45, %44, %46 : vector<1x24x128xbf16>
    %cst_27 = arith.constant 0.000000e+00 : bf16
    %48 = vector.broadcast %cst_27 : bf16 to vector<1x24x128xbf16>
    %49 = tpu.concatenate %48, %30, %13, %47, %48 in 0 : vector<1x24x128xbf16>, vector<1x24x128xbf16>, vector<8x24x128xbf16>, vector<1x24x128xbf16>, vector<1x24x128xbf16> -> vector<12x24x128xbf16>
    %50 = tpu.iota {dimensions = array<i32: 1>} : vector<12x24x128xi32>
    %c16_i32 = arith.constant 16 : i32
    %51 = vector.broadcast %c16_i32 : i32 to vector<12x24x128xi32>
    %52 = arith.cmpi slt, %50, %51 : vector<12x24x128xi32>
    %cst_28 = arith.constant 0.000000e+00 : bf16
    %53 = vector.broadcast %cst_28 : bf16 to vector<12x24x128xbf16>
    %54 = arith.select %52, %49, %53 : vector<12x24x128xi1>, vector<12x24x128xbf16>
    %55 = vector.shape_cast %54 : vector<12x24x128xbf16> to vector<288x128xbf16>
    %cst_29 = arith.constant 0.000000e+00 : f32
    %56 = vector.broadcast %cst_29 : f32 to vector<192x128xf32>
    %57 = vector.extract_strided_slice %55 {offsets = [23, 0], sizes = [192, 128], strides = [1, 1]} : vector<288x128xbf16> to vector<192x128xbf16>
    %c0_30 = arith.constant 0 : index
    %c0_31 = arith.constant 0 : index
    %c0_32 = arith.constant 0 : index
    %58 = vector.load %arg5[%c0_30, %c0_31, %c0_32] : memref<9x128x128xbf16, #tpu.memory_space<vmem>>, vector<1x128x128xbf16>
    %59 = vector.shape_cast %58 : vector<1x128x128xbf16> to vector<128x128xbf16>
    %cst_33 = arith.constant dense<0.000000e+00> : vector<192x128xf32>
    %60 = tpu.matmul %57, %59, %cst_33 {dimension_numbers = #tpu.dot_dimension_numbers<[1], [0], [0], [1], [0, 0, 1, 1], [], []>} : vector<192x128xbf16>, vector<128x128xbf16>, vector<192x128xf32> -> vector<192x128xf32>
    %61 = arith.addf %56, %60 : vector<192x128xf32>
    %62 = vector.extract_strided_slice %55 {offsets = [24, 0], sizes = [192, 128], strides = [1, 1]} : vector<288x128xbf16> to vector<192x128xbf16>
    %c1 = arith.constant 1 : index
    %c0_34 = arith.constant 0 : index
    %c0_35 = arith.constant 0 : index
    %63 = vector.load %arg5[%c1, %c0_34, %c0_35] : memref<9x128x128xbf16, #tpu.memory_space<vmem>>, vector<1x128x128xbf16>
    %64 = vector.shape_cast %63 : vector<1x128x128xbf16> to vector<128x128xbf16>
    %cst_36 = arith.constant dense<0.000000e+00> : vector<192x128xf32>
    %65 = tpu.matmul %62, %64, %cst_36 {dimension_numbers = #tpu.dot_dimension_numbers<[1], [0], [0], [1], [0, 0, 1, 1], [], []>} : vector<192x128xbf16>, vector<128x128xbf16>, vector<192x128xf32> -> vector<192x128xf32>
    %66 = arith.addf %61, %65 : vector<192x128xf32>
    %67 = vector.extract_strided_slice %55 {offsets = [25, 0], sizes = [192, 128], strides = [1, 1]} : vector<288x128xbf16> to vector<192x128xbf16>
    %c2 = arith.constant 2 : index
    %c0_37 = arith.constant 0 : index
    %c0_38 = arith.constant 0 : index
    %68 = vector.load %arg5[%c2, %c0_37, %c0_38] : memref<9x128x128xbf16, #tpu.memory_space<vmem>>, vector<1x128x128xbf16>
    %69 = vector.shape_cast %68 : vector<1x128x128xbf16> to vector<128x128xbf16>
    %cst_39 = arith.constant dense<0.000000e+00> : vector<192x128xf32>
    %70 = tpu.matmul %67, %69, %cst_39 {dimension_numbers = #tpu.dot_dimension_numbers<[1], [0], [0], [1], [0, 0, 1, 1], [], []>} : vector<192x128xbf16>, vector<128x128xbf16>, vector<192x128xf32> -> vector<192x128xf32>
    %71 = arith.addf %66, %70 : vector<192x128xf32>
    %72 = vector.extract_strided_slice %55 {offsets = [47, 0], sizes = [192, 128], strides = [1, 1]} : vector<288x128xbf16> to vector<192x128xbf16>
    %c3 = arith.constant 3 : index
    %c0_40 = arith.constant 0 : index
    %c0_41 = arith.constant 0 : index
    %73 = vector.load %arg5[%c3, %c0_40, %c0_41] : memref<9x128x128xbf16, #tpu.memory_space<vmem>>, vector<1x128x128xbf16>
    %74 = vector.shape_cast %73 : vector<1x128x128xbf16> to vector<128x128xbf16>
    %cst_42 = arith.constant dense<0.000000e+00> : vector<192x128xf32>
    %75 = tpu.matmul %72, %74, %cst_42 {dimension_numbers = #tpu.dot_dimension_numbers<[1], [0], [0], [1], [0, 0, 1, 1], [], []>} : vector<192x128xbf16>, vector<128x128xbf16>, vector<192x128xf32> -> vector<192x128xf32>
    %76 = arith.addf %71, %75 : vector<192x128xf32>
    %77 = vector.extract_strided_slice %55 {offsets = [48, 0], sizes = [192, 128], strides = [1, 1]} : vector<288x128xbf16> to vector<192x128xbf16>
    %c4 = arith.constant 4 : index
    %c0_43 = arith.constant 0 : index
    %c0_44 = arith.constant 0 : index
    %78 = vector.load %arg5[%c4, %c0_43, %c0_44] : memref<9x128x128xbf16, #tpu.memory_space<vmem>>, vector<1x128x128xbf16>
    %79 = vector.shape_cast %78 : vector<1x128x128xbf16> to vector<128x128xbf16>
    %cst_45 = arith.constant dense<0.000000e+00> : vector<192x128xf32>
    %80 = tpu.matmul %77, %79, %cst_45 {dimension_numbers = #tpu.dot_dimension_numbers<[1], [0], [0], [1], [0, 0, 1, 1], [], []>} : vector<192x128xbf16>, vector<128x128xbf16>, vector<192x128xf32> -> vector<192x128xf32>
    %81 = arith.addf %76, %80 : vector<192x128xf32>
    %82 = vector.extract_strided_slice %55 {offsets = [49, 0], sizes = [192, 128], strides = [1, 1]} : vector<288x128xbf16> to vector<192x128xbf16>
    %c5 = arith.constant 5 : index
    %c0_46 = arith.constant 0 : index
    %c0_47 = arith.constant 0 : index
    %83 = vector.load %arg5[%c5, %c0_46, %c0_47] : memref<9x128x128xbf16, #tpu.memory_space<vmem>>, vector<1x128x128xbf16>
    %84 = vector.shape_cast %83 : vector<1x128x128xbf16> to vector<128x128xbf16>
    %cst_48 = arith.constant dense<0.000000e+00> : vector<192x128xf32>
    %85 = tpu.matmul %82, %84, %cst_48 {dimension_numbers = #tpu.dot_dimension_numbers<[1], [0], [0], [1], [0, 0, 1, 1], [], []>} : vector<192x128xbf16>, vector<128x128xbf16>, vector<192x128xf32> -> vector<192x128xf32>
    %86 = arith.addf %81, %85 : vector<192x128xf32>
    %87 = vector.extract_strided_slice %55 {offsets = [71, 0], sizes = [192, 128], strides = [1, 1]} : vector<288x128xbf16> to vector<192x128xbf16>
    %c6 = arith.constant 6 : index
    %c0_49 = arith.constant 0 : index
    %c0_50 = arith.constant 0 : index
    %88 = vector.load %arg5[%c6, %c0_49, %c0_50] : memref<9x128x128xbf16, #tpu.memory_space<vmem>>, vector<1x128x128xbf16>
    %89 = vector.shape_cast %88 : vector<1x128x128xbf16> to vector<128x128xbf16>
    %cst_51 = arith.constant dense<0.000000e+00> : vector<192x128xf32>
    %90 = tpu.matmul %87, %89, %cst_51 {dimension_numbers = #tpu.dot_dimension_numbers<[1], [0], [0], [1], [0, 0, 1, 1], [], []>} : vector<192x128xbf16>, vector<128x128xbf16>, vector<192x128xf32> -> vector<192x128xf32>
    %91 = arith.addf %86, %90 : vector<192x128xf32>
    %92 = vector.extract_strided_slice %55 {offsets = [72, 0], sizes = [192, 128], strides = [1, 1]} : vector<288x128xbf16> to vector<192x128xbf16>
    %c7 = arith.constant 7 : index
    %c0_52 = arith.constant 0 : index
    %c0_53 = arith.constant 0 : index
    %93 = vector.load %arg5[%c7, %c0_52, %c0_53] : memref<9x128x128xbf16, #tpu.memory_space<vmem>>, vector<1x128x128xbf16>
    %94 = vector.shape_cast %93 : vector<1x128x128xbf16> to vector<128x128xbf16>
    %cst_54 = arith.constant dense<0.000000e+00> : vector<192x128xf32>
    %95 = tpu.matmul %92, %94, %cst_54 {dimension_numbers = #tpu.dot_dimension_numbers<[1], [0], [0], [1], [0, 0, 1, 1], [], []>} : vector<192x128xbf16>, vector<128x128xbf16>, vector<192x128xf32> -> vector<192x128xf32>
    %96 = arith.addf %91, %95 : vector<192x128xf32>
    %97 = vector.extract_strided_slice %55 {offsets = [73, 0], sizes = [192, 128], strides = [1, 1]} : vector<288x128xbf16> to vector<192x128xbf16>
    %c8 = arith.constant 8 : index
    %c0_55 = arith.constant 0 : index
    %c0_56 = arith.constant 0 : index
    %98 = vector.load %arg5[%c8, %c0_55, %c0_56] : memref<9x128x128xbf16, #tpu.memory_space<vmem>>, vector<1x128x128xbf16>
    %99 = vector.shape_cast %98 : vector<1x128x128xbf16> to vector<128x128xbf16>
    %cst_57 = arith.constant dense<0.000000e+00> : vector<192x128xf32>
    %100 = tpu.matmul %97, %99, %cst_57 {dimension_numbers = #tpu.dot_dimension_numbers<[1], [0], [0], [1], [0, 0, 1, 1], [], []>} : vector<192x128xbf16>, vector<128x128xbf16>, vector<192x128xf32> -> vector<192x128xf32>
    %101 = arith.addf %96, %100 : vector<192x128xf32>
    %c0_58 = arith.constant 0 : index
    %c0_59 = arith.constant 0 : index
    %102 = vector.load %arg6[%c0_58, %c0_59] : memref<1x128xf32, #tpu.memory_space<vmem>>, vector<1x128xf32>
    %103 = vector.broadcast %102 : vector<1x128xf32> to vector<192x128xf32>
    %104 = arith.addf %101, %103 : vector<192x128xf32>
    %105 = vector.shape_cast %104 : vector<192x128xf32> to vector<8x24x128xf32>
    %106 = vector.extract_strided_slice %105 {offsets = [0, 0, 0], sizes = [8, 16, 128], strides = [1, 1, 1]} : vector<8x24x128xf32> to vector<8x16x128xf32>
    %107 = arith.truncf %106 : vector<8x16x128xf32> to vector<8x16x128xbf16>
    %c0_60 = arith.constant 0 : index
    %c0_61 = arith.constant 0 : index
    %c0_62 = arith.constant 0 : index
    %c0_63 = arith.constant 0 : index
    %108 = vector.load %arg9[%c0_60, %c0_61, %c0_62, %c0_63] : memref<1x8x24x128xbf16, #tpu.memory_space<vmem>>, vector<1x8x16x128xbf16>
    %109 = vector.shape_cast %108 : vector<1x8x16x128xbf16> to vector<8x16x128xbf16>
    %110 = vector.shape_cast %107 : vector<8x16x128xbf16> to vector<1x8x16x128xbf16>
    tpu.vector_store %arg9[%c0_60, %c0_61, %c0_62, %c0_63], %110 {strides = array<i32>} : memref<1x8x24x128xbf16, #tpu.memory_space<vmem>>, vector<1x8x16x128xbf16>,
    %cst_64 = arith.constant 0.000000e+00 : bf16
    %111 = vector.broadcast %cst_64 : bf16 to vector<8x8x128xbf16>
    %c0_65 = arith.constant 0 : index
    %c0_66 = arith.constant 0 : index
    %c16 = arith.constant 16 : index
    %c0_67 = arith.constant 0 : index
    %112 = vector.load %arg9[%c0_65, %c0_66, %c16, %c0_67] : memref<1x8x24x128xbf16, #tpu.memory_space<vmem>>, vector<1x8x8x128xbf16>
    %113 = vector.shape_cast %112 : vector<1x8x8x128xbf16> to vector<8x8x128xbf16>
    %114 = vector.shape_cast %111 : vector<8x8x128xbf16> to vector<1x8x8x128xbf16>
    tpu.vector_store %arg9[%c0_65, %c0_66, %c16, %c0_67], %114 {strides = array<i32>} : memref<1x8x24x128xbf16, #tpu.memory_space<vmem>>, vector<1x8x8x128xbf16>,
    %115 = vector.shape_cast %106 : vector<8x16x128xf32> to vector<128x128xf32>
    %cst_68 = arith.constant dense<0.000000e+00> : vector<128xf32>
    %116 = vector.multi_reduction <add>, %115, %cst_68 [0] : vector<128x128xf32> to vector<128xf32>
    %117 = vector.shape_cast %116 : vector<128xf32> to vector<1x128xf32>
    %118 = arith.mulf %115, %115 : vector<128x128xf32>
    %cst_69 = arith.constant dense<0.000000e+00> : vector<128xf32>
    %119 = vector.multi_reduction <add>, %118, %cst_69 [0] : vector<128x128xf32> to vector<128xf32>
    %120 = vector.shape_cast %119 : vector<128xf32> to vector<1x128xf32>
    %121 = tpu.concatenate %117, %120 in 0 : vector<1x128xf32>, vector<1x128xf32> -> vector<2x128xf32>
    %c0_70 = arith.constant 0 : index
    %c0_71 = arith.constant 0 : index
    %c0_72 = arith.constant 0 : index
    %c0_73 = arith.constant 0 : index
    %122 = vector.load %arg10[%c0_70, %c0_71, %c0_72, %c0_73] : memref<1x1x2x128xf32, #tpu.memory_space<vmem>>, vector<1x1x2x128xf32>
    %123 = vector.shape_cast %122 : vector<1x1x2x128xf32> to vector<2x128xf32>
    %124 = vector.shape_cast %121 : vector<2x128xf32> to vector<1x1x2x128xf32>
    tpu.vector_store %arg10[%c0_70, %c0_71, %c0_72, %c0_73], %124 {strides = array<i32>} : memref<1x1x2x128xf32, #tpu.memory_space<vmem>>, vector<1x1x2x128xf32>,
    return
  }
  func.func @transform_0(%arg0: i32, %arg1: i32) -> (i32, i32, i32, i32) {
    %c8_i32 = arith.constant 8 : i32
    %0 = arith.muli %arg1, %c8_i32 : i32
    %c1_i32 = arith.constant 1 : i32
    %1 = arith.subi %0, %c1_i32 : i32
    %c0_i32 = arith.constant 0 : i32
    %2 = arith.maxsi %1, %c0_i32 : i32
    %c0_i32_0 = arith.constant 0 : i32
    %c0_i32_1 = arith.constant 0 : i32
    %c0_i32_2 = arith.constant 0 : i32
    return %arg0, %2, %c0_i32_0, %c0_i32_1 : i32, i32, i32, i32
  }
  func.func @transform_1(%arg0: i32, %arg1: i32) -> (i32, i32, i32, i32) {
    %c0_i32 = arith.constant 0 : i32
    %c0_i32_0 = arith.constant 0 : i32
    %c0_i32_1 = arith.constant 0 : i32
    return %arg0, %arg1, %c0_i32, %c0_i32_0 : i32, i32, i32, i32
  }
  func.func @transform_2(%arg0: i32, %arg1: i32) -> (i32, i32, i32, i32) {
    %c8_i32 = arith.constant 8 : i32
    %0 = arith.muli %arg1, %c8_i32 : i32
    %c8_i32_0 = arith.constant 8 : i32
    %1 = arith.addi %0, %c8_i32_0 : i32
    %c15_i32 = arith.constant 15 : i32
    %2 = arith.minsi %1, %c15_i32 : i32
    %c0_i32 = arith.constant 0 : i32
    %c0_i32_1 = arith.constant 0 : i32
    %c0_i32_2 = arith.constant 0 : i32
    return %arg0, %2, %c0_i32, %c0_i32_1 : i32, i32, i32, i32
  }
  func.func @transform_3(%arg0: i32, %arg1: i32) -> (i32, i32, i32) {
    %c0_i32 = arith.constant 0 : i32
    %c0_i32_0 = arith.constant 0 : i32
    %c0_i32_1 = arith.constant 0 : i32
    %c0_i32_2 = arith.constant 0 : i32
    return %c0_i32, %c0_i32_0, %c0_i32_1 : i32, i32, i32
  }
  func.func @transform_4(%arg0: i32, %arg1: i32) -> (i32, i32) {
    %c0_i32 = arith.constant 0 : i32
    %c0_i32_0 = arith.constant 0 : i32
    %c0_i32_1 = arith.constant 0 : i32
    return %c0_i32, %c0_i32_0 : i32, i32
  }
  func.func @transform_5(%arg0: i32, %arg1: i32) -> (i32, i32) {
    %c0_i32 = arith.constant 0 : i32
    %c0_i32_0 = arith.constant 0 : i32
    %c0_i32_1 = arith.constant 0 : i32
    return %c0_i32, %c0_i32_0 : i32, i32
  }
  func.func @transform_6(%arg0: i32, %arg1: i32) -> (i32, i32) {
    %c0_i32 = arith.constant 0 : i32
    %c0_i32_0 = arith.constant 0 : i32
    %c0_i32_1 = arith.constant 0 : i32
    return %c0_i32, %c0_i32_0 : i32, i32
  }
  func.func @transform_7(%arg0: i32, %arg1: i32) -> (i32, i32, i32, i32) {
    %c0_i32 = arith.constant 0 : i32
    %c0_i32_0 = arith.constant 0 : i32
    %c0_i32_1 = arith.constant 0 : i32
    return %arg0, %arg1, %c0_i32, %c0_i32_0 : i32, i32, i32, i32
  }
  func.func @transform_8(%arg0: i32, %arg1: i32) -> (i32, i32, i32, i32) {
    %c0_i32 = arith.constant 0 : i32
    %c0_i32_0 = arith.constant 0 : i32
    %c0_i32_1 = arith.constant 0 : i32
    return %arg0, %arg1, %c0_i32, %c0_i32_0 : i32, i32, i32, i32
  }
}

module attributes {stable_mosaic.version = 11 : i64} {
  func.func @_bn_skip_relu_kernel(%arg0: i32, %arg1: i32, %arg2: memref<1x8x16x128xbf16, #tpu.memory_space<vmem>>, %arg3: memref<1x8x16x128xbf16, #tpu.memory_space<vmem>>, %arg4: memref<128x128xbf16, #tpu.memory_space<vmem>>, %arg5: memref<1x128xf32, #tpu.memory_space<vmem>>, %arg6: memref<1x128xf32, #tpu.memory_space<vmem>>, %arg7: memref<1x128xf32, #tpu.memory_space<vmem>>, %arg8: memref<1x8x16x128xbf16, #tpu.memory_space<vmem>>) attributes {dimension_semantics = [#tpu.dimension_semantics<parallel>, #tpu.dimension_semantics<parallel>], iteration_bounds = array<i64: 2, 2>, scalar_prefetch = 0 : i64, scratch_operands = 0 : i64, tpu.core_type = #tpu.core_type<tc>, window_params = [{transform_indices = @transform_0, window_bounds = array<i64: 1, 8, 16, 128>}, {transform_indices = @transform_1, window_bounds = array<i64: 1, 8, 16, 128>}, {pipeline_mode = #tpu.pipeline_mode<synchronous>, transform_indices = @transform_2, window_bounds = array<i64: 128, 128>}, {pipeline_mode = #tpu.pipeline_mode<synchronous>, transform_indices = @transform_3, window_bounds = array<i64: 1, 128>}, {pipeline_mode = #tpu.pipeline_mode<synchronous>, transform_indices = @transform_4, window_bounds = array<i64: 1, 128>}, {pipeline_mode = #tpu.pipeline_mode<synchronous>, transform_indices = @transform_5, window_bounds = array<i64: 1, 128>}, {transform_indices = @transform_6, window_bounds = array<i64: 1, 8, 16, 128>}]} {
    %c0 = arith.constant 0 : index
    %c0_0 = arith.constant 0 : index
    %c0_1 = arith.constant 0 : index
    %c0_2 = arith.constant 0 : index
    %0 = vector.load %arg3[%c0, %c0_0, %c0_1, %c0_2] : memref<1x8x16x128xbf16, #tpu.memory_space<vmem>>, vector<1x8x16x128xbf16>
    %1 = vector.shape_cast %0 : vector<1x8x16x128xbf16> to vector<8x16x128xbf16>
    %2 = vector.shape_cast %1 : vector<8x16x128xbf16> to vector<128x128xbf16>
    %c0_3 = arith.constant 0 : index
    %c0_4 = arith.constant 0 : index
    %3 = vector.load %arg4[%c0_3, %c0_4] : memref<128x128xbf16, #tpu.memory_space<vmem>>, vector<128x128xbf16>
    %cst = arith.constant dense<0.000000e+00> : vector<128x128xf32>
    %4 = tpu.matmul %2, %3, %cst {dimension_numbers = #tpu.dot_dimension_numbers<[1], [0], [0], [1], [0, 0, 1, 1], [], []>} : vector<128x128xbf16>, vector<128x128xbf16>, vector<128x128xf32> -> vector<128x128xf32>
    %c0_5 = arith.constant 0 : index
    %c0_6 = arith.constant 0 : index
    %5 = vector.load %arg5[%c0_5, %c0_6] : memref<1x128xf32, #tpu.memory_space<vmem>>, vector<1x128xf32>
    %6 = vector.broadcast %5 : vector<1x128xf32> to vector<128x128xf32>
    %7 = arith.addf %4, %6 : vector<128x128xf32>
    %c0_7 = arith.constant 0 : index
    %c0_8 = arith.constant 0 : index
    %c0_9 = arith.constant 0 : index
    %c0_10 = arith.constant 0 : index
    %8 = vector.load %arg2[%c0_7, %c0_8, %c0_9, %c0_10] : memref<1x8x16x128xbf16, #tpu.memory_space<vmem>>, vector<1x8x16x128xbf16>
    %9 = vector.shape_cast %8 : vector<1x8x16x128xbf16> to vector<8x16x128xbf16>
    %10 = arith.extf %9 : vector<8x16x128xbf16> to vector<8x16x128xf32>
    %11 = vector.shape_cast %10 : vector<8x16x128xf32> to vector<128x128xf32>
    %c0_11 = arith.constant 0 : index
    %c0_12 = arith.constant 0 : index
    %12 = vector.load %arg6[%c0_11, %c0_12] : memref<1x128xf32, #tpu.memory_space<vmem>>, vector<1x128xf32>
    %13 = vector.broadcast %12 : vector<1x128xf32> to vector<128x128xf32>
    %14 = arith.mulf %11, %13 : vector<128x128xf32>
    %c0_13 = arith.constant 0 : index
    %c0_14 = arith.constant 0 : index
    %15 = vector.load %arg7[%c0_13, %c0_14] : memref<1x128xf32, #tpu.memory_space<vmem>>, vector<1x128xf32>
    %16 = vector.broadcast %15 : vector<1x128xf32> to vector<128x128xf32>
    %17 = arith.addf %14, %16 : vector<128x128xf32>
    %18 = arith.addf %17, %7 : vector<128x128xf32>
    %cst_15 = arith.constant 0.000000e+00 : f32
    %19 = vector.broadcast %cst_15 : f32 to vector<128x128xf32>
    %20 = arith.maximumf %18, %19 : vector<128x128xf32>
    %21 = vector.shape_cast %20 : vector<128x128xf32> to vector<8x16x128xf32>
    %22 = arith.truncf %21 : vector<8x16x128xf32> to vector<8x16x128xbf16>
    %c0_16 = arith.constant 0 : index
    %c0_17 = arith.constant 0 : index
    %c0_18 = arith.constant 0 : index
    %c0_19 = arith.constant 0 : index
    %23 = vector.load %arg8[%c0_16, %c0_17, %c0_18, %c0_19] : memref<1x8x16x128xbf16, #tpu.memory_space<vmem>>, vector<1x8x16x128xbf16>
    %24 = vector.shape_cast %23 : vector<1x8x16x128xbf16> to vector<8x16x128xbf16>
    %25 = vector.shape_cast %22 : vector<8x16x128xbf16> to vector<1x8x16x128xbf16>
    tpu.vector_store %arg8[%c0_16, %c0_17, %c0_18, %c0_19], %25 {strides = array<i32>} : memref<1x8x16x128xbf16, #tpu.memory_space<vmem>>, vector<1x8x16x128xbf16>,
    return
  }
  func.func @transform_0(%arg0: i32, %arg1: i32) -> (i32, i32, i32, i32) {
    %c0_i32 = arith.constant 0 : i32
    %c0_i32_0 = arith.constant 0 : i32
    %c0_i32_1 = arith.constant 0 : i32
    return %arg0, %arg1, %c0_i32, %c0_i32_0 : i32, i32, i32, i32
  }
  func.func @transform_1(%arg0: i32, %arg1: i32) -> (i32, i32, i32, i32) {
    %c0_i32 = arith.constant 0 : i32
    %c0_i32_0 = arith.constant 0 : i32
    %c0_i32_1 = arith.constant 0 : i32
    return %arg0, %arg1, %c0_i32, %c0_i32_0 : i32, i32, i32, i32
  }
  func.func @transform_2(%arg0: i32, %arg1: i32) -> (i32, i32) {
    %c0_i32 = arith.constant 0 : i32
    %c0_i32_0 = arith.constant 0 : i32
    %c0_i32_1 = arith.constant 0 : i32
    return %c0_i32, %c0_i32_0 : i32, i32
  }
  func.func @transform_3(%arg0: i32, %arg1: i32) -> (i32, i32) {
    %c0_i32 = arith.constant 0 : i32
    %c0_i32_0 = arith.constant 0 : i32
    %c0_i32_1 = arith.constant 0 : i32
    return %c0_i32, %c0_i32_0 : i32, i32
  }
  func.func @transform_4(%arg0: i32, %arg1: i32) -> (i32, i32) {
    %c0_i32 = arith.constant 0 : i32
    %c0_i32_0 = arith.constant 0 : i32
    %c0_i32_1 = arith.constant 0 : i32
    return %c0_i32, %c0_i32_0 : i32, i32
  }
  func.func @transform_5(%arg0: i32, %arg1: i32) -> (i32, i32) {
    %c0_i32 = arith.constant 0 : i32
    %c0_i32_0 = arith.constant 0 : i32
    %c0_i32_1 = arith.constant 0 : i32
    return %c0_i32, %c0_i32_0 : i32, i32
  }
  func.func @transform_6(%arg0: i32, %arg1: i32) -> (i32, i32, i32, i32) {
    %c0_i32 = arith.constant 0 : i32
    %c0_i32_0 = arith.constant 0 : i32
    %c0_i32_1 = arith.constant 0 : i32
    return %arg0, %arg1, %c0_i32, %c0_i32_0 : i32, i32, i32, i32
  }
}

</mosaic_0001>

<bundles_post_ra>
// kernel: identity_block_forward.3
= control target key start
LH: loop header
LB: loop body
LE: loop exit
PB: predicated region body
PF: predicated region fallthrough
CT: control target
= control target key end

     0   :  { %s1067_s15 = smov 0   ;;  %s1069_s16 = smov 0   ;;  %s1228_s0 = inlined_call_operand.vmem [shape: bf16[2,16,16,128], index: 0, kind: input, shape index: {}]   ;;  %s1229_s1 = inlined_call_operand.vmem [shape: bf16[128,128], index: 1, kind: input, shape index: {}]   ;;  %s1230_s2 = inlined_call_operand.vmem [shape: f32[1,128], index: 2, kind: input, shape index: {}]   ;;  %s1231_s3 = inlined_call_operand.vmem [shape: bf16[2,16,24,128], index: 3, kind: output, shape index: {0}]   ;;  %s1232_s4 = inlined_call_operand.vmem [shape: f32[2,2,2,128], index: 4, kind: output, shape index: {1}]  }
   0x1   :  { %s1071_s17 = smov 0   ;;  %s1073_s18 = smov 0  }
   0x2   :  { %s1075_s19 = smov 0  }
   0x3 LB: > { %s24_s20 = sadd.s32 1, %s1031_s17  ;;  %s27_s21 = sadd.s32 1, %s1035_s18  ;;  %s1039_s19 = sphi %s1075_s19, %s15_s19   ;;  %s1035_s18 = sphi %s1073_s18, %s1236_s18   ;;  %s1031_s17 = sphi %s1071_s17, %s1235_s17   ;;  %s1027_s16 = sphi %s1069_s16, %s1234_s16   ;;  %s1023_s15 = sphi %s1067_s15, %s1233_s15  }
   0x4   : > { %p25_p0 = scmp.ge.s32.totalorder %s24_s20, 2  ;;  %p795_p1 = scmp.ge.s32.totalorder %s1039_s19, 1 }
   0x5   : > { %p189_p2 = scmp.lt.s32.totalorder %s1039_s19, 5 }
   0x6   : > { %s1238_s20 = smov (%p25_p0, %s24_s20), 0  ;;  %s1240_s21 = smov (!%p25_p0, %s27_s21), %s1035_s18 }
   0x7   : > { %p190_p3 = pnand %p795_p1, %p189_p2  ;;  %p29_p4 = scmp.ge.s32.totalorder %s1240_s21, 2 }
   0x8   : > { %v985_v0 = vld [vmem:[%s1229_s1] sm:$0xff] (!%p190_p3)   ;;  %s796_s24 = sshll.u32 (!%p190_p3), %s1023_s15, 3  ;;  %v986_v1 = vld [vmem:[%s1229_s1 + $0x8] sm:$0xff] (!%p190_p3)   ;;  %p234_p5 = scmp.lt.s32.totalorder (!%p190_p3), %s1027_s16, 1  ;;  %v987_v2 = vld [vmem:[%s1229_s1 + $0x10] sm:$0xff] (!%p190_p3)   ;;  %v1041_v6 = vmov (!%p190_p3), 0  }
   0x9   : > { %s1242_s21 = smov (%p29_p4, %s1240_s21), 0  ;;  %193 = sbr.rel (%p190_p3) target bundleno = 305 (0x131), region = 32 }
   0xa   : > { %894 = vmatprep.subr.bf16.mxu0 (!%p190_p3), %v985_v0  ;;  %926 = vmatprep.subr.bf16.mxu1 (!%p190_p3), %v985_v0  ;;  %p236_p6 = scmp.lt.s32.totalorder (!%p190_p3), %s796_s24, 15  ;;  %v988_v3 = vld [vmem:[%s1229_s1 + $0x18] sm:$0xff] (!%p190_p3)   ;;  %v989_v5 = vld [vmem:[%s1229_s1 + $0x20] sm:$0xff] (!%p190_p3)   ;;  %v990_v8 = vld [vmem:[%s1229_s1 + $0x28] sm:$0xff] (!%p190_p3)   ;;  %p257_p7 = scmp.lt.s32.totalorder (!%p190_p3), %s1023_s15, 1  ;;  %vm642_vm0 = vcmask (!%p190_p3), 1040384  }
   0xb   : > { %895 = vmatpush3.bf16.msra.mxu0 (!%p190_p3), %v985_v0  ;;  %934 = vmatpush3.bf16.msra.mxu1 (!%p190_p3), %v985_v0  ;;  %v991_v9 = vld [vmem:[%s1229_s1 + $0x30] sm:$0xff] (!%p190_p3)   ;;  %v992_v10 = vld [vmem:[%s1229_s1 + $0x38] sm:$0xff] (!%p190_p3)   ;;  %v1157_v17 = vld [vmem:[%s1230_s2] ss:$0 sm:$0xff] (!%p190_p3) }
   0xc   : > { %896 = vmatprep.subr.bf16.mxu0 (!%p190_p3), %v986_v1  ;;  %927 = vmatprep.subr.bf16.mxu1 (!%p190_p3), %v986_v1 }
   0xf   : > { %897 = vmatpush3.bf16.msra.mxu0 (!%p190_p3), %v986_v1  ;;  %935 = vmatpush3.bf16.msra.mxu1 (!%p190_p3), %v986_v1 }
  0x10   : > { %s1244_s16 = smov (!%p234_p5, %s1027_s16), 1  ;;  %s1246_s24 = smov (!%p236_p6, %s796_s24), 15  ;;  %898 = vmatprep.subr.bf16.mxu0 %v987_v2  ;;  %928 = vmatprep.subr.bf16.mxu1 %v987_v2 }
  0x11   : > { %s798_s29 = sshll.u32 %s1244_s16, 5  ;;  %s797_s30 = sshll.u32 %s1246_s24, 1 }
  0x12   : > { %s240_s5 = sadd.s32 %s798_s29, %s797_s30  ;;  %s942_s6 = smul.u32 3, %s1246_s24 }
  0x13   : > { %s799_s9 = sshll.u32 %s240_s5, 2  ;;  %s943_s10 = smul.u32 48, %s1244_s16  ;;  %899 = vmatpush3.bf16.msra.mxu0 %v987_v2  ;;  %936 = vmatpush3.bf16.msra.mxu1 %v987_v2 }
  0x14   : > { %s1119_s13 = scalar_lea.vmem %s1228_s0, %s799_s9  ;;  %900 = vmatprep.subr.bf16.mxu0 %v988_v3  ;;  %929 = vmatprep.subr.bf16.mxu1 %v988_v3  ;;  %s1248_s15 = smov (!%p257_p7, %s1023_s15), 1 }
  0x15   : > { %s251_s14 = sadd.s32 %s943_s10, %s942_s6  ;;  %v993_v4 = vld [vmem:[%s1119_s13] sm:$0xff]   ;;  %v994_v11 = vld [vmem:[%s1119_s13 + $0x8] sm:$0xff]   ;;  %v995_v13 = vld [vmem:[%s1119_s13 + $0x10] sm:$0xff]   ;;  %s802_s10 = sshll.u32 %s1244_s16, 1 }
  0x16   : > { %s801_s22 = sshll.u32 %s251_s14, 2  ;;  %910 = vmatprep.mubr.bf16.mxu0 %v993_v4  ;;  %v997_v7 = vld [vmem:[%s1119_s13 + $0x20] sm:$0xff]   ;;  %v998_v12 = vld [vmem:[%s1119_s13 + $0x28] sm:$0xff]   ;;  %v999_v14 = vld [vmem:[%s1119_s13 + $0x30] sm:$0xff]   ;;  %s260_s11 = sadd.s32 %s802_s10, %s1248_s15 }
  0x17   : > { %s1128_s27 = scalar_lea.vmem %s1231_s3, %s801_s22  ;;  %901 = vmatpush3.bf16.msra.mxu0 %v988_v3  ;;  %937 = vmatpush3.bf16.msra.mxu1 %v988_v3  ;;  %v996_v15 = vld [vmem:[%s1119_s13 + $0x18] sm:$0xff]   ;;  %s803_s12 = sshll.u32 %s260_s11, 1 }
  0x18   : > { %576 = vst [vmem:[%s1128_s27 + $0x8] sm:$0xf] %v1041_v6  ;;  %577 = vst [vmem:[%s1128_s27 + $0x14] sm:$0xf] %v1041_v6  ;;  %902 = vmatprep.subr.bf16.mxu0 %v989_v5  ;;  %930 = vmatprep.subr.bf16.mxu1 %v989_v5  ;;  %v1000_v16 = vld [vmem:[%s1119_s13 + $0x38] sm:$0xff]   ;;  %s262_s22 = scalar_lea.vmem %s1232_s4, %s803_s12 }
  0x19   : > { %578 = vst [vmem:[%s1128_s27 + $0x20] sm:$0xf] %v1041_v6  ;;  %579 = vst [vmem:[%s1128_s27 + $0x2c] sm:$0xf] %v1041_v6  ;;  %918 = vmatprep.mubr.bf16.mxu1 %v997_v7 }
  0x1a   : > { %580 = vst [vmem:[%s1128_s27 + $0x38] sm:$0xf] %v1041_v6  ;;  %581 = vst [vmem:[%s1128_s27 + $0x44] sm:$0xf] %v1041_v6 }
  0x1b   : > { %582 = vst [vmem:[%s1128_s27 + $0x50] sm:$0xf] %v1041_v6  ;;  %583 = vst [vmem:[%s1128_s27 + $0x5c] sm:$0xf] %v1041_v6  ;;  %903 = vmatpush3.bf16.msra.mxu0 %v989_v5  ;;  %938 = vmatpush3.bf16.msra.mxu1 %v989_v5 }
  0x1c   : > { %904 = vmatprep.subr.bf16.mxu0 %v990_v8  ;;  %931 = vmatprep.subr.bf16.mxu1 %v990_v8 }
  0x1f   : > { %905 = vmatpush3.bf16.msra.mxu0 %v990_v8  ;;  %939 = vmatpush3.bf16.msra.mxu1 %v990_v8 }
  0x20   : > { %906 = vmatprep.subr.bf16.mxu0 %v991_v9  ;;  %932 = vmatprep.subr.bf16.mxu1 %v991_v9 }
  0x23   : > { %907 = vmatpush3.bf16.msra.mxu0 %v991_v9  ;;  %940 = vmatpush3.bf16.msra.mxu1 %v991_v9 }
  0x24   : > { %908 = vmatprep.subr.bf16.mxu0 %v992_v10  ;;  %933 = vmatprep.subr.bf16.mxu1 %v992_v10 }
  0x27   : > { %909 = vmatpush3.bf16.msra.mxu0 %v992_v10  ;;  %941 = vmatpush3.bf16.msra.mxu1 %v992_v10 }
  0x2a   : > { %911 = vmatmul.mubr.bf16.vlgmr.msra.gmra.mrb[0].mxu0 %v994_v11  ;;  %919 = vmatmul.mubr.bf16.vlgmr.msra.gmra.mrb[0].mxu1 %v998_v12 }
  0x2b   : > { %914 = vmatprep.mubr.bf16.mxu0 %v995_v13  ;;  %922 = vmatprep.mubr.bf16.mxu1 %v999_v14 }
  0x32   : > { %915 = vmatmul.mubr.bf16.gmra.mrb[4].mxu0 %v996_v15  ;;  %923 = vmatmul.mubr.bf16.gmra.mrb[4].mxu1 %v1000_v16 }
  0xfd   : > { %v912_v18 = vpop.f32.mrb[0].mxu0  ;;  %v920_v19 = vpop.f32.mrb[0].mxu1 }
  0xfe   : > { %v442_v20 = vadd.f32 %v912_v18, %v1157_v17  ;;  %v433_v21 = vpop.f32.mrb[1].mxu0  ;;  %v1161_v22 = vadd.f32 %v920_v19, %v1157_v17  ;;  %v465_v23 = vpop.f32.mrb[1].mxu1 }
  0xff   : > { %v434_v24 = vadd.f32 %v1157_v17, %v433_v21  ;;  %v913_v25 = vpop.f32.mrb[2].mxu0  ;;  %v921_v26 = vpop.f32.mrb[2].mxu1  ;;  %v1168_v31 = vadd.f32 %v1157_v17, %v465_v23 }
 0x100   : > { %v841_v27 = vpack.c.bf16 %v442_v20, %v442_v20  ;;  %v445_v28 = vadd.f32 %v913_v25, %v1157_v17  ;;  %v436_v29 = vpop.f32.mrb[3].mxu0  ;;  %v849_v30 = vpack.c.bf16 %v1161_v22, %v1161_v22  ;;  %v468_v32 = vpop.f32.mrb[3].mxu1  ;;  %v1174_v35 = vadd.f32 %v921_v26, %v1157_v17 }
 0x101   : > { %v437_v33 = vadd.f32 %v1157_v17, %v436_v29  ;;  %v469_v36 = vadd.f32 %v1157_v17, %v468_v32  ;;  %v605_v37 = vmul.f32 %v434_v24, %v434_v24  ;;  %v607_v43 = vmul.f32 %v442_v20, %v442_v20 }
 0x102   : > { %562 = vst [vmem:[%s1128_s27 + $0xc] sm:$0xf] %v841_v27  ;;  %v842_v34 = vpack.c.bf16 %v445_v28, %v445_v28  ;;  %570 = vst [vmem:[%s1128_s27 + $0x3c] sm:$0xf] %v849_v30  ;;  %v850_v41 = vpack.c.bf16 %v1174_v35, %v1174_v35  ;;  %v608_v52 = vmul.f32 %v445_v28, %v445_v28 }
 0x103   : > { %v858_v38 = vpack.c.bf16 %v437_v33, %v434_v24  ;;  %v584_v39 = vadd.f32 %v437_v33, %v434_v24  ;;  %v606_v40 = vmul.f32 %v437_v33, %v437_v33  ;;  %v868_v42 = vpack.c.bf16 %v469_v36, %v1168_v31 }
 0x104   : > { %563 = vst [vmem:[%s1128_s27 + $0x10] sm:$0xf] %v842_v34  ;;  %571 = vst [vmem:[%s1128_s27 + $0x40] sm:$0xf] %v850_v41  ;;  %v615_v26 = vmul.f32 %v1161_v22, %v1161_v22  ;;  %v616_v29 = vmul.f32 %v1174_v35, %v1174_v35 }
 0x105   : > { %859 = vst [vmem:[%s1128_s27] sm:$0xff] %v858_v38   ;;  %v585_v44 = vadd.f32 %v584_v39, %v442_v20  ;;  %v621_v45 = vadd.f32 %v606_v40, %v605_v37  ;;  %v916_v46 = vpop.f32.mrb[4].mxu0  ;;  %v924_v47 = vpop.f32.mrb[4].mxu1  ;;  %876 = vst [vmem:[%s1128_s27 + $0x30] sm:$0xff] %v868_v42   ;;  %v613_v20 = vmul.f32 %v1168_v31, %v1168_v31 }
 0x106   : > { %v458_v48 = vadd.f32 %v916_v46, %v1157_v17  ;;  %v449_v49 = vpop.f32.mrb[5].mxu0  ;;  %v490_v50 = vadd.f32 %v924_v47, %v1157_v17  ;;  %v481_v51 = vpop.f32.mrb[5].mxu1 }
 0x107   : > { %v622_v53 = vadd.f32 %v621_v45, %v607_v43  ;;  %v450_v54 = vadd.f32 %v1157_v17, %v449_v49  ;;  %v586_v55 = vadd.f32 %v585_v44, %v445_v28  ;;  %v917_v56 = vpop.f32.mrb[6].mxu0  ;;  %v925_v57 = vpop.f32.mrb[6].mxu1  ;;  %v482_v4 = vadd.f32 %v1157_v17, %v481_v51 }
 0x108   : > { %v845_v58 = vpack.c.bf16 %v458_v48, %v458_v48  ;;  %v461_v59 = vadd.f32 %v917_v56, %v1157_v17  ;;  %v452_v60 = vpop.f32.mrb[7].mxu0  ;;  %v853_v61 = vpack.c.bf16 %v490_v50, %v490_v50  ;;  %v484_v62 = vpop.f32.mrb[7].mxu1  ;;  %v493_v9 = vadd.f32 %v925_v57, %v1157_v17 }
 0x109   : > { %v587_v63 = vadd.f32 %v586_v55, %v450_v54  ;;  %v609_v0 = vmul.f32 %v450_v54, %v450_v54  ;;  %v623_v1 = vadd.f32 %v622_v53, %v608_v52  ;;  %v453_v2 = vadd.f32 %v1157_v17, %v452_v60 }
 0x10a   : > { %566 = vst [vmem:[%s1128_s27 + $0x24] sm:$0xf] %v845_v58  ;;  %v846_v3 = vpack.c.bf16 %v461_v59, %v461_v59  ;;  %574 = vst [vmem:[%s1128_s27 + $0x54] sm:$0xf] %v853_v61  ;;  %v485_v10 = vadd.f32 %v1157_v17, %v484_v62  ;;  %v611_v11 = vmul.f32 %v458_v48, %v458_v48 }
 0x10b   : > { %v624_v5 = vadd.f32 %v623_v1, %v609_v0  ;;  %v863_v6 = vpack.c.bf16 %v453_v2, %v450_v54  ;;  %v588_v7 = vadd.f32 %v587_v63, %v453_v2  ;;  %v610_v8 = vmul.f32 %v453_v2, %v453_v2 }
 0x10c   : > { %567 = vst [vmem:[%s1128_s27 + $0x28] sm:$0xf] %v846_v3  ;;  %v854_v14 = vpack.c.bf16 %v493_v9, %v493_v9  ;;  %v873_v15 = vpack.c.bf16 %v485_v10, %v482_v4  ;;  %v612_v16 = vmul.f32 %v461_v59, %v461_v59  ;;  %v614_v17 = vmul.f32 %v469_v36, %v469_v36 }
 0x10d   : > { %875 = vst [vmem:[%s1128_s27 + $0x18] sm:$0xff] %v863_v6   ;;  %v589_v12 = vadd.f32 %v588_v7, %v458_v48  ;;  %v625_v13 = vadd.f32 %v624_v5, %v610_v8  ;;  %v617_v33 = vmul.f32 %v482_v4, %v482_v4  ;;  %v618_v38 = vmul.f32 %v485_v10, %v485_v10 }
 0x10e   : > { %575 = vst [vmem:[%s1128_s27 + $0x58] sm:$0xf] %v854_v14  ;;  %877 = vst [vmem:[%s1128_s27 + $0x48] sm:$0xff] %v873_v15   ;;  %v619_v39 = vmul.f32 %v490_v50, %v490_v50  ;;  %v620_v42 = vmul.f32 %v493_v9, %v493_v9 }
 0x10f   : > { %v626_v18 = vadd.f32 %v625_v13, %v611_v11  ;;  %v590_v19 = vadd.f32 %v589_v12, %v461_v59 }
 0x111   : > { %v591_v21 = vadd.f32 %v590_v19, %v1168_v31  ;;  %v627_v23 = vadd.f32 %v626_v18, %v612_v16 }
 0x113   : > { %v628_v24 = vadd.f32 %v627_v23, %v613_v20  ;;  %v592_v25 = vadd.f32 %v591_v21, %v469_v36 }
 0x115   : > { %v593_v27 = vadd.f32 %v592_v25, %v1161_v22  ;;  %v629_v28 = vadd.f32 %v628_v24, %v614_v17 }
 0x117   : > { %v630_v30 = vadd.f32 %v629_v28, %v615_v26  ;;  %v594_v32 = vadd.f32 %v593_v27, %v1174_v35 }
 0x119   : > { %v595_v31 = vadd.f32 %v594_v32, %v482_v4  ;;  %v631_v34 = vadd.f32 %v630_v30, %v616_v29 }
 0x11b   : > { %v632_v37 = vadd.f32 %v631_v34, %v617_v33  ;;  %v596_v36 = vadd.f32 %v595_v31, %v485_v10 }
 0x11d   : > { %v597_v40 = vadd.f32 %v596_v36, %v490_v50  ;;  %v633_v41 = vadd.f32 %v632_v37, %v618_v38 }
 0x11f   : > { %v598_v22 = vadd.f32 %v597_v40, %v493_v9  ;;  %v634_v43 = vadd.f32 %v633_v41, %v619_v39 }
 0x121   : > { %v599_v44 = vrot.slane %v598_v22, 4  ;;  %v635_v45 = vadd.f32 %v634_v43, %v620_v42 }
 0x123   : > { %v600_v46 = vadd.f32 %v599_v44, %v598_v22  ;;  %v636_v35 = vrot.slane %v635_v45, 4 }
 0x125   : > { %v601_v47 = vrot.slane %v600_v46, 2  ;;  %v637_v48 = vadd.f32 %v636_v35, %v635_v45 }
 0x127   : > { %v602_v49 = vadd.f32 %v601_v47, %v600_v46  ;;  %v638_v51 = vrot.slane %v637_v48, 2 }
 0x129   : > { %v603_v52 = vrot.slane %v602_v49, 1  ;;  %v639_v53 = vadd.f32 %v638_v51, %v637_v48 }
 0x12b   : > { %v640_v50 = vrot.slane %v639_v53, 1  ;;  %v604_v54 = vadd.f32 %v603_v52, %v602_v49 }
 0x12d   : > { %v641_v55 = vadd.f32 %v640_v50, %v639_v53 }
 0x12f   : > { %v643_v56 = vsel %vm642_vm0, %v604_v54, %v641_v55 }
 0x130   : > { %644 = vst [vmem:[%s262_s22] sm:$0x3] %v643_v56 }
 0x131 PF: > { %s15_s19 = sadd.s32 1, %s1039_s19   ;;  %s1233_s15 = smov %s1031_s17 }
 0x132   : > { %p12_p8 = scmp.ge.s32.totalorder %s15_s19, 6   ;;  %s1234_s16 = smov %s1035_s18 }
 0x133   : > { %s1235_s17 = smov %s1238_s20  ;;  %s1236_s18 = smov %s1242_s21 }
 0x134   :  { %14 = sbr.rel (!%p12_p8) target bundleno = 3 (0x3), region = 74 }

// kernel: identity_block_forward.5
= control target key start
LH: loop header
LB: loop body
LE: loop exit
PB: predicated region body
PF: predicated region fallthrough
CT: control target
= control target key end

     0   :  { %s1445_s21 = smov 0   ;;  %s1447_s22 = smov 0   ;;  %s1677_s0 = inlined_call_operand.vmem [shape: bf16[2,16,24,128], index: 0, kind: input, shape index: {}]   ;;  %s1678_s1 = inlined_call_operand.vmem [shape: bf16[2,16,24,128], index: 1, kind: input, shape index: {}]   ;;  %s1679_s2 = inlined_call_operand.vmem [shape: bf16[128,128], index: 2, kind: input, shape index: {}]   ;;  %s1680_s3 = inlined_call_operand.vmem [shape: f32[1,128], index: 3, kind: input, shape index: {}]   ;;  %s1681_s4 = inlined_call_operand.vmem [shape: f32[1,128], index: 4, kind: input, shape index: {}]   ;;  %s1682_s5 = inlined_call_operand.vmem [shape: f32[1,128], index: 5, kind: input, shape index: {}]   ;;  %s1683_s6 = inlined_call_operand.vmem [shape: bf16[2,16,16,128], index: 6, kind: output, shape index: {}]  }
   0x1   :  { %s1449_s23 = smov 0   ;;  %s1451_s24 = smov 0  }
   0x2   :  { %s1453_s25 = smov 0   ;;  %s1455_s26 = smov 0  }
   0x3   :  { %s1457_s27 = smov 0  }
   0x4 LB: > { %s25_s28 = sadd.s32 1, %s1400_s25  ;;  %s28_s29 = sadd.s32 1, %s1404_s26  ;;  %s1408_s27 = sphi %s1457_s27, %s16_s27   ;;  %s1404_s26 = sphi %s1455_s26, %s1691_s26   ;;  %s1400_s25 = sphi %s1453_s25, %s1690_s25   ;;  %s1396_s24 = sphi %s1451_s24, %s1689_s24   ;;  %s1392_s23 = sphi %s1449_s23, %s1688_s23   ;;  %s1388_s22 = sphi %s1447_s22, %s1687_s22   ;;  %s1384_s21 = sphi %s1445_s21, %s1686_s21  }
   0x5   : > { %p26_p0 = scmp.ge.s32.totalorder %s25_s28, 2  ;;  %p44_p1 = scmp.ne.s32.totalorder %s1388_s22, %s1384_s21 }
   0x6   : > { %p45_p2 = scmp.eq.s32.totalorder %s1408_s27, 0  ;;  %s37_s10 = sadd.s32 1, %s1388_s22 }
   0x7   : > { %s1693_s28 = smov (%p26_p0, %s25_s28), 0  ;;  %s1695_s29 = smov (!%p26_p0, %s28_s29), %s1404_s26 }
   0x8   : > { %p1488_p3 = por %p45_p2, %p44_p1  ;;  %p30_p4 = scmp.ge.s32.totalorder %s1695_s29, 2 }
   0x9   : > { %s33_s7 = ssub.s32 %s1400_s25, %s1693_s28  ;;  %p1059_p6 = scmp.ge.s32.totalorder %s1408_s27, 4 }
   0xa   : > { %s1697_s29 = smov (%p30_p4, %s1695_s29), 0 }
   0xb   : > { %s32_s8 = ssub.s32 %s1404_s26, %s1697_s29  ;;  %222 = sbr.rel (%p1059_p6) target bundleno = 42 (0x2a), region = 32 }
   0xc   : > { %s34_s9 = sor.u32 %s33_s7, %s32_s8 }
   0xd   : > { %p35_p5 = scmp.eq.s32.totalorder %s34_s9, 0 }
   0xf   : > { %s1500_s11 = scalar_select %p35_p5, %s1388_s22, %s37_s10  }
  0x12   : > { %225 = sbr.rel (!%p1488_p3) target bundleno = 30 (0x1e), region = 36  ;;  %s227_s12 = sand.u32 (%p1488_p3), 1, %s1388_s22  }
  0x13   : > { %s1278_s13 = smul.u32 (%p1488_p3), 24, %s1400_s25  ;;  %s1060_s14 = sshll.u32 (%p1488_p3), %s227_s12, 6 }
  0x14   : > { %s1279_s15 = smul.u32 (%p1488_p3), 48, %s1404_s26  ;;  %s229_s7 = scalar_lea.vmem (%p1488_p3), [#allocation2], %s1060_s14 }
  0x16   : > { %s233_s16 = sadd.s32 (%p1488_p3), %s1279_s15, %s1278_s13 }
  0x17   : > { %s1063_s17 = sshll.u32 (%p1488_p3), %s233_s16, 2 }
  0x18   : > { %s235_s20 = scalar_lea.vmem (%p1488_p3), %s1677_s0, %s1063_s17 }
  0x19   : > { %v251_v0 = vld [vmem:[%s235_s20] sm:$0xff]   ;;  %v255_v1 = vld [vmem:[%s235_s20 + $0xc] sm:$0xff]   ;;  %v259_v2 = vld [vmem:[%s235_s20 + $0x18] sm:$0xff]  }
  0x1a   : > { %252 = vst [vmem:[%s229_s7] sm:$0xff] %v251_v0   ;;  %256 = vst [vmem:[%s229_s7 + $0x8] sm:$0xff] %v255_v1   ;;  %v263_v3 = vld [vmem:[%s235_s20 + $0x24] sm:$0xff]   ;;  %v267_v4 = vld [vmem:[%s235_s20 + $0x30] sm:$0xff]  }
  0x1b   : > { %260 = vst [vmem:[%s229_s7 + $0x10] sm:$0xff] %v259_v2   ;;  %v271_v5 = vld [vmem:[%s235_s20 + $0x3c] sm:$0xff]   ;;  %264 = vst [vmem:[%s229_s7 + $0x18] sm:$0xff] %v263_v3   ;;  %v275_v6 = vld [vmem:[%s235_s20 + $0x48] sm:$0xff]  }
  0x1c   : > { %268 = vst [vmem:[%s229_s7 + $0x20] sm:$0xff] %v267_v4   ;;  %272 = vst [vmem:[%s229_s7 + $0x28] sm:$0xff] %v271_v5   ;;  %v279_v7 = vld [vmem:[%s235_s20 + $0x54] sm:$0xff]  }
  0x1d   : > { %276 = vst [vmem:[%s229_s7 + $0x30] sm:$0xff] %v275_v6   ;;  %280 = vst [vmem:[%s229_s7 + $0x38] sm:$0xff] %v279_v7  }
  0x1e PF: > { %337 = sbr.rel (!%p1488_p3) target bundleno = 42 (0x2a), region = 77  ;;  %s339_s8 = sand.u32 (%p1488_p3), 1, %s1388_s22  }
  0x1f   : > { %s1280_s9 = smul.u32 (%p1488_p3), 24, %s1400_s25  ;;  %s1064_s10 = sshll.u32 (%p1488_p3), %s339_s8, 6 }
  0x20   : > { %s1281_s12 = smul.u32 (%p1488_p3), 48, %s1404_s26  ;;  %s341_s18 = scalar_lea.vmem (%p1488_p3), [#allocation3], %s1064_s10 }
  0x22   : > { %s345_s13 = sadd.s32 (%p1488_p3), %s1281_s12, %s1280_s9 }
  0x23   : > { %s1067_s14 = sshll.u32 (%p1488_p3), %s345_s13, 2 }
  0x24   : > { %s347_s17 = scalar_lea.vmem (%p1488_p3), %s1678_s1, %s1067_s14 }
  0x25   : > { %v363_v8 = vld [vmem:[%s347_s17] sm:$0xff]   ;;  %v367_v9 = vld [vmem:[%s347_s17 + $0xc] sm:$0xff]   ;;  %v371_v10 = vld [vmem:[%s347_s17 + $0x18] sm:$0xff]  }
  0x26   : > { %364 = vst [vmem:[%s341_s18] sm:$0xff] %v363_v8   ;;  %368 = vst [vmem:[%s341_s18 + $0x8] sm:$0xff] %v367_v9   ;;  %v375_v11 = vld [vmem:[%s347_s17 + $0x24] sm:$0xff]   ;;  %v379_v12 = vld [vmem:[%s347_s17 + $0x30] sm:$0xff]  }
  0x27   : > { %372 = vst [vmem:[%s341_s18 + $0x10] sm:$0xff] %v371_v10   ;;  %v383_v13 = vld [vmem:[%s347_s17 + $0x3c] sm:$0xff]   ;;  %376 = vst [vmem:[%s341_s18 + $0x18] sm:$0xff] %v375_v11   ;;  %v387_v14 = vld [vmem:[%s347_s17 + $0x48] sm:$0xff]  }
  0x28   : > { %380 = vst [vmem:[%s341_s18 + $0x20] sm:$0xff] %v379_v12   ;;  %384 = vst [vmem:[%s341_s18 + $0x28] sm:$0xff] %v383_v13   ;;  %v391_v15 = vld [vmem:[%s347_s17 + $0x54] sm:$0xff]  }
  0x29   : > { %388 = vst [vmem:[%s341_s18 + $0x30] sm:$0xff] %v387_v14   ;;  %392 = vst [vmem:[%s341_s18 + $0x38] sm:$0xff] %v391_v15  }
  0x2a PF: > { %p1068_p7 = scmp.ge.s32.totalorder %s1408_s27, 1  ;;  %p448_p8 = scmp.lt.s32.totalorder %s1408_s27, 5 }
  0x2c   : > { %p449_p9 = pnand %p1068_p7, %p448_p8 }
  0x2d   : > { %v1338_v16 = vld [vmem:[%s1679_s2] sm:$0xff] (!%p449_p9)   ;;  %s455_s20 = sand.u32 (!%p449_p9), 1, %s1384_s21   ;;  %v1339_v17 = vld [vmem:[%s1679_s2 + $0x8] sm:$0xff] (!%p449_p9)   ;;  %v1340_v18 = vld [vmem:[%s1679_s2 + $0x10] sm:$0xff] (!%p449_p9)   ;;  %s1071_s10 = sshll.u32 (!%p449_p9), %s1392_s23, 3 }
  0x2e   : > { %452 = sbr.rel (%p449_p9) target bundleno = 311 (0x137), region = 118  ;;  %1230 = vmatprep.subr.bf16.mxu0 (!%p449_p9), %v1338_v16  ;;  %1262 = vmatprep.subr.bf16.mxu1 (!%p449_p9), %v1338_v16  ;;  %s1528_s9 = sshll.u32 (!%p449_p9), %s455_s20, 6  ;;  %v1341_v19 = vld [vmem:[%s1679_s2 + $0x18] sm:$0xff] (!%p449_p9)   ;;  %v1342_v22 = vld [vmem:[%s1679_s2 + $0x20] sm:$0xff] (!%p449_p9)   ;;  %v1343_v23 = vld [vmem:[%s1679_s2 + $0x28] sm:$0xff] (!%p449_p9)  }
  0x2f   : > { %1231 = vmatpush3.bf16.msra.mxu0 (!%p449_p9), %v1338_v16  ;;  %1270 = vmatpush3.bf16.msra.mxu1 (!%p449_p9), %v1338_v16  ;;  %s1537_s14 = scalar_lea.vmem (!%p449_p9), [#allocation3], %s1528_s9  ;;  %v1344_v24 = vld [vmem:[%s1679_s2 + $0x30] sm:$0xff] (!%p449_p9)   ;;  %v1345_v25 = vld [vmem:[%s1679_s2 + $0x38] sm:$0xff] (!%p449_p9)   ;;  %s457_s8 = scalar_lea.vmem (!%p449_p9), [#allocation2], %s1528_s9  ;;  %v1564_v40 = vld [vmem:[%s1681_s4] ss:$0 sm:$0xff] (!%p449_p9) }
  0x30   : > { %1232 = vmatprep.subr.bf16.mxu0 (!%p449_p9), %v1339_v17  ;;  %1263 = vmatprep.subr.bf16.mxu1 (!%p449_p9), %v1339_v17  ;;  %v1346_v20 = vld [vmem:[%s1537_s14] sm:$0xff] (!%p449_p9)   ;;  %v1348_v26 = vld [vmem:[%s1537_s14 + $0x8] sm:$0xff] (!%p449_p9)   ;;  %v1350_v28 = vld [vmem:[%s1537_s14 + $0x10] sm:$0xff] (!%p449_p9)   ;;  %p503_p10 = scmp.lt.s32.totalorder (!%p449_p9), %s1396_s24, 1  ;;  %p1567_p11 = scmp.lt.s32.totalorder (!%p449_p9), %s1071_s10, 15 }
  0x31   : > { %v1347_v21 = vld [vmem:[%s1537_s14 + $0x20] sm:$0xff] (!%p449_p9)   ;;  %1246 = vmatprep.mubr.bf16.mxu0 (!%p449_p9), %v1346_v20  ;;  %v1349_v27 = vld [vmem:[%s1537_s14 + $0x28] sm:$0xff] (!%p449_p9)   ;;  %v1351_v29 = vld [vmem:[%s1537_s14 + $0x30] sm:$0xff] (!%p449_p9)  }
  0x32   : > { %1254 = vmatprep.mubr.bf16.mxu1 (!%p449_p9), %v1347_v21  ;;  %v1352_v30 = vld [vmem:[%s1537_s14 + $0x18] sm:$0xff] (!%p449_p9)   ;;  %v1200_v32 = vld [vmem:[%s457_s8 + $0x8] sm:$0xff] (!%p449_p9)   ;;  %v1129_v34 = vld [vmem:[%s457_s8] sm:$0xff] (!%p449_p9)  }
  0x33   : > { %1233 = vmatpush3.bf16.msra.mxu0 (!%p449_p9), %v1339_v17  ;;  %1271 = vmatpush3.bf16.msra.mxu1 (!%p449_p9), %v1339_v17  ;;  %v1353_v31 = vld [vmem:[%s1537_s14 + $0x38] sm:$0xff] (!%p449_p9)   ;;  %v1204_v33 = vld [vmem:[%s457_s8 + $0x28] sm:$0xff] (!%p449_p9)   ;;  %v1203_v35 = vld [vmem:[%s457_s8 + $0x20] sm:$0xff] (!%p449_p9)   ;;  %v1134_v36 = vunpack.c.l.bf16 (!%p449_p9), %v1200_v32  ;;  %v1130_v41 = vunpack.c.l.bf16 (!%p449_p9), %v1129_v34  ;;  %v1135_v45 = vunpack.c.h.bf16 (!%p449_p9), %v1200_v32  ;;  %v1131_v47 = vunpack.c.h.bf16 (!%p449_p9), %v1129_v34 }
  0x34   : > { %1234 = vmatprep.subr.bf16.mxu0 (!%p449_p9), %v1340_v18  ;;  %1264 = vmatprep.subr.bf16.mxu1 (!%p449_p9), %v1340_v18  ;;  %v1150_v37 = vunpack.c.l.bf16 (!%p449_p9), %v1204_v33  ;;  %v1202_v38 = vld [vmem:[%s457_s8 + $0x18] sm:$0xff] (!%p449_p9)   ;;  %v1146_v42 = vunpack.c.l.bf16 (!%p449_p9), %v1203_v35  ;;  %v1201_v43 = vld [vmem:[%s457_s8 + $0x10] sm:$0xff] (!%p449_p9)   ;;  %v1151_v46 = vunpack.c.h.bf16 (!%p449_p9), %v1204_v33  ;;  %v1147_v48 = vunpack.c.h.bf16 (!%p449_p9), %v1203_v35  ;;  %v1576_v55 = vld [vmem:[%s1682_s5] ss:$0 sm:$0xff] (!%p449_p9) }
  0x35   : > { %v1206_v39 = vld [vmem:[%s457_s8 + $0x38] sm:$0xff]   ;;  %v1205_v44 = vld [vmem:[%s457_s8 + $0x30] sm:$0xff]   ;;  %v1142_v49 = vunpack.c.l.bf16 %v1202_v38  ;;  %v787_v51 = vmul.f32 %v1134_v36, %v1564_v40  ;;  %v1138_v53 = vunpack.c.l.bf16 %v1201_v43  ;;  %v785_v56 = vmul.f32 %v1130_v41, %v1564_v40  ;;  %s1699_s24 = smov (!%p503_p10, %s1396_s24), 1  ;;  %s1701_s10 = smov (!%p1567_p11, %s1071_s10), 15  ;;  %v1602_v6 = vld [vmem:[%s1680_s3] ss:$0 sm:$0xff] }
  0x36   : > { %v1158_v50 = vunpack.c.l.bf16 %v1206_v39  ;;  %v795_v52 = vmul.f32 %v1150_v37, %v1564_v40  ;;  %v1154_v54 = vunpack.c.l.bf16 %v1205_v44  ;;  %v793_v57 = vmul.f32 %v1146_v42, %v1564_v40  ;;  %s1072_s16 = sshll.u32 %s1701_s10, 1  ;;  %s1073_s17 = sshll.u32 %s1699_s24, 5 }
  0x37   : > { %1235 = vmatpush3.bf16.msra.mxu0 %v1340_v18  ;;  %1272 = vmatpush3.bf16.msra.mxu1 %v1340_v18  ;;  %v788_v58 = vmul.f32 %v1135_v45, %v1564_v40  ;;  %v796_v59 = vmul.f32 %v1151_v46, %v1564_v40  ;;  %v786_v60 = vmul.f32 %v1131_v47, %v1564_v40  ;;  %v1143_v0 = vunpack.c.h.bf16 %v1202_v38  ;;  %s1622_s24 = sadd.s32 %s1073_s17, %s1072_s16 }
  0x38   : > { %1236 = vmatprep.subr.bf16.mxu0 %v1341_v19  ;;  %1265 = vmatprep.subr.bf16.mxu1 %v1341_v19  ;;  %v794_v61 = vmul.f32 %v1147_v48, %v1564_v40  ;;  %v791_v62 = vmul.f32 %v1142_v49, %v1564_v40  ;;  %v799_v63 = vmul.f32 %v1158_v50, %v1564_v40  ;;  %v1159_v1 = vunpack.c.h.bf16 %v1206_v39  ;;  %s1074_s18 = sshll.u32 %s1622_s24, 2 }
  0x39   : > { %v810_v2 = vadd.f32 %v1576_v55, %v787_v51  ;;  %v818_v3 = vadd.f32 %v1576_v55, %v795_v52  ;;  %v789_v4 = vmul.f32 %v1138_v53, %v1564_v40  ;;  %v797_v5 = vmul.f32 %v1154_v54, %v1564_v40  ;;  %s1638_s20 = scalar_lea.vmem %s1683_s6, %s1074_s18 }
  0x3a   : > { %v808_v7 = vadd.f32 %v1576_v55, %v785_v56  ;;  %v816_v8 = vadd.f32 %v1576_v55, %v793_v57  ;;  %v1139_v9 = vunpack.c.h.bf16 %v1201_v43  ;;  %v1155_v10 = vunpack.c.h.bf16 %v1205_v44 }
  0x3b   : > { %1237 = vmatpush3.bf16.msra.mxu0 %v1341_v19  ;;  %1273 = vmatpush3.bf16.msra.mxu1 %v1341_v19  ;;  %v811_v11 = vadd.f32 %v1576_v55, %v788_v58  ;;  %v819_v12 = vadd.f32 %v1576_v55, %v796_v59  ;;  %v809_v13 = vadd.f32 %v1576_v55, %v786_v60 }
  0x3c   : > { %1238 = vmatprep.subr.bf16.mxu0 %v1342_v22  ;;  %1266 = vmatprep.subr.bf16.mxu1 %v1342_v22  ;;  %v817_v14 = vadd.f32 %v1576_v55, %v794_v61  ;;  %v814_v17 = vadd.f32 %v1576_v55, %v791_v62  ;;  %v822_v18 = vadd.f32 %v1576_v55, %v799_v63 }
  0x3d   : > { %v792_v19 = vmul.f32 %v1143_v0, %v1564_v40  ;;  %v800_v20 = vmul.f32 %v1159_v1, %v1564_v40  ;;  %v798_v32 = vmul.f32 %v1155_v10, %v1564_v40 }
  0x3f   : > { %1239 = vmatpush3.bf16.msra.mxu0 %v1342_v22  ;;  %1274 = vmatpush3.bf16.msra.mxu1 %v1342_v22  ;;  %v815_v46 = vadd.f32 %v1576_v55, %v792_v19  ;;  %v821_v50 = vadd.f32 %v1576_v55, %v798_v32 }
  0x40   : > { %1240 = vmatprep.subr.bf16.mxu0 %v1343_v23  ;;  %1267 = vmatprep.subr.bf16.mxu1 %v1343_v23 }
  0x43   : > { %1241 = vmatpush3.bf16.msra.mxu0 %v1343_v23  ;;  %1275 = vmatpush3.bf16.msra.mxu1 %v1343_v23 }
  0x44   : > { %1242 = vmatprep.subr.bf16.mxu0 %v1344_v24  ;;  %1268 = vmatprep.subr.bf16.mxu1 %v1344_v24 }
  0x47   : > { %1243 = vmatpush3.bf16.msra.mxu0 %v1344_v24  ;;  %1276 = vmatpush3.bf16.msra.mxu1 %v1344_v24 }
  0x48   : > { %1244 = vmatprep.subr.bf16.mxu0 %v1345_v25  ;;  %1269 = vmatprep.subr.bf16.mxu1 %v1345_v25 }
  0x4b   : > { %1245 = vmatpush3.bf16.msra.mxu0 %v1345_v25  ;;  %1277 = vmatpush3.bf16.msra.mxu1 %v1345_v25  ;;  %v812_v25 = vadd.f32 %v1576_v55, %v789_v4 }
  0x4e   : > { %1247 = vmatmul.mubr.bf16.vlgmr.msra.gmra.mrb[0].mxu0 %v1348_v26  ;;  %1255 = vmatmul.mubr.bf16.vlgmr.msra.gmra.mrb[0].mxu1 %v1349_v27  ;;  %v820_v26 = vadd.f32 %v1576_v55, %v797_v5 }
  0x4f   : > { %1250 = vmatprep.mubr.bf16.mxu0 %v1350_v28  ;;  %1258 = vmatprep.mubr.bf16.mxu1 %v1351_v29 }
  0x56   : > { %1251 = vmatmul.mubr.bf16.gmra.mrb[4].mxu0 %v1352_v30  ;;  %1259 = vmatmul.mubr.bf16.gmra.mrb[4].mxu1 %v1353_v31  ;;  %v790_v31 = vmul.f32 %v1139_v9, %v1564_v40  ;;  %v823_v40 = vadd.f32 %v1576_v55, %v800_v20 }
  0x58   : > { %v813_v49 = vadd.f32 %v1576_v55, %v790_v31 }
 0x121   : > { %v1248_v15 = vpop.f32.mrb[0].mxu0  ;;  %v1256_v16 = vpop.f32.mrb[0].mxu1 }
 0x122   : > { %v692_v21 = vadd.f32 %v1248_v15, %v1602_v6  ;;  %v724_v22 = vadd.f32 %v1256_v16, %v1602_v6  ;;  %v683_v23 = vpop.f32.mrb[1].mxu0  ;;  %v715_v24 = vpop.f32.mrb[1].mxu1 }
 0x123   : > { %v684_v27 = vadd.f32 %v1602_v6, %v683_v23  ;;  %v716_v28 = vadd.f32 %v1602_v6, %v715_v24  ;;  %v1249_v29 = vpop.f32.mrb[2].mxu0  ;;  %v1257_v30 = vpop.f32.mrb[2].mxu1 }
 0x124   : > { %v826_v33 = vadd.f32 %v810_v2, %v692_v21  ;;  %v834_v34 = vadd.f32 %v818_v3, %v724_v22  ;;  %v695_v35 = vadd.f32 %v1249_v29, %v1602_v6  ;;  %v727_v36 = vadd.f32 %v1257_v30, %v1602_v6  ;;  %v686_v37 = vpop.f32.mrb[3].mxu0  ;;  %v718_v38 = vpop.f32.mrb[3].mxu1 }
 0x125   : > { %v824_v39 = vadd.f32 %v808_v7, %v684_v27  ;;  %v832_v41 = vadd.f32 %v816_v8, %v716_v28  ;;  %v687_v42 = vadd.f32 %v1602_v6, %v686_v37  ;;  %v719_v43 = vadd.f32 %v1602_v6, %v718_v38 }
 0x126   : > { %v827_v44 = vadd.f32 %v811_v11, %v695_v35  ;;  %v835_v45 = vadd.f32 %v819_v12, %v727_v36  ;;  %v842_v51 = vmax.f32 %v826_v33, 0.0  ;;  %v850_v52 = vmax.f32 %v834_v34, 0.0 }
 0x127   : > { %v825_v47 = vadd.f32 %v809_v13, %v687_v42  ;;  %v833_v48 = vadd.f32 %v817_v14, %v719_v43  ;;  %v840_v56 = vmax.f32 %v824_v39, 0.0  ;;  %v848_v57 = vmax.f32 %v832_v41, 0.0 }
 0x128   : > { %v843_v53 = vmax.f32 %v827_v44, 0.0  ;;  %v851_v54 = vmax.f32 %v835_v45, 0.0 }
 0x129   : > { %v841_v58 = vmax.f32 %v825_v47, 0.0  ;;  %v849_v59 = vmax.f32 %v833_v48, 0.0  ;;  %v1252_v60 = vpop.f32.mrb[4].mxu0  ;;  %v1260_v61 = vpop.f32.mrb[4].mxu1 }
 0x12a   : > { %v1168_v62 = vpack.c.bf16 %v843_v53, %v842_v51  ;;  %v1188_v63 = vpack.c.bf16 %v851_v54, %v850_v52  ;;  %v708_v55 = vadd.f32 %v1252_v60, %v1602_v6  ;;  %v740_v0 = vadd.f32 %v1260_v61, %v1602_v6  ;;  %v699_v1 = vpop.f32.mrb[5].mxu0  ;;  %v731_v2 = vpop.f32.mrb[5].mxu1 }
 0x12b   : > { %v1163_v3 = vpack.c.bf16 %v841_v58, %v840_v56  ;;  %v1183_v4 = vpack.c.bf16 %v849_v59, %v848_v57  ;;  %v700_v5 = vadd.f32 %v1602_v6, %v699_v1  ;;  %v732_v7 = vadd.f32 %v1602_v6, %v731_v2  ;;  %v1253_v8 = vpop.f32.mrb[6].mxu0  ;;  %v1261_v9 = vpop.f32.mrb[6].mxu1 }
 0x12c   : > { %1207 = vst [vmem:[%s1638_s20 + $0x8] sm:$0xff] %v1168_v62   ;;  %1211 = vst [vmem:[%s1638_s20 + $0x28] sm:$0xff] %v1188_v63   ;;  %v830_v10 = vadd.f32 %v814_v17, %v708_v55  ;;  %v838_v11 = vadd.f32 %v822_v18, %v740_v0  ;;  %v711_v12 = vadd.f32 %v1253_v8, %v1602_v6  ;;  %v702_v14 = vpop.f32.mrb[7].mxu0  ;;  %v734_v15 = vpop.f32.mrb[7].mxu1 }
 0x12d   : > { %v743_v13 = vadd.f32 %v1261_v9, %v1602_v6  ;;  %1164 = vst [vmem:[%s1638_s20] sm:$0xff] %v1163_v3   ;;  %1210 = vst [vmem:[%s1638_s20 + $0x20] sm:$0xff] %v1183_v4   ;;  %v828_v16 = vadd.f32 %v812_v25, %v700_v5  ;;  %v836_v19 = vadd.f32 %v820_v26, %v732_v7 }
 0x12e   : > { %v703_v20 = vadd.f32 %v1602_v6, %v702_v14  ;;  %v735_v21 = vadd.f32 %v1602_v6, %v734_v15  ;;  %v831_v22 = vadd.f32 %v815_v46, %v711_v12  ;;  %v846_v24 = vmax.f32 %v830_v10, 0.0 }
 0x12f   : > { %v839_v23 = vadd.f32 %v823_v40, %v743_v13  ;;  %v854_v27 = vmax.f32 %v838_v11, 0.0  ;;  %v844_v30 = vmax.f32 %v828_v16, 0.0  ;;  %v852_v31 = vmax.f32 %v836_v19, 0.0 }
 0x130   : > { %v829_v17 = vadd.f32 %v813_v49, %v703_v20  ;;  %v837_v18 = vadd.f32 %v821_v50, %v735_v21  ;;  %v847_v28 = vmax.f32 %v831_v22, 0.0 }
 0x131   : > { %v855_v29 = vmax.f32 %v839_v23, 0.0 }
 0x132   : > { %v845_v25 = vmax.f32 %v829_v17, 0.0  ;;  %v853_v26 = vmax.f32 %v837_v18, 0.0  ;;  %v1178_v32 = vpack.c.bf16 %v847_v28, %v846_v24 }
 0x133   : > { %v1198_v33 = vpack.c.bf16 %v855_v29, %v854_v27 }
 0x134   : > { %v1173_v34 = vpack.c.bf16 %v845_v25, %v844_v30  ;;  %v1193_v6 = vpack.c.bf16 %v853_v26, %v852_v31  ;;  %1209 = vst [vmem:[%s1638_s20 + $0x18] sm:$0xff] %v1178_v32  }
 0x135   : > { %1213 = vst [vmem:[%s1638_s20 + $0x38] sm:$0xff] %v1198_v33  }
 0x136   : > { %1208 = vst [vmem:[%s1638_s20 + $0x10] sm:$0xff] %v1173_v34   ;;  %1212 = vst [vmem:[%s1638_s20 + $0x30] sm:$0xff] %v1193_v6  }
 0x137 PF: > { %s16_s27 = sadd.s32 1, %s1408_s27   ;;  %s1686_s21 = smov %s1388_s22 }
 0x138   : > { %p13_p12 = scmp.ge.s32.totalorder %s16_s27, 6   ;;  %s1687_s22 = smov %s1500_s11 }
 0x139   : > { %s1688_s23 = smov %s1400_s25  ;;  %s1689_s24 = smov %s1404_s26 }
 0x13a   : > { %s1690_s25 = smov %s1693_s28  ;;  %s1691_s26 = smov %s1697_s29 }
 0x13b   :  { %15 = sbr.rel (!%p13_p12) target bundleno = 4 (0x4), region = 169 }

// kernel: identity_block_forward.4
= control target key start
LH: loop header
LB: loop body
LE: loop exit
PB: predicated region body
PF: predicated region fallthrough
CT: control target
= control target key end

     0   :  { %s4583_s27 = smov 0   ;;  %s4585_s28 = smov 0   ;;  %s5932_s0 = inlined_call_operand.vmem [shape: bf16[2,16,24,128], index: 0, kind: input, shape index: {}, may-alias: {0,1,2}]   ;;  %s5933_s1 = inlined_call_operand.vmem [shape: bf16[2,16,24,128], index: 1, kind: input, shape index: {}, may-alias: {0,1,2}]   ;;  %s5934_s2 = inlined_call_operand.vmem [shape: bf16[2,16,24,128], index: 2, kind: input, shape index: {}, may-alias: {0,1,2}]   ;;  %s5935_s3 = inlined_call_operand.vmem [shape: bf16[9,128,128], index: 3, kind: input, shape index: {}]   ;;  %s5936_s4 = inlined_call_operand.vmem [shape: f32[1,128], index: 4, kind: input, shape index: {}]   ;;  %s5937_s5 = inlined_call_operand.vmem [shape: f32[1,128], index: 5, kind: input, shape index: {}]   ;;  %s5938_s6 = inlined_call_operand.vmem [shape: f32[1,128], index: 6, kind: input, shape index: {}]   ;;  %s5939_s7 = inlined_call_operand.vmem [shape: bf16[2,16,24,128], index: 7, kind: output, shape index: {0}]   ;;  %s5940_s8 = inlined_call_operand.vmem [shape: f32[2,2,2,128], index: 8, kind: output, shape index: {1}]  }
   0x1   :  { %s4587_s29 = smov 0   ;;  %s4589_s30 = smov 0  }
   0x2   :  { %s4591_s9 = smov 0  }
   0x3 LB: > { %s28_s10 = sadd.s32 1, %s4525_s29  ;;  %s31_s11 = sadd.s32 1, %s4529_s30  ;;  %s4533_s9 = sphi %s4591_s9, %s19_s9   ;;  %s4529_s30 = sphi %s4589_s30, %s6080_s30   ;;  %s4525_s29 = sphi %s4587_s29, %s6079_s29   ;;  %s4521_s28 = sphi %s4585_s28, %s6078_s28   ;;  %s4517_s27 = sphi %s4583_s27, %s6077_s27  }
   0x4   : > { %p29_p0 = scmp.ge.s32.totalorder %s28_s10, 2  ;;  %p3439_p1 = scmp.ge.s32.totalorder %s4533_s9, 1 }
   0x5   : > { %p353_p2 = scmp.lt.s32.totalorder %s4533_s9, 5 }
   0x6   : > { %s6082_s10 = smov (%p29_p0, %s28_s10), 0  ;;  %s6084_s11 = smov (!%p29_p0, %s31_s11), %s4529_s30 }
   0x7   : > { %5988 = sst [smem:[#allocation2_spill]] %s6082_s10  ;;  %p354_p3 = pnand %p3439_p1, %p353_p2 }
   0x8   : > { %p33_p4 = scmp.ge.s32.totalorder %s6084_s11, 2 }
   0x9   : > { %357 = sbr.rel (%p354_p3) target bundleno = 522 (0x20a), region = 48 }
   0xa   : > { %s6086_s11 = smov (%p33_p4, %s6084_s11), 0 }
   0xb   : > { %5989 = sst [smem:[#allocation3_spill]] %s6086_s11 }
  0x10   : > { %v4421_v0 = vld [vmem:[%s5935_s3 + $0x40] sm:$0xff]   ;;  %s4621_s14 = sshll.u32 %s4517_s27, 3  ;;  %v4423_v2 = vld [vmem:[%s5935_s3 + $0x48] sm:$0xff]   ;;  %p435_p6 = scmp.lt.s32.totalorder %s4521_s28, 1  ;;  %v4425_v4 = vld [vmem:[%s5935_s3 + $0x50] sm:$0xff]   ;;  %vm4535_vm0 = vmmov 1  }
  0x11   : > { %v4422_v1 = vld [vmem:[%s5935_s3] sm:$0xff]   ;;  %s3441_s17 = sadd.s32 4294967295, %s4621_s14  ;;  %3998 = vmatprep.subr.bf16.mxu0 %v4421_v0  ;;  %v4424_v3 = vld [vmem:[%s5935_s3 + $0x8] sm:$0xff]   ;;  %v4426_v5 = vld [vmem:[%s5935_s3 + $0x10] sm:$0xff]   ;;  %p451_p8 = scmp.lt.s32.totalorder %s4621_s14, 15  ;;  %vm4536_vm2 = vmmov 0  }
  0x12   : > { %p433_p5 = scmp.gt.s32.totalorder %s3441_s17, 0  ;;  %3999 = vmatpush3.bf16.msra.mxu0 %v4421_v0  ;;  %4038 = vmatprep.subr.bf16.mxu1 %v4422_v1  ;;  %s6088_s28 = smov (!%p435_p6, %s4521_s28), 1  ;;  %v4427_v6 = vld [vmem:[%s5935_s3 + $0x58] sm:$0xff]   ;;  %v4429_v8 = vld [vmem:[%s5935_s3 + $0x60] sm:$0xff]   ;;  %v4431_v10 = vld [vmem:[%s5935_s3 + $0x68] sm:$0xff]   ;;  %v5941_v19 = vmov 0  }
  0x13   : > { %4000 = vmatprep.subr.bf16.mxu0 %v4423_v2  ;;  %4039 = vmatpush3.bf16.msra.mxu1 %v4422_v1  ;;  %p3442_p7 = scmp.lt.s32.totalorder %s3441_s17, 15  ;;  %s4644_s12 = smul.u32 48, %s6088_s28  ;;  %v4428_v7 = vld [vmem:[%s5935_s3 + $0x18] sm:$0xff]   ;;  %v4430_v9 = vld [vmem:[%s5935_s3 + $0x20] sm:$0xff]   ;;  %v4671_v11 = vld [vmem:[%s5935_s3 + $0x28] sm:$0xff]   ;;  %vm3238_vm10 = vcmask 1040384  }
  0x14   : > { %s434_s24 = scalar_select %p433_p5, %s3441_s17, 0  ;;  %4040 = vmatprep.subr.bf16.mxu1 %v4424_v3  ;;  %v4682_v12 = vld [vmem:[%s5937_s5] ss:$0 sm:$0xff]  ;;  %vm701_vm1 = vmpackc.low %vm4535_vm0, %vm4535_vm0  ;;  %v4433_v21 = vld [vmem:[%s5935_s3 + $0x70] sm:$0xff]   ;;  %vm1025_vm7 = vsmask.f32 4352 }
  0x15   : > { %s452_s17 = scalar_select %p451_p8, %s4621_s14, 15  ;;  %v4699_v18 = vld [vmem:[%s5938_s6] ss:$0 sm:$0xff]  ;;  %vm703_vm3 = vmpackc.low %vm4536_vm2, %vm4536_vm2  ;;  %v704_v20 = vsel %vm701_vm1, 65537, %v5941_v19  ;;  %v4434_v30 = vld [vmem:[%s5935_s3 + $0x30] sm:$0xff]  }
  0x16   : > { %4001 = vmatpush3.bf16.msra.mxu0 %v4423_v2  ;;  %s6090_s24 = smov (!%p3442_p7, %s434_s24), 15  ;;  %s460_s23 = sadd.s32 8, %s4621_s14  ;;  %v706_v25 = vsel %vm703_vm3, 65537, %v5941_v19  ;;  %v3461_v27 = vcombine.low %v704_v20, %v704_v20  ;;  %v4435_v44 = vld [vmem:[%s5935_s3 + $0x78] sm:$0xff]   ;;  %v4437_v1 = vld [vmem:[%s5935_s3 + $0x80] sm:$0xff]   ;;  %v4470_v51 = vld [vmem:[%s5935_s3 + $0x188] sm:$0xff]  }
  0x17   : > { %4002 = vmatprep.subr.bf16.mxu0 %v4425_v4  ;;  %4041 = vmatpush3.bf16.msra.mxu1 %v4424_v3  ;;  %s4374_s19 = smul.u32 3, %s6090_s24  ;;  %p4675_p9 = scmp.lt.s32.totalorder %s460_s23, 15  ;;  %v3462_v34 = vcombine.low %v706_v25, %v706_v25  ;;  %v4436_v52 = vld [vmem:[%s5935_s3 + $0x38] sm:$0xff]   ;;  %vm1341_vm8 = vsmask.f32 7424 }
  0x18   : > { %4042 = vmatprep.subr.bf16.mxu1 %v4426_v5  ;;  %s4376_s18 = smul.u32 3, %s452_s17  ;;  %p665_p10 = scmp.gt.s32.totalorder %s4517_s27, 0  ;;  %vm4745_vm4 = vcmp.ne.s16.totalorder %v3461_v27, 0 }
  0x19   : > { %s441_s22 = sadd.s32 %s4644_s12, %s4374_s19  ;;  %s6092_s23 = smov (!%p4675_p9, %s460_s23), 15  ;;  %vm4765_vm6 = vcmp.ne.s16.totalorder %v3462_v34, 0 }
  0x1a   : > { %4003 = vmatpush3.bf16.msra.mxu0 %v4425_v4  ;;  %s3447_s13 = sshll.u32 %s441_s22, 2  ;;  %s455_s17 = sadd.s32 %s4376_s18, %s4644_s12 }
  0x1b   : > { %4004 = vmatprep.subr.bf16.mxu0 %v4427_v6  ;;  %4043 = vmatpush3.bf16.msra.mxu1 %v4426_v5  ;;  %s443_s16 = scalar_lea.vmem %s5932_s0, %s3447_s13  ;;  %s3449_s10 = sshll.u32 %s455_s17, 2  ;;  %v4796_v5 = vld [vmem:[%s5935_s3 + $0xc0] sm:$0xff]  }
  0x1c   : > { %4044 = vmatprep.subr.bf16.mxu1 %v4428_v7  ;;  %v3777_v13 = vld [vmem:[%s443_s16] sm:$0xff]   ;;  %v650_v14 = vld [vmem:[%s443_s16 + $0x8] sm:$0xf]  ;;  %s4689_s13 = scalar_lea.vmem %s5933_s1, %s3449_s10  ;;  %s4694_s18 = scalar_lea.vmem %s5939_s7, %s3449_s10 }
  0x1d   : > { %v3778_v15 = vunpack.c.l.bf16 %v3777_v13  ;;  %v3779_v16 = vunpack.c.h.bf16 %v3777_v13  ;;  %v653_v17 = vunpack.c.l.bf16 %v650_v14  ;;  %3172 = vst [vmem:[%s4694_s18 + $0x8] sm:$0xf] %v5941_v19  ;;  %3173 = vst [vmem:[%s4694_s18 + $0x14] sm:$0xf] %v5941_v19  ;;  %v3729_v26 = vld [vmem:[%s4689_s13] sm:$0xff]   ;;  %s6094_s23 = smov (!%p4675_p9, %s6092_s23), 15 }
  0x1e   : > { %4005 = vmatpush3.bf16.msra.mxu0 %v4427_v6  ;;  %3174 = vst [vmem:[%s4694_s18 + $0x20] sm:$0xf] %v5941_v19  ;;  %3175 = vst [vmem:[%s4694_s18 + $0x2c] sm:$0xf] %v5941_v19  ;;  %s666_s14 = scalar_select %p665_p10, 1, 0  ;;  %v3730_v28 = vunpack.c.l.bf16 %v3729_v26  ;;  %v3731_v29 = vunpack.c.h.bf16 %v3729_v26 }
  0x1f   : > { %4006 = vmatprep.subr.bf16.mxu0 %v4429_v8  ;;  %4045 = vmatpush3.bf16.msra.mxu1 %v4428_v7  ;;  %v654_v22 = vmul.f32 %v3778_v15, %v4682_v12  ;;  %v655_v23 = vmul.f32 %v3779_v16, %v4682_v12  ;;  %v656_v24 = vmul.f32 %v4682_v12, %v653_v17  ;;  %v3804_v35 = vld [vmem:[%s4689_s13 + $0x8] sm:$0xff]   ;;  %v3805_v39 = vld [vmem:[%s4689_s13 + $0x10] sm:$0xff]   ;;  %s4751_s21 = smul.u32 3, %s6094_s23  ;;  %v3807_v34 = vld [vmem:[%s4689_s13 + $0x20] sm:$0xff]   ;;  %p489_p11 = scmp.lt.s32.totalorder %s4517_s27, 1 }
  0x20   : > { %4046 = vmatprep.subr.bf16.mxu1 %v4430_v9  ;;  %3176 = vst [vmem:[%s4694_s18 + $0x38] sm:$0xf] %v5941_v19  ;;  %3177 = vst [vmem:[%s4694_s18 + $0x44] sm:$0xf] %v5941_v19  ;;  %v667_v36 = vstv %s666_s14  ;;  %v553_v38 = vmul.f32 %v3730_v28, %v4682_v12  ;;  %v554_v45 = vmul.f32 %v3731_v29, %v4682_v12  ;;  %v3734_v47 = vunpack.c.l.bf16 %v3804_v35  ;;  %s3457_s22 = sshll.u32 %s6088_s28, 1 }
  0x21   : > { %3178 = vst [vmem:[%s4694_s18 + $0x50] sm:$0xf] %v5941_v19  ;;  %3179 = vst [vmem:[%s4694_s18 + $0x5c] sm:$0xf] %v5941_v19  ;;  %v657_v31 = vadd.f32 %v4699_v18, %v654_v22  ;;  %v658_v32 = vadd.f32 %v4699_v18, %v655_v23  ;;  %v659_v33 = vadd.f32 %v4699_v18, %v656_v24  ;;  %vm4753_vm5 = vcmp.eq.s32.totalorder %v667_v36, 1  ;;  %s469_s23 = sadd.s32 %s4751_s21, %s4644_s12  ;;  %v4438_v24 = vld [vmem:[%s5935_s3 + $0x88] sm:$0xff]  }
  0x22   : > { %4007 = vmatpush3.bf16.msra.mxu0 %v4429_v8  ;;  %v584_v46 = vadd.f32 %v4699_v18, %v553_v38  ;;  %v3735_v48 = vunpack.c.h.bf16 %v3804_v35  ;;  %v3738_v53 = vunpack.c.l.bf16 %v3805_v39  ;;  %v585_v54 = vadd.f32 %v4699_v18, %v554_v45  ;;  %s3454_s15 = sshll.u32 %s469_s23, 2  ;;  %s6096_s27 = smov (!%p489_p11, %s4517_s27), 1 }
  0x23   : > { %4008 = vmatprep.subr.bf16.mxu0 %v4431_v10  ;;  %4047 = vmatpush3.bf16.msra.mxu1 %v4430_v9  ;;  %v660_v40 = vmax.f32 %v657_v31, 0.0  ;;  %v661_v41 = vmax.f32 %v658_v32, 0.0  ;;  %v662_v42 = vmax.f32 %v659_v33, 0.0  ;;  %v555_v56 = vmul.f32 %v3734_v47, %v4682_v12  ;;  %v3806_v33 = vld [vmem:[%s4689_s13 + $0x18] sm:$0xff]   ;;  %s5171_s23 = scalar_lea.vmem %s5934_s2, %s3454_s15  ;;  %s5754_s14 = sadd.s32 %s3457_s22, %s6096_s27 }
  0x24   : > { %4048 = vmatprep.subr.bf16.mxu1 %v4671_v11  ;;  %v608_v55 = vmax.f32 %v584_v46, 0.0  ;;  %v3739_v57 = vunpack.c.h.bf16 %v3805_v39  ;;  %v556_v60 = vmul.f32 %v3735_v48, %v4682_v12  ;;  %v557_v61 = vmul.f32 %v3738_v53, %v4682_v12  ;;  %v4439_v46 = vld [vmem:[%s5935_s3 + $0x90] sm:$0xff]   ;;  %s5420_s19 = scalar_select %p489_p11, 1, 0 }
  0x25   : > { %v663_v49 = vpack.c.bf16 %v661_v41, %v660_v40  ;;  %v664_v50 = vpack.c.bf16 %v662_v42, %v662_v42  ;;  %v609_v0 = vmax.f32 %v585_v54, 0.0  ;;  %v586_v2 = vadd.f32 %v4699_v18, %v555_v56  ;;  %v4841_v54 = vld [vmem:[%s4689_s13 + $0x28] sm:$0xff]  }
  0x26   : > { %4009 = vmatpush3.bf16.msra.mxu0 %v4431_v10  ;;  %v558_v8 = vmul.f32 %v3739_v57, %v4682_v12  ;;  %v587_v13 = vadd.f32 %v4699_v18, %v556_v60  ;;  %v588_v17 = vadd.f32 %v4699_v18, %v557_v61  ;;  %v3742_v47 = vunpack.c.l.bf16 %v3806_v33 }
  0x27   : > { %4010 = vmatprep.subr.bf16.mxu0 %v4433_v21  ;;  %4049 = vmatpush3.bf16.msra.mxu1 %v4671_v11  ;;  %v669_v58 = vsel %vm4753_vm5, %v663_v49, 0  ;;  %v670_v59 = vsel %vm4753_vm5, %v664_v50, 0  ;;  %v4800_v7 = vpack.c.bf16 %v609_v0, %v608_v55  ;;  %v610_v11 = vmax.f32 %v586_v2, 0.0  ;;  %v4442_v55 = vld [vmem:[%s5935_s3 + $0xc8] sm:$0xff]  }
  0x28   : > { %4050 = vmatprep.subr.bf16.mxu1 %v4434_v30  ;;  %v4782_v62 = vsel %vm4745_vm4, %v669_v58, 0  ;;  %v715_v63 = vsel %vm4765_vm6, %v670_v59, 0  ;;  %4014 = vmatprep.mubr.msk.bf16.mxu0 %vm4745_vm4, %v669_v58  ;;  %v589_v42 = vadd.f32 %v4699_v18, %v558_v8  ;;  %v611_v43 = vmax.f32 %v587_v13, 0.0 }
  0x29   : > { %v757_v3 = vunpack.c.h.b16 %v4782_v62  ;;  %v758_v4 = vunpack.c.l.b16 %v715_v63  ;;  %v3495_v6 = vcombine.low %v5941_v19, %v4782_v62  ;;  %v1343_v10 = vshrl.u32 %v4782_v62, 16 }
  0x2a   : > { %4011 = vmatpush3.bf16.msra.mxu0 %v4433_v21  ;;  %v4808_v14 = vsel %vm4745_vm4, %v4800_v7, 0  ;;  %v633_v28 = vpack.c.bf16 %v610_v11, %v610_v11  ;;  %v1345_v29 = vshll.u32 %v4782_v62, 16  ;;  %v612_v45 = vmax.f32 %v588_v17, 0.0 }
  0x2b   : > { %4012 = vmatprep.subr.bf16.mxu0 %v4435_v44  ;;  %4051 = vmatpush3.bf16.msra.mxu1 %v4434_v30  ;;  %v1013_v9 = vpack.c.b16 %v758_v4, %v757_v3  ;;  %v1027_v15 = vshrl.u32 %v3495_v6, 16  ;;  %v1030_v16 = vshll.u32 %v3495_v6, 16  ;;  %v4812_v20 = vcombine.low %v715_v63, %v4808_v14 }
  0x2c   : > { %4052 = vmatprep.subr.bf16.mxu1 %v4436_v52  ;;  %v5942_v23 = vshrl.u32 %v4808_v14, 16  ;;  %v5943_v27 = vshll.u32 %v4808_v14, 16  ;;  %v717_v38 = vsel %vm4765_vm6, %v633_v28, 0  ;;  %v760_v39 = vunpack.c.h.b16 %v4808_v14 }
  0x2d   : > { %v1035_v21 = vshrl.u32 %v1013_v9, 16  ;;  %v1038_v22 = vshll.u32 %v1013_v9, 16  ;;  %v1029_v25 = vrot.slane %v1027_v15, 3  ;;  %v1032_v26 = vrot.slane %v1030_v16, 4  ;;  %v4444_v15 = vld [vmem:[%s5935_s3 + $0xd0] sm:$0xff]  }
  0x2e   : > { %4013 = vmatpush3.bf16.msra.mxu0 %v4435_v44  ;;  %v1046_v32 = vrot.slane %v5942_v23, 3  ;;  %v1049_v36 = vrot.slane %v5943_v27, 4  ;;  %v761_v41 = vunpack.c.l.b16 %v717_v38  ;;  %v3743_v48 = vunpack.c.h.bf16 %v3806_v33 }
  0x2f   : > { %4053 = vmatpush3.bf16.msra.mxu1 %v4436_v52  ;;  %4078 = vmatprep.subr.bf16.mxu0 %v4437_v1  ;;  %v1037_v30 = vrot.slane %v1035_v21, 3  ;;  %v1040_v31 = vrot.slane %v1038_v22, 4  ;;  %v1033_v35 = vor.u32 %v1032_v26, %v1029_v25  ;;  %v613_v52 = vmax.f32 %v589_v42, 0.0  ;;  %v4884_v22 = vld [vmem:[%s4689_s13 + $0x30] sm:$0xff]  }
  0x30   : > { %4118 = vmatprep.subr.bf16.mxu1 %v4796_v5  ;;  %v4832_v44 = vor.u32 %v1049_v36, %v1046_v32  ;;  %v4838_v50 = vpack.c.b16 %v761_v41, %v760_v39  ;;  %v3746_v53 = vunpack.c.l.bf16 %v3807_v34  ;;  %v4848_v57 = vpack.c.bf16 %v612_v45, %v611_v43  ;;  %v4446_v39 = vld [vmem:[%s5935_s3 + $0xd8] sm:$0xff]  }
  0x31   : > { %4015 = vmatmul.mubr.bf16.vlgmr.msra.gmra.mrb[0].mxu0 %v4812_v20  ;;  %v1041_v40 = vor.u32 %v1040_v31, %v1037_v30  ;;  %v559_v58 = vmul.f32 %v3742_v47, %v4682_v12  ;;  %v3747_v59 = vunpack.c.h.bf16 %v3807_v34  ;;  %v4851_v60 = vrot.slane %v1345_v29, 1  ;;  %v4443_v29 = vld [vmem:[%s5935_s3 + $0xa0] sm:$0xff]  }
  0x32   : > { %4079 = vmatpush3.bf16.msra.mxu0 %v4437_v1  ;;  %5997 = vst [vmem:[#allocation4_spill] sm:$0xff] %v4848_v57  ;;  %v1354_v61 = vshrl.u32 %v4812_v20, 16  ;;  %4018 = vmatprep.mubr.bf16.mxu0 %v4838_v50  ;;  %v635_v63 = vpack.c.bf16 %v613_v52, %v613_v52  ;;  %v560_v0 = vmul.f32 %v3743_v48, %v4682_v12  ;;  %v4441_v1 = vld [vmem:[%s5935_s3 + $0x98] sm:$0xff]   ;;  %v4862_v2 = vsel %vm4745_vm4, %v4848_v57, 0 }
  0x33   : > { %4080 = vmatprep.subr.bf16.mxu0 %v4438_v24  ;;  %v1042_v49 = vsel %vm1025_vm7, %v1033_v35, %v1041_v40  ;;  %v1051_v56 = vsel %vm1025_vm7, %v1041_v40, %v4832_v44  ;;  %v590_v3 = vadd.f32 %v4699_v18, %v559_v58  ;;  %v3750_v4 = vunpack.c.l.bf16 %v4841_v54 }
  0x34   : > { %4054 = vmatprep.mubr.bf16.mxu1 %v1042_v49  ;;  %v561_v6 = vmul.f32 %v3746_v53, %v4682_v12  ;;  %v763_v8 = vunpack.c.h.b16 %v4862_v2  ;;  %v4873_v9 = vcombine.low %v717_v38, %v4862_v2  ;;  %v719_v11 = vsel %vm4765_vm6, %v635_v63, 0  ;;  %v4445_v49 = vld [vmem:[%s5935_s3 + $0xa8] sm:$0xff]  }
  0x35   : > { %4055 = vmatmul.mubr.bf16.vlgmr.msra.gmra.mrb[0].mxu1 %v1051_v56  ;;  %v591_v13 = vadd.f32 %v4699_v18, %v560_v0  ;;  %v614_v16 = vmax.f32 %v590_v3, 0.0  ;;  %v562_v17 = vmul.f32 %v3747_v59, %v4682_v12  ;;  %v563_v21 = vmul.f32 %v3750_v4, %v4682_v12  ;;  %v4447_v0 = vld [vmem:[%s5935_s3 + $0xe0] sm:$0xff]  }
  0x36   : > { %4081 = vmatpush3.bf16.msra.mxu0 %v4438_v24  ;;  %4119 = vmatpush3.bf16.msra.mxu1 %v4796_v5  ;;  %v764_v5 = vunpack.c.l.b16 %v719_v11  ;;  %v5957_v24 = vshrl.u32 %v4873_v9, 16  ;;  %v5961_v25 = vshll.u32 %v4873_v9, 16  ;;  %v592_v28 = vadd.f32 %v4699_v18, %v561_v6 }
  0x37   : > { %4082 = vmatprep.subr.bf16.mxu0 %v4439_v46  ;;  %4120 = vmatprep.subr.bf16.mxu1 %v4442_v55  ;;  %v615_v26 = vmax.f32 %v591_v13, 0.0  ;;  %v593_v31 = vadd.f32 %v4699_v18, %v562_v17  ;;  %v594_v32 = vadd.f32 %v4699_v18, %v563_v21  ;;  %v3751_v33 = vunpack.c.h.bf16 %v4841_v54 }
  0x38   : > { %v4892_v30 = vpack.c.b16 %v764_v5, %v763_v8  ;;  %v1055_v34 = vrot.slane %v5957_v24, 3  ;;  %v1058_v35 = vrot.slane %v5961_v25, 4  ;;  %v616_v38 = vmax.f32 %v592_v28, 0.0  ;;  %v5179_v25 = vld [vmem:[%s5171_s23] sm:$0xff]  }
  0x39   : > { %4019 = vmatmul.mubr.msk.bf16.gmra.mrb[4].mxu0 %vm4745_vm4, %v4848_v57  ;;  %v4901_v36 = vpack.c.bf16 %v615_v26, %v614_v16  ;;  %v617_v42 = vmax.f32 %v593_v31, 0.0  ;;  %v618_v43 = vmax.f32 %v594_v32, 0.0  ;;  %v3754_v48 = vunpack.c.l.bf16 %v4884_v22  ;;  %v3811_v32 = vld [vmem:[%s4689_s13 + $0x40] sm:$0xff]  }
  0x3a   : > { %4083 = vmatpush3.bf16.msra.mxu0 %v4439_v46  ;;  %4121 = vmatpush3.bf16.msra.mxu1 %v4442_v55  ;;  %v5953_v40 = vshrl.u32 %v4892_v30, 16  ;;  %v5960_v41 = vshll.u32 %v4892_v30, 16  ;;  %v1059_v45 = vor.u32 %v1058_v35, %v1055_v34  ;;  %v637_v47 = vpack.c.bf16 %v616_v38, %v616_v38 }
  0x3b   : > { %4084 = vmatprep.subr.bf16.mxu0 %v4441_v1  ;;  %4122 = vmatprep.subr.bf16.mxu1 %v4444_v15  ;;  %v4911_v46 = vsel %vm4745_vm4, %v4901_v36, 0  ;;  %v4924_v55 = vpack.c.bf16 %v618_v43, %v617_v42  ;;  %v564_v13 = vmul.f32 %v3751_v33, %v4682_v12  ;;  %v565_v21 = vmul.f32 %v3754_v48, %v4682_v12  ;;  %v4449_v33 = vld [vmem:[%s5935_s3 + $0xe8] sm:$0xff]  }
  0x3c   : > { %v1064_v52 = vrot.slane %v5953_v40, 3  ;;  %v1067_v53 = vrot.slane %v5960_v41, 4  ;;  %v4922_v54 = vcombine.low %v719_v11, %v4911_v46  ;;  %v1060_v56 = vsel %vm1025_vm7, %v4832_v44, %v1059_v45  ;;  %v3812_v48 = vld [vmem:[%s4689_s13 + $0x48] sm:$0xff]  }
  0x3d   : > { %5999 = vst [vmem:[#allocation6_spill] sm:$0xff] %v4924_v55  ;;  %v721_v58 = vsel %vm4765_vm6, %v637_v47, 0  ;;  %v766_v59 = vunpack.c.h.b16 %v4911_v46  ;;  %v5949_v63 = vshrl.u32 %v4911_v46, 16  ;;  %4058 = vmatprep.mubr.bf16.mxu1 %v1060_v56  ;;  %v4939_v44 = vsel %vm4745_vm4, %v4924_v55, 0 }
  0x3e   : > { %4085 = vmatpush3.bf16.msra.mxu0 %v4441_v1  ;;  %5998 = vst [vmem:[#allocation5_spill] sm:$0xff] %v4922_v54  ;;  %4123 = vmatpush3.bf16.msra.mxu1 %v4444_v15  ;;  %v1068_v1 = vor.u32 %v1067_v53, %v1064_v52  ;;  %v767_v3 = vunpack.c.l.b16 %v721_v58  ;;  %v5959_v4 = vshll.u32 %v4911_v46, 16  ;;  %v4943_v6 = vcombine.low %v721_v58, %v4939_v44  ;;  %v3810_v15 = vld [vmem:[%s4689_s13 + $0x38] sm:$0xff]  }
  0x3f   : > { %4086 = vmatprep.subr.bf16.mxu0 %v4443_v29  ;;  %4124 = vmatprep.subr.bf16.mxu1 %v4446_v39  ;;  %v1073_v8 = vrot.slane %v5949_v63, 3  ;;  %v3755_v11 = vunpack.c.h.bf16 %v4884_v22  ;;  %v4448_v22 = vld [vmem:[%s5935_s3 + $0xb0] sm:$0xff]   ;;  %v595_v31 = vadd.f32 %v4699_v18, %v564_v13  ;;  %v596_v35 = vadd.f32 %v4699_v18, %v565_v21 }
  0x40   : > { %4022 = vmatprep.mubr.bf16.mxu0 %v4922_v54  ;;  %v4951_v5 = vsel %vm1025_vm7, %v1059_v45, %v1068_v1  ;;  %v4953_v16 = vpack.c.b16 %v767_v3, %v766_v59  ;;  %v1076_v17 = vrot.slane %v5959_v4, 4  ;;  %v5946_v26 = vshrl.u32 %v4943_v6, 16  ;;  %v4450_v59 = vld [vmem:[%s5935_s3 + $0xb8] sm:$0xff]  }
  0x41   : > { %4059 = vmatmul.mubr.bf16.gmra.mrb[4].mxu1 %v4951_v5  ;;  %v5950_v28 = vshll.u32 %v4943_v6, 16  ;;  %v769_v38 = vunpack.c.h.b16 %v4939_v44  ;;  %v619_v47 = vmax.f32 %v595_v31, 0.0  ;;  %v620_v53 = vmax.f32 %v596_v35, 0.0 }
  0x42   : > { %4087 = vmatpush3.bf16.msra.mxu0 %v4443_v29  ;;  %6000 = vst [vmem:[#allocation7_spill] sm:$0xff] %v4953_v16  ;;  %4125 = vmatpush3.bf16.msra.mxu1 %v4446_v39  ;;  %v566_v29 = vmul.f32 %v3755_v11, %v4682_v12  ;;  %v1077_v34 = vor.u32 %v1076_v17, %v1073_v8  ;;  %v3758_v39 = vunpack.c.l.bf16 %v3810_v15  ;;  %v1082_v42 = vrot.slane %v5946_v26, 3 }
  0x43   : > { %4088 = vmatprep.subr.bf16.mxu0 %v4445_v49  ;;  %4126 = vmatprep.subr.bf16.mxu1 %v4447_v0  ;;  %v1085_v43 = vrot.slane %v5950_v28, 4  ;;  %v3759_v58 = vunpack.c.h.bf16 %v3810_v15  ;;  %v3762_v11 = vunpack.c.l.bf16 %v3811_v32  ;;  %v3763_v15 = vunpack.c.h.bf16 %v3811_v32 }
  0x44   : > { %4023 = vmatmul.mubr.bf16.gmra.mrb[8].mxu0 %v4953_v16  ;;  %v597_v45 = vadd.f32 %v4699_v18, %v566_v29  ;;  %v4983_v52 = vsel %vm1025_vm7, %v1068_v1, %v1077_v34  ;;  %v567_v56 = vmul.f32 %v3758_v39, %v4682_v12  ;;  %v4451_v1 = vld [vmem:[%s5935_s3 + $0xf0] sm:$0xff]   ;;  %v3766_v17 = vunpack.c.l.bf16 %v3812_v48 }
  0x45   : > { %4026 = vmatprep.mubr.msk.bf16.mxu0 %vm4745_vm4, %v4924_v55  ;;  %6001 = vst [vmem:[#allocation8_spill] sm:$0xff] %v4983_v52  ;;  %4062 = vmatprep.mubr.bf16.mxu1 %v4983_v52  ;;  %v4990_v3 = vor.u32 %v1085_v43, %v1082_v42  ;;  %v569_v35 = vmul.f32 %v3762_v11, %v4682_v12  ;;  %v1386_v41 = vshrl.u32 %v4953_v16, 16 }
  0x46   : > { %4089 = vmatpush3.bf16.msra.mxu0 %v4445_v49  ;;  %4127 = vmatpush3.bf16.msra.mxu1 %v4447_v0  ;;  %v621_v8 = vmax.f32 %v597_v45, 0.0  ;;  %v639_v49 = vpack.c.bf16 %v619_v47, %v619_v47  ;;  %v598_v13 = vadd.f32 %v4699_v18, %v567_v56  ;;  %v568_v0 = vmul.f32 %v3759_v58, %v4682_v12 }
  0x47   : > { %4090 = vmatprep.subr.bf16.mxu0 %v4448_v22  ;;  %4128 = vmatprep.subr.bf16.mxu1 %v4449_v33  ;;  %v4999_v21 = vsel %vm1025_vm7, %v1077_v34, %v4990_v3  ;;  %v570_v43 = vmul.f32 %v3763_v15, %v4682_v12  ;;  %v4452_v34 = vld [vmem:[%s5935_s3 + $0xf8] sm:$0xff]   ;;  %v3767_v47 = vunpack.c.h.bf16 %v3812_v48 }
  0x48   : > { %6002 = vst [vmem:[#allocation9_spill] sm:$0xff] %v4999_v21  ;;  %v5001_v29 = vpack.c.bf16 %v621_v8, %v620_v53  ;;  %v723_v31 = vsel %vm4765_vm6, %v639_v49, 0  ;;  %v622_v42 = vmax.f32 %v598_v13, 0.0  ;;  %v599_v32 = vadd.f32 %v4699_v18, %v568_v0  ;;  %v5034_v0 = vld [vmem:[%s4689_s13 + $0x50] sm:$0xff]  }
  0x49   : > { %v770_v39 = vunpack.c.l.b16 %v723_v31  ;;  %4063 = vmatmul.mubr.bf16.gmra.mrb[8].mxu1 %v4999_v21  ;;  %v571_v53 = vmul.f32 %v3766_v17, %v4682_v12  ;;  %v601_v13 = vadd.f32 %v4699_v18, %v570_v43 }
  0x4a   : > { %4091 = vmatpush3.bf16.msra.mxu0 %v4448_v22  ;;  %4129 = vmatpush3.bf16.msra.mxu1 %v4449_v33  ;;  %v5015_v45 = vsel %vm4745_vm4, %v5001_v29, 0  ;;  %v600_v22 = vadd.f32 %v4699_v18, %v569_v35  ;;  %v5022_v33 = vld [vmem:[%s5935_s3 + $0x100] sm:$0xff]   ;;  %v641_v11 = vpack.c.bf16 %v622_v42, %v622_v42  ;;  %v623_v15 = vmax.f32 %v599_v32, 0.0 }
  0x4b   : > { %4092 = vmatprep.subr.bf16.mxu0 %v4450_v59  ;;  %4130 = vmatprep.subr.bf16.mxu1 %v4451_v1  ;;  %v5025_v56 = vcombine.low %v723_v31, %v5015_v45  ;;  %v5027_v58 = vpack.c.b16 %v770_v39, %v769_v38  ;;  %v5944_v8 = vshrl.u32 %v5015_v45, 16  ;;  %v5945_v49 = vshll.u32 %v5015_v45, 16  ;;  %v5050_v32 = vld [vmem:[%s5935_s3 + $0x140] sm:$0xff]  }
  0x4c   : > { %v772_v48 = vunpack.c.h.b16 %v5015_v45  ;;  %v725_v39 = vsel %vm4765_vm6, %v641_v11, 0  ;;  %v624_v42 = vmax.f32 %v600_v22, 0.0  ;;  %v625_v43 = vmax.f32 %v601_v13, 0.0 }
  0x4d   : > { %6003 = vst [vmem:[#allocation10_spill] sm:$0xff] %v5025_v56  ;;  %4027 = vmatmul.mubr.bf16.gmra.mrb[12].mxu0 %v5025_v56  ;;  %v5947_v17 = vshrl.u32 %v5027_v58, 16  ;;  %v5948_v38 = vshll.u32 %v5027_v58, 16  ;;  %v1100_v31 = vrot.slane %v5944_v8, 3  ;;  %v1103_v35 = vrot.slane %v5945_v49, 4 }
  0x4e   : > { %4093 = vmatpush3.bf16.msra.mxu0 %v4450_v59  ;;  %4131 = vmatpush3.bf16.msra.mxu1 %v4451_v1  ;;  %v572_v59 = vmul.f32 %v3767_v47, %v4682_v12  ;;  %v773_v11 = vunpack.c.l.b16 %v725_v39  ;;  %v5056_v22 = vpack.c.bf16 %v624_v42, %v623_v15  ;;  %v643_v13 = vpack.c.bf16 %v625_v43, %v625_v43 }
  0x4f   : > { %4132 = vmatprep.subr.bf16.mxu1 %v4452_v34  ;;  %4158 = vmatprep.subr.bf16.mxu0 %v5022_v33  ;;  %v1091_v19 = vrot.slane %v5947_v17, 3  ;;  %v1094_v1 = vrot.slane %v5948_v38, 4  ;;  %v1104_v23 = vor.u32 %v1103_v35, %v1100_v31  ;;  %v602_v47 = vadd.f32 %v4699_v18, %v571_v53 }
  0x50   : > { %6004 = vst [vmem:[#allocation11_spill] sm:$0xff] %v5056_v22  ;;  %v603_v27 = vadd.f32 %v4699_v18, %v572_v59  ;;  %v1358_v8 = vshll.u32 %v4838_v50, 16  ;;  %v5061_v26 = vpack.c.b16 %v773_v11, %v772_v48  ;;  %v3770_v17 = vunpack.c.l.bf16 %v5034_v0 }
  0x51   : > { %v1095_v49 = vor.u32 %v1094_v1, %v1091_v19  ;;  %v5067_v31 = vsel %vm4745_vm4, %v5056_v22, 0  ;;  %v727_v15 = vsel %vm4765_vm6, %v643_v13, 0  ;;  %v626_v53 = vmax.f32 %v602_v47, 0.0 }
  0x52   : > { %6005 = vst [vmem:[#allocation12_spill] sm:$0xff] %v5061_v26  ;;  %4133 = vmatpush3.bf16.msra.mxu1 %v4452_v34  ;;  %v627_v35 = vmax.f32 %v603_v27, 0.0  ;;  %4030 = vmatprep.mubr.bf16.mxu0 %v5061_v26  ;;  %v775_v34 = vunpack.c.h.b16 %v5067_v31  ;;  %v5082_v42 = vcombine.low %v725_v39, %v5067_v31  ;;  %v1362_v43 = vshrl.u32 %v4838_v50, 16 }
  0x53   : > { %4198 = vmatprep.subr.bf16.mxu1 %v5050_v32  ;;  %v5074_v19 = vsel %vm1025_vm7, %v4990_v3, %v1095_v49  ;;  %v5077_v48 = vsel %vm1025_vm7, %v1095_v49, %v1104_v23  ;;  %v776_v27 = vunpack.c.l.b16 %v727_v15  ;;  %v573_v3 = vmul.f32 %v3770_v17, %v4682_v12 }
  0x54   : > { %6006 = vst [vmem:[#allocation13_spill] sm:$0xff] %v5074_v19  ;;  %6007 = vst [vmem:[#allocation14_spill] sm:$0xff] %v5077_v48  ;;  %4066 = vmatprep.mubr.bf16.mxu1 %v5074_v19  ;;  %v5086_v59 = vpack.c.bf16 %v627_v35, %v626_v53  ;;  %v5951_v49 = vshrl.u32 %v5082_v42, 16  ;;  %v5952_v39 = vshll.u32 %v5082_v42, 16  ;;  %v1350_v1 = vshll.u32 %v4812_v20, 16 }
  0x55   : > { %4067 = vmatmul.mubr.bf16.gmra.mrb[12].mxu1 %v5077_v48  ;;  %4031 = vmatmul.mubr.msk.bf16.gmra.mrb[16].mxu0 %vm4745_vm4, %v5056_v22  ;;  %v1360_v11 = vrot.slane %v1358_v8, 1  ;;  %v5098_v13 = vpack.c.b16 %v776_v27, %v775_v34  ;;  %v604_v17 = vadd.f32 %v4699_v18, %v573_v3  ;;  %v1658_v47 = vrot.slane %v1354_v61, 3  ;;  %v3814_v48 = vld [vmem:[%s4689_s13 + $0x58] sm:$0xff]  }
  0x56   : > { %v5103_v12 = vsel %vm4745_vm4, %v5086_v59, 0  ;;  %v1109_v53 = vrot.slane %v5951_v49, 3  ;;  %v1112_v35 = vrot.slane %v5952_v39, 4  ;;  %v1348_v34 = vor.u32 %v4851_v60, %v1343_v10 }
  0x57   : > { %v5113_v38 = vcombine.low %v727_v15, %v5103_v12  ;;  %v5954_v27 = vshrl.u32 %v5098_v13, 16  ;;  %v5955_v18 = vshll.u32 %v5098_v13, 16  ;;  %v628_v3 = vmax.f32 %v604_v17, 0.0 }
  0x58   : > { %v5956_v63 = vshrl.u32 %v5103_v12, 16  ;;  %v1113_v28 = vor.u32 %v1112_v35, %v1109_v53  ;;  %v5958_v49 = vshll.u32 %v5103_v12, 16  ;;  %v1352_v39 = vrot.slane %v1350_v1, 1 }
  0x59   : > { %6008 = vst [vmem:[#allocation15_spill] sm:$0xff] %v5113_v38  ;;  %4034 = vmatprep.mubr.bf16.mxu0 %v5113_v38  ;;  %v1659_v40 = vrot.slane %v1350_v1, 4  ;;  %v1118_v15 = vrot.slane %v5954_v27, 3  ;;  %v1121_v62 = vrot.slane %v5955_v18, 4  ;;  %v645_v10 = vpack.c.bf16 %v628_v3, %v628_v3 }
  0x5a   : > { %v1127_v60 = vrot.slane %v5956_v63, 3  ;;  %v5130_v17 = vsel %vm1025_vm7, %v1104_v23, %v1113_v28  ;;  %v778_v53 = vunpack.c.h.b16 %v5103_v12  ;;  %v1130_v1 = vrot.slane %v5958_v49, 4 }
  0x5b   : > { %6009 = vst [vmem:[#allocation16_spill] sm:$0xff] %v5130_v17  ;;  %v1353_v35 = vsel %vm1341_vm8, %v1348_v34, %v1352_v39  ;;  %4070 = vmatprep.mubr.bf16.mxu1 %v5130_v17  ;;  %v1122_v27 = vor.u32 %v1121_v62, %v1118_v15  ;;  %v5139_v18 = vsel %vm4765_vm6, %v645_v10, 0  ;;  %v1356_v3 = vor.u32 %v1354_v61, %v1352_v39 }
  0x5c   : > { %v1661_v63 = vrot.slane %v1362_v43, 3  ;;  %v779_v23 = vunpack.c.l.b16 %v5139_v18  ;;  %v5144_v24 = vor.u32 %v1130_v1, %v1127_v60  ;;  %v3499_v49 = vcombine.low %v5139_v18, %v5139_v18 }
  0x5d   : > { %v1660_v4 = vor.u32 %v1659_v40, %v1658_v47  ;;  %v5152_v34 = vsel %vm1025_vm7, %v1113_v28, %v1122_v27  ;;  %v1662_v15 = vrot.slane %v1358_v8, 4  ;;  %v1366_v20 = vshll.u32 %v4862_v2, 16 }
  0x5e   : > { %6010 = vst [vmem:[#allocation17_spill] sm:$0xff] %v5152_v34  ;;  %v1370_v61 = vshrl.u32 %v4862_v2, 16  ;;  %4071 = vmatmul.mubr.bf16.gmra.mrb[16].mxu1 %v5152_v34  ;;  %v5159_v39 = vpack.c.b16 %v779_v23, %v778_v53  ;;  %v5163_v62 = vsel %vm1025_vm7, %v1122_v27, %v5144_v24  ;;  %v1134_v40 = vshrl.u32 %v3499_v49, 16 }
  0x5f   : > { %6012 = vst [vmem:[#allocation19_spill] sm:$0xff] %v5163_v62  ;;  %v1137_v47 = vshll.u32 %v3499_v49, 16  ;;  %4074 = vmatprep.mubr.bf16.mxu1 %v5163_v62  ;;  %v1663_v28 = vor.u32 %v1662_v15, %v1661_v63  ;;  %v1666_v50 = vrot.slane %v1366_v20, 4  ;;  %v1364_v8 = vor.u32 %v1362_v43, %v1360_v11 }
  0x60   : > { %6011 = vst [vmem:[#allocation18_spill] sm:$0xff] %v5159_v39  ;;  %v1665_v10 = vrot.slane %v1370_v61, 3  ;;  %4035 = vmatmul.mubr.bf16.gmra.mrb[20].mxu0 %v5159_v39  ;;  %v1136_v60 = vrot.slane %v1134_v40, 3  ;;  %v1368_v1 = vrot.slane %v1366_v20, 1  ;;  %v1374_v53 = vshll.u32 %v4922_v54, 16 }
  0x61   : > { %v1139_v2 = vrot.slane %v1137_v47, 4  ;;  %4094 = vmatprep.mubr.bf16.mxu0 %v1353_v35  ;;  %v1378_v49 = vshrl.u32 %v4922_v54, 16  ;;  %v1382_v63 = vshll.u32 %v4953_v16, 16  ;;  %v1361_v43 = vsel %vm1341_vm8, %v1356_v3, %v1360_v11  ;;  %v4454_v3 = vld [vmem:[%s5935_s3 + $0x108] sm:$0xff]  }
  0x62   : > { %v1664_v23 = vsel %vm1025_vm7, %v1660_v4, %v1663_v28  ;;  %v1667_v15 = vor.u32 %v1666_v50, %v1665_v10  ;;  %v1376_v20 = vrot.slane %v1374_v53, 1  ;;  %v1670_v47 = vrot.slane %v1374_v53, 4  ;;  %v673_v54 = vld [vmem:[%s5171_s23 + $0x8] sm:$0xf] }
  0x63   : > { %v1140_v27 = vor.u32 %v1139_v2, %v1136_v60  ;;  %v1669_v40 = vrot.slane %v1378_v49, 3  ;;  %v1369_v62 = vsel %vm1341_vm8, %v1364_v8, %v1368_v1  ;;  %v1372_v22 = vor.u32 %v1370_v61, %v1368_v1 }
  0x64   : > { %v1674_v34 = vrot.slane %v1382_v63, 4  ;;  %v1673_v2 = vrot.slane %v1386_v41, 3  ;;  %v1380_v11 = vor.u32 %v1378_v49, %v1376_v20  ;;  %v1390_v4 = vshll.u32 %v4939_v44, 16 }
  0x65   : > { %v1141_v35 = vsel %vm1025_vm7, %v5144_v24, %v1140_v27  ;;  %v1671_v60 = vor.u32 %v1670_v47, %v1669_v40  ;;  %v1384_v10 = vrot.slane %v1382_v63, 1  ;;  %v1394_v50 = vshrl.u32 %v4939_v44, 16 }
  0x66   : > { %4075 = vmatmul.mubr.bf16.gmra.mrb[20].mxu1 %v1141_v35  ;;  %v1398_v53 = vshll.u32 %v5025_v56, 16  ;;  %v1402_v27 = vshrl.u32 %v5025_v56, 16  ;;  %v1406_v1 = vshll.u32 %v5061_v26, 16  ;;  %v1668_v49 = vsel %vm1025_vm7, %v1663_v28, %v1667_v15  ;;  %v4455_v28 = vld [vmem:[%s5935_s3 + $0x110] sm:$0xff]  }
  0x67   : > { %4134 = vmatprep.mubr.bf16.mxu1 %v1664_v23  ;;  %v5196_v40 = vsel %vm1341_vm8, %v1372_v22, %v1376_v20  ;;  %v1677_v63 = vrot.slane %v1394_v50, 3  ;;  %v1678_v47 = vrot.slane %v1390_v4, 4  ;;  %v1672_v44 = vsel %vm1025_vm7, %v1667_v15, %v1671_v60 }
  0x68   : > { %4095 = vmatmul.mubr.bf16.vlgmr.msra.gmra.mrb[24].mxu0 %v1361_v43  ;;  %6013 = vst [vmem:[#allocation20_spill] sm:$0xff] %v5196_v40  ;;  %v1681_v35 = vrot.slane %v1402_v27, 3  ;;  %v1682_v61 = vrot.slane %v1398_v53, 4  ;;  %v1400_v17 = vrot.slane %v1398_v53, 1  ;;  %v1675_v23 = vor.u32 %v1674_v34, %v1673_v2  ;;  %v4458_v34 = vld [vmem:[%s5935_s3 + $0x148] sm:$0xff]  }
  0x69   : > { %4159 = vmatpush3.bf16.msra.mxu0 %v5022_v33  ;;  %4098 = vmatprep.mubr.bf16.mxu0 %v1369_v62  ;;  %v5204_v22 = vsel %vm1341_vm8, %v1380_v11, %v1384_v10  ;;  %v1392_v43 = vrot.slane %v1390_v4, 1  ;;  %v1410_v20 = vshrl.u32 %v5061_v26, 16  ;;  %v1388_v33 = vor.u32 %v1386_v41, %v1384_v10  ;;  %v4457_v41 = vld [vmem:[%s5935_s3 + $0x118] sm:$0xff]  }
  0x6a   : > { %4160 = vmatprep.subr.bf16.mxu0 %v4454_v3  ;;  %6014 = vst [vmem:[#allocation21_spill] sm:$0xff] %v5204_v22  ;;  %v1408_v62 = vrot.slane %v1406_v1, 1  ;;  %v1686_v8 = vrot.slane %v1406_v1, 4  ;;  %v1414_v15 = vshll.u32 %v5067_v31, 16  ;;  %v1679_v56 = vor.u32 %v1678_v47, %v1677_v63  ;;  %v4460_v47 = vld [vmem:[%s5935_s3 + $0x150] sm:$0xff]  }
  0x6b   : > { %v1396_v2 = vor.u32 %v1394_v50, %v1392_v43  ;;  %v1685_v53 = vrot.slane %v1410_v20, 3  ;;  %v1418_v55 = vshrl.u32 %v5067_v31, 16  ;;  %v1683_v11 = vor.u32 %v1682_v61, %v1681_v35 }
  0x6c   : > { %v1404_v4 = vor.u32 %v1402_v27, %v1400_v17  ;;  %v1690_v19 = vrot.slane %v1414_v15, 4  ;;  %v1412_v26 = vor.u32 %v1410_v20, %v1408_v62  ;;  %v1416_v63 = vrot.slane %v1414_v15, 1 }
  0x6d   : > { %4161 = vmatpush3.bf16.msra.mxu0 %v4454_v3  ;;  %v1687_v10 = vor.u32 %v1686_v8, %v1685_v53  ;;  %v1689_v1 = vrot.slane %v1418_v55, 3  ;;  %v1422_v50 = vshll.u32 %v5113_v38, 16  ;;  %v1676_v31 = vsel %vm1025_vm7, %v1671_v60, %v1675_v23 }
  0x6e   : > { %4135 = vmatmul.mubr.bf16.vlgmr.msra.gmra.mrb[24].mxu1 %v1668_v49  ;;  %4162 = vmatprep.subr.bf16.mxu0 %v4455_v28  ;;  %v5219_v3 = vsel %vm1341_vm8, %v1388_v33, %v1392_v43  ;;  %v1426_v27 = vshrl.u32 %v5113_v38, 16  ;;  %v3774_v61 = vunpack.c.l.bf16 %v3814_v48  ;;  %v1680_v49 = vsel %vm1025_vm7, %v1675_v23, %v1679_v56  ;;  %v4459_v43 = vld [vmem:[%s5935_s3 + $0x120] sm:$0xff]  }
  0x6f   : > { %4138 = vmatprep.mubr.bf16.mxu1 %v1672_v44  ;;  %6015 = vst [vmem:[#allocation22_spill] sm:$0xff] %v5219_v3  ;;  %4199 = vmatpush3.bf16.msra.mxu1 %v5050_v32  ;;  %v5225_v8 = vor.u32 %v1690_v19, %v1689_v1  ;;  %v1430_v60 = vshll.u32 %v5159_v39, 16  ;;  %v5971_v44 = vshrl.u32 %v5159_v39, 16  ;;  %v5235_v35 = vsel %vm1025_vm7, %v1679_v56, %v1683_v11 }
  0x70   : > { %4099 = vmatmul.mubr.bf16.gmra.mrb[28].mxu0 %v5196_v40  ;;  %4200 = vmatprep.subr.bf16.mxu1 %v4458_v34  ;;  %v5238_v23 = vsel %vm1341_vm8, %v1396_v2, %v1400_v17  ;;  %v5241_v19 = vsel %vm1341_vm8, %v1404_v4, %v1408_v62  ;;  %v5247_v20 = vsel %vm1025_vm7, %v1683_v11, %v1687_v10  ;;  %v1424_v56 = vrot.slane %v1422_v50, 1  ;;  %v5255_v62 = vld [vmem:[%s5937_s5] ss:$0 sm:$0xff] }
  0x71   : > { %4163 = vmatpush3.bf16.msra.mxu0 %v4455_v28  ;;  %4102 = vmatprep.mubr.bf16.mxu0 %v5204_v22  ;;  %6016 = vst [vmem:[#allocation23_spill] sm:$0xff] %v5238_v23  ;;  %6017 = vst [vmem:[#allocation24_spill] sm:$0xff] %v5241_v19  ;;  %v5250_v28 = vsel %vm1341_vm8, %v1412_v26, %v1416_v63  ;;  %v1420_v33 = vor.u32 %v1418_v55, %v1416_v63  ;;  %v1693_v15 = vrot.slane %v1426_v27, 3  ;;  %v4462_v55 = vld [vmem:[%s5935_s3 + $0x158] sm:$0xff]  }
  0x72   : > { %4164 = vmatprep.subr.bf16.mxu0 %v4457_v41  ;;  %6018 = vst [vmem:[#allocation25_spill] sm:$0xff] %v5250_v28  ;;  %v1694_v17 = vrot.slane %v1422_v50, 4  ;;  %v6019_v2 = vunpack.c.h.bf16 %v5034_v0  ;;  %v575_v11 = vmul.f32 %v5255_v62, %v3774_v61  ;;  %v5263_v26 = vsel %vm1025_vm7, %v1687_v10, %v5225_v8  ;;  %v5273_v50 = vld [vmem:[%s5938_s6] ss:$0 sm:$0xff] }
  0x73   : > { %4201 = vmatpush3.bf16.msra.mxu1 %v4458_v34  ;;  %v1697_v34 = vrot.slane %v5971_v44, 3  ;;  %v1698_v4 = vrot.slane %v1430_v60, 4  ;;  %v3775_v1 = vunpack.c.h.bf16 %v3814_v48  ;;  %v1428_v0 = vor.u32 %v1426_v27, %v1424_v56 }
  0x74   : > { %v574_v53 = vmul.f32 %v5255_v62, %v6019_v2  ;;  %4202 = vmatprep.subr.bf16.mxu1 %v4460_v47  ;;  %v1432_v63 = vrot.slane %v1430_v60, 1  ;;  %v606_v61 = vadd.f32 %v5273_v50, %v575_v11  ;;  %v4461_v2 = vld [vmem:[%s5935_s3 + $0x128] sm:$0xff]   ;;  %v5281_v48 = vsel %vm1341_vm8, %v1420_v33, %v1424_v56  ;;  %v4463_v33 = vld [vmem:[%s5935_s3 + $0x160] sm:$0xff]  }
  0x75   : > { %4165 = vmatpush3.bf16.msra.mxu0 %v4457_v41  ;;  %6020 = vst [vmem:[#allocation26_spill] sm:$0xff] %v5281_v48  ;;  %v576_v41 = vmul.f32 %v5255_v62, %v3775_v1  ;;  %v6021_v27 = vshll.u32 %v4873_v9, 16  ;;  %v6022_v32 = vshll.u32 %v4892_v30, 16  ;;  %v6023_v22 = vshll.u32 %v4911_v46, 16 }
  0x76   : > { %v605_v10 = vadd.f32 %v5273_v50, %v574_v53  ;;  %4139 = vmatmul.mubr.bf16.gmra.mrb[28].mxu1 %v1676_v31  ;;  %4166 = vmatprep.subr.bf16.mxu0 %v4459_v43  ;;  %v5290_v31 = vor.u32 %v1694_v17, %v1693_v15  ;;  %v630_v44 = vmax.f32 %v606_v61, 0.0  ;;  %v6026_v17 = vshll.u32 %v4943_v6, 16 }
  0x77   : > { %v5286_v60 = vrot.slane %v6021_v27, 1  ;;  %v2155_v53 = vrot.slane %v6022_v32, 1  ;;  %4142 = vmatprep.mubr.bf16.mxu1 %v1680_v49  ;;  %4203 = vmatpush3.bf16.msra.mxu1 %v4460_v47  ;;  %v2158_v40 = vrot.slane %v6023_v22, 1  ;;  %v607_v56 = vadd.f32 %v5273_v50, %v576_v41 }
  0x78   : > { %v629_v11 = vmax.f32 %v605_v10, 0.0  ;;  %4103 = vmatmul.mubr.bf16.gmra.mrb[32].mxu0 %v5219_v3  ;;  %4204 = vmatprep.subr.bf16.mxu1 %v4462_v55  ;;  %v6024_v32 = vshrl.u32 %v4873_v9, 16  ;;  %v6025_v47 = vshrl.u32 %v4892_v30, 16  ;;  %v2161_v1 = vrot.slane %v6026_v17, 1 }
  0x79   : > { %4106 = vmatprep.mubr.bf16.mxu0 %v5238_v23  ;;  %4167 = vmatpush3.bf16.msra.mxu0 %v4459_v43  ;;  %v5307_v22 = vor.u32 %v1698_v4, %v1697_v34  ;;  %v6028_v61 = vshrl.u32 %v4911_v46, 16  ;;  %v6029_v27 = vshll.u32 %v5027_v58, 16 }
  0x7a   : > { %v2154_v49 = vor.u32 %v5286_v60, %v6024_v32  ;;  %v2157_v15 = vor.u32 %v2155_v53, %v6025_v47  ;;  %v5309_v10 = vpack.c.bf16 %v630_v44, %v629_v11  ;;  %4168 = vmatprep.subr.bf16.mxu0 %v4461_v2  ;;  %v4464_v32 = vld [vmem:[%s5935_s3 + $0x130] sm:$0xff]   ;;  %v631_v47 = vmax.f32 %v607_v56, 0.0 }
  0x7b   : > { %v2160_v41 = vor.u32 %v2158_v40, %v6028_v61  ;;  %v2164_v3 = vrot.slane %v6029_v27, 1  ;;  %v6030_v44 = vshrl.u32 %v4943_v6, 16  ;;  %4205 = vmatpush3.bf16.msra.mxu1 %v4462_v55  ;;  %v6031_v11 = vshrl.u32 %v5027_v58, 16 }
  0x7c   : > { %6027 = vst [vmem:[#allocation27_spill] sm:$0xff] %v5309_v10  ;;  %v5319_v17 = vsel %vm1341_vm8, %v2154_v49, %v2155_v53  ;;  %v5322_v43 = vsel %vm1341_vm8, %v2157_v15, %v2158_v40  ;;  %v5329_v46 = vsel %vm4745_vm4, %v5309_v10, 0  ;;  %v6032_v53 = vshll.u32 %v5015_v45, 16  ;;  %4206 = vmatprep.subr.bf16.mxu1 %v4463_v33  ;;  %v4465_v40 = vld [vmem:[%s5935_s3 + $0x168] sm:$0xff]  }
  0x7d   : > { %v2163_v34 = vor.u32 %v2161_v1, %v6030_v44  ;;  %v5332_v4 = vsel %vm1341_vm8, %v2160_v41, %v2161_v1  ;;  %v2166_v56 = vor.u32 %v2164_v3, %v6031_v11  ;;  %v3524_v55 = vcombine.low %v5329_v46, %v5329_v46  ;;  %4169 = vmatpush3.bf16.msra.mxu0 %v4461_v2 }
  0x7e   : > { %v2167_v49 = vrot.slane %v6032_v53, 1  ;;  %v5977_v1 = vshll.u32 %v5329_v46, 16  ;;  %v647_v61 = vpack.c.bf16 %v631_v47, %v631_v47  ;;  %v6033_v44 = vshrl.u32 %v5015_v45, 16  ;;  %4143 = vmatmul.mubr.bf16.gmra.mrb[32].mxu1 %v5235_v35  ;;  %4170 = vmatprep.subr.bf16.mxu0 %v4464_v32  ;;  %v4466_v45 = vld [vmem:[%s5935_s3 + $0x138] sm:$0xff]  }
  0x7f   : > { %v5346_v41 = vsel %vm1341_vm8, %v2163_v34, %v2164_v3  ;;  %v6034_v53 = vshll.u32 %v5082_v42, 16  ;;  %v5357_v15 = vsel %vm1341_vm8, %v1428_v0, %v1432_v63  ;;  %v6035_v2 = vshrl.u32 %v5159_v39, 16  ;;  %4146 = vmatprep.mubr.bf16.mxu1 %v5247_v20  ;;  %4207 = vmatpush3.bf16.msra.mxu1 %v4463_v33 }
  0x80   : > { %v5349_v27 = vsel %vm1341_vm8, %v2166_v56, %v2167_v49  ;;  %v2169_v11 = vor.u32 %v2167_v49, %v6033_v44  ;;  %v5363_v3 = vshll.u32 %v3524_v55, 16  ;;  %v5370_v34 = vsel %vm4765_vm6, %v647_v61, 0  ;;  %4107 = vmatmul.mubr.bf16.gmra.mrb[36].mxu0 %v5241_v19  ;;  %4208 = vmatprep.subr.bf16.mxu1 %v4465_v40  ;;  %v4467_v44 = vld [vmem:[%s5935_s3 + $0x170] sm:$0xff]  }
  0x81   : > { %v2170_v23 = vrot.slane %v6034_v53, 1  ;;  %v5361_v47 = vor.u32 %v6035_v2, %v1432_v63  ;;  %v3549_v35 = vcombine.low %v5370_v34, %v5370_v34  ;;  %v6036_v63 = vshrl.u32 %v5082_v42, 16  ;;  %4110 = vmatprep.mubr.bf16.mxu0 %v5250_v28  ;;  %4171 = vmatpush3.bf16.msra.mxu0 %v4464_v32 }
  0x82   : > { %v6037_v49 = vshll.u32 %v5098_v13, 16  ;;  %v1696_v61 = vsel %vm1025_vm7, %v5225_v8, %v5290_v31  ;;  %v6038_v20 = vshrl.u32 %v5329_v46, 16  ;;  %v5396_v53 = vcombine.low %v5139_v18, %v5329_v46  ;;  %4172 = vmatprep.subr.bf16.mxu0 %v4466_v45  ;;  %v5409_v18 = vld [vmem:[%s5935_s3 + $0x180] sm:$0xff]  }
  0x83   : > { %v5377_v0 = vsel %vm1341_vm8, %v2169_v11, %v2170_v23  ;;  %v2172_v56 = vor.u32 %v2170_v23, %v6036_v63  ;;  %v6039_v23 = vshll.u32 %v5103_v12, 16  ;;  %v1707_v8 = vrot.slane %v5977_v1, 4  ;;  %4209 = vmatpush3.bf16.msra.mxu1 %v4465_v40 }
  0x84   : > { %v2173_v55 = vrot.slane %v6037_v49, 1  ;;  %v1704_v33 = vrot.slane %v6038_v20, 3  ;;  %v1711_v2 = vshrl.u32 %v3549_v35, 16  ;;  %v6040_v49 = vshrl.u32 %v5098_v13, 16  ;;  %4210 = vmatprep.subr.bf16.mxu1 %v4467_v44 }
  0x85   : > { %v2176_v11 = vrot.slane %v6039_v23, 1  ;;  %v1714_v19 = vshll.u32 %v3549_v35, 16  ;;  %v6041_v23 = vshll.u32 %v4808_v14, 16  ;;  %v6042_v1 = vshrl.u32 %v5103_v12, 16  ;;  %v4468_v12 = vld [vmem:[%s5935_s3 + $0x178] sm:$0xff]   ;;  %4173 = vmatpush3.bf16.msra.mxu0 %v4466_v45 }
  0x86   : > { %v5402_v63 = vsel %vm1341_vm8, %v2172_v56, %v2173_v55  ;;  %v2175_v20 = vor.u32 %v2173_v55, %v6040_v49  ;;  %v2180_v56 = vshll.u32 %v5396_v53, 16  ;;  %v1700_v35 = vsel %vm1025_vm7, %v5290_v31, %v5307_v22  ;;  %4147 = vmatmul.mubr.bf16.gmra.mrb[36].mxu1 %v5263_v26  ;;  %4238 = vmatprep.subr.bf16.mxu0 %v5409_v18 }
  0x87   : > { %v5413_v32 = vrot.slane %v6041_v23, 1  ;;  %v2178_v28 = vor.u32 %v2176_v11, %v6042_v1  ;;  %v1440_v55 = vrot.slane %v5363_v3, 1  ;;  %v781_v23 = vunpack.c.h.b16 %v5329_v46  ;;  %4150 = vmatprep.mubr.bf16.mxu1 %v1696_v61  ;;  %4211 = vmatpush3.bf16.msra.mxu1 %v4467_v44 }
  0x88   : > { %v5427_v49 = vsel %vm1341_vm8, %v2175_v20, %v2176_v11  ;;  %v2182_v1 = vrot.slane %v2180_v56, 1  ;;  %v782_v10 = vunpack.c.l.b16 %v5370_v34  ;;  %v2184_v31 = vshrl.u32 %v5396_v53, 16  ;;  %4111 = vmatmul.mubr.bf16.gmra.mrb[40].mxu0 %v5281_v48  ;;  %4212 = vmatprep.subr.bf16.mxu1 %v4468_v12 }
  0x89   : > { %v6043_v39 = vunpack.c.l.bf16 %v5179_v25  ;;  %v5438_v3 = vor.u32 %v1707_v8, %v1704_v33  ;;  %v5440_v11 = vrot.slane %v1711_v2, 3  ;;  %v6044_v20 = vunpack.c.h.bf16 %v5179_v25  ;;  %4114 = vmatprep.mubr.bf16.mxu0 %v5357_v15 }
  0x8a   : > { %v2417_v16 = vrot.slane %v2180_v56, 4  ;;  %v1716_v21 = vrot.slane %v1714_v19, 4  ;;  %v5449_v52 = vsel %vm1341_vm8, %v2178_v28, %v2182_v1  ;;  %v690_v33 = vstv %s5420_s19  ;;  %v5460_v19 = vld [vmem:[%s5935_s3 + $0x1c0] sm:$0xff]  }
  0x8b   : > { %v677_v40 = vmul.f32 %v5255_v62, %v6043_v39  ;;  %v678_v38 = vmul.f32 %v5255_v62, %v6044_v20  ;;  %v5451_v39 = vpack.c.b16 %v782_v10, %v781_v23  ;;  %v2186_v45 = vor.u32 %v2184_v31, %v2182_v1  ;;  %4213 = vmatpush3.bf16.msra.mxu1 %v4468_v12 }
  0x8c   : > { %v2416_v2 = vrot.slane %v2184_v31, 3  ;;  %v676_v10 = vunpack.c.l.bf16 %v673_v54  ;;  %v6045_v61 = vshll.u32 %v5329_v46, 16  ;;  %vm5467_vm9 = vcmp.eq.s32.totalorder %v690_v33, 1  ;;  %4278 = vmatprep.subr.bf16.mxu1 %v5460_v19 }
  0x8d   : > { %v680_v25 = vadd.f32 %v5273_v50, %v677_v40  ;;  %v681_v8 = vadd.f32 %v5273_v50, %v678_v38  ;;  %v2188_v28 = vshll.u32 %v5451_v39, 16  ;;  %v2192_v26 = vshrl.u32 %v5451_v39, 16 }
  0x8e   : > { %v2856_v44 = vrot.slane %v6045_v61, 1  ;;  %v2418_v1 = vor.u32 %v2417_v16, %v2416_v2  ;;  %v679_v48 = vmul.f32 %v5255_v62, %v676_v10  ;;  %v6048_v33 = vshrl.u32 %v5329_v46, 16  ;;  %4151 = vmatmul.mubr.bf16.gmra.mrb[40].mxu1 %v1700_v35 }
  0x8f   : > { %v683_v38 = vmax.f32 %v680_v25, 0.0  ;;  %v684_v56 = vmax.f32 %v681_v8, 0.0  ;;  %v2190_v31 = vrot.slane %v2188_v28, 1  ;;  %v2420_v40 = vrot.slane %v2192_v26, 3 }
  0x90   : > { %v2421_v20 = vrot.slane %v2188_v28, 4  ;;  %v5474_v54 = vsel %vm1025_vm7, %v5144_v24, %v2418_v1  ;;  %v5478_v25 = vsel %vm1341_vm8, %v5361_v47, %v2856_v44  ;;  %v2858_v8 = vor.u32 %v2856_v44, %v6048_v33 }
  0x91   : > { %v686_v57 = vpack.c.bf16 %v684_v56, %v683_v38  ;;  %v1709_v16 = vsel %vm1025_vm7, %v5307_v22, %v5438_v3  ;;  %v5487_v62 = vsel %vm1341_vm8, %v2186_v45, %v2190_v31  ;;  %v682_v24 = vadd.f32 %v5273_v50, %v679_v48 }
  0x92   : > { %v2422_v12 = vor.u32 %v2421_v20, %v2420_v40  ;;  %v1441_v2 = vsel %vm1341_vm8, %v5361_v47, %v1440_v55  ;;  %v1717_v46 = vor.u32 %v1716_v21, %v5440_v11  ;;  %4154 = vmatprep.mubr.bf16.mxu1 %v1709_v16  ;;  %v2194_v21 = vor.u32 %v2192_v26, %v2190_v31 }
  0x93   : > { %v692_v28 = vsel %vm5467_vm9, %v686_v57, 0  ;;  %v685_v45 = vmax.f32 %v682_v24, 0.0  ;;  %4115 = vmatmul.mubr.bf16.gmra.mrb[44].mxu0 %v1441_v2  ;;  %v6049_v57 = vshrl.u32 %v4808_v14, 16 }
  0x94   : > { %v732_v22 = vsel %vm4745_vm4, %v692_v28, 0  ;;  %v5498_v10 = vsel %vm1025_vm7, %v2418_v1, %v2422_v12  ;;  %4174 = vmatprep.mubr.msk.bf16.mxu0 %vm4745_vm4, %v4800_v7  ;;  %v4474_v28 = vld [vmem:[%s5935_s3 + $0x1c8] sm:$0xff]  }
  0x95   : > { %v3603_v61 = vcombine.low %v732_v22, %v732_v22  ;;  %v2425_v44 = vshrl.u32 %v732_v22, 16  ;;  %v2428_v50 = vshll.u32 %v732_v22, 16  ;;  %v5501_v48 = vcombine.low %v5370_v34, %v732_v22 }
  0x96   : > { %v2151_v47 = vor.u32 %v5413_v32, %v6049_v57  ;;  %v687_v35 = vpack.c.bf16 %v685_v45, %v685_v45  ;;  %v1718_v34 = vsel %vm1025_vm7, %v5438_v3, %v1717_v46  ;;  %v784_v14 = vunpack.c.h.b16 %v732_v22  ;;  %v6057_v46 = vld [vmem:[#allocation6_spill] sm:$0xff]  ;;  %v4490_v22 = vld [vmem:[%s5935_s3 + $0x228] sm:$0xff]  }
  0x97   : > { %v2196_v55 = vshll.u32 %v3603_v61, 16  ;;  %v2427_v11 = vrot.slane %v2425_v44, 3  ;;  %v2430_v38 = vrot.slane %v2428_v50, 4  ;;  %v2860_v56 = vshll.u32 %v5501_v48, 16  ;;  %4155 = vmatmul.mubr.bf16.gmra.mrb[44].mxu1 %v1718_v34  ;;  %v6058_v45 = vld [vmem:[#allocation10_spill] sm:$0xff]  ;;  %v6059_v61 = vld [vmem:[#allocation16_spill] sm:$0xff] }
  0x98   : > { %v693_v1 = vsel %vm5467_vm9, %v687_v35, 0  ;;  %v2153_v31 = vsel %vm1341_vm8, %v2151_v47, %v5286_v60  ;;  %v2864_v33 = vshrl.u32 %v5501_v48, 16  ;;  %v6060_v44 = vld [vmem:[#allocation17_spill] sm:$0xff]  ;;  %v4491_v50 = vld [vmem:[%s5935_s3 + $0x230] sm:$0xff]   ;;  %v6061_v47 = vld [vmem:[#allocation12_spill] sm:$0xff] }
  0x99   : > { %v2198_v40 = vrot.slane %v2196_v55, 1  ;;  %v5514_v32 = vor.u32 %v2430_v38, %v2427_v11  ;;  %v5518_v26 = vsel %vm4765_vm6, %v693_v1, 0  ;;  %v2862_v7 = vrot.slane %v2860_v56, 1  ;;  %4214 = vmatprep.mubr.bf16.mxu1 %v2153_v31  ;;  %v6062_v35 = vld [vmem:[#allocation11_spill] sm:$0xff]  ;;  %v6069_v31 = vld [vmem:[#allocation21_spill] sm:$0xff] }
  0x9a   : > { %v785_v20 = vunpack.c.l.b16 %v5518_v26  ;;  %v3628_v57 = vcombine.low %v5518_v26, %v5518_v26  ;;  %v6063_v55 = vld [vmem:[#allocation19_spill] sm:$0xff] }
  0x9b   : > { %v5525_v3 = vsel %vm1341_vm8, %v2194_v21, %v2198_v40  ;;  %v5529_v23 = vsel %vm1025_vm7, %v2422_v12, %v5514_v32  ;;  %v5532_v16 = vsel %vm1341_vm8, %v2858_v8, %v2862_v7  ;;  %4175 = vmatmul.mubr.bf16.vlgmr.msra.gmra.mrb[48].mxu0 %v4873_v9  ;;  %v2866_v24 = vor.u32 %v2864_v33, %v2862_v7  ;;  %v4471_v8 = vld [vmem:[%s5935_s3 + $0x190] sm:$0xff]   ;;  %v4492_v21 = vld [vmem:[%s5935_s3 + $0x238] sm:$0xff]   ;;  %v6067_v7 = vld [vmem:[#allocation20_spill] sm:$0xff] }
  0x9c   : > { %v5537_v60 = vpack.c.b16 %v785_v20, %v784_v14  ;;  %4239 = vmatpush3.bf16.msra.mxu0 %v5409_v18  ;;  %4178 = vmatprep.mubr.bf16.mxu0 %v4892_v30  ;;  %v4473_v30 = vld [vmem:[%s5935_s3 + $0x198] sm:$0xff]   ;;  %v4476_v18 = vld [vmem:[%s5935_s3 + $0x1d0] sm:$0xff]   ;;  %v2434_v11 = vshrl.u32 %v3628_v57, 16  ;;  %v2437_v38 = vshll.u32 %v3628_v57, 16 }
  0x9d   : > { %4240 = vmatprep.subr.bf16.mxu0 %v4470_v51  ;;  %v6064_v1 = vld [vmem:[#allocation15_spill] sm:$0xff]  ;;  %v6065_v14 = vld [vmem:[#allocation18_spill] sm:$0xff] }
  0x9e   : > { %v2868_v2 = vshll.u32 %v5537_v60, 16  ;;  %v2436_v56 = vrot.slane %v2434_v11, 3  ;;  %v2439_v34 = vrot.slane %v2437_v38, 4  ;;  %v6066_v26 = vld [vmem:[#allocation27_spill] sm:$0xff]  ;;  %v6070_v20 = vld [vmem:[#allocation22_spill] sm:$0xff] }
  0x9f   : > { %4215 = vmatmul.mubr.bf16.vlgmr.msra.gmra.mrb[48].mxu1 %v5319_v17  ;;  %v4475_v17 = vld [vmem:[%s5935_s3 + $0x1a0] sm:$0xff]   ;;  %v6072_v33 = vld [vmem:[#allocation23_spill] sm:$0xff] }
  0xa0   : > { %v5546_v12 = vrot.slane %v2868_v2, 1  ;;  %4241 = vmatpush3.bf16.msra.mxu0 %v4470_v51  ;;  %4218 = vmatprep.mubr.bf16.mxu1 %v5322_v43  ;;  %v4478_v43 = vld [vmem:[%s5935_s3 + $0x1d8] sm:$0xff]  }
  0xa1   : > { %4242 = vmatprep.subr.bf16.mxu0 %v4471_v8  ;;  %4279 = vmatpush3.bf16.msra.mxu1 %v5460_v19  ;;  %v6056_v19 = vld [vmem:[#allocation14_spill] sm:$0xff] }
  0xa2   : > { %v5553_v9 = vsel %vm1341_vm8, %v2866_v24, %v5546_v12  ;;  %4280 = vmatprep.subr.bf16.mxu1 %v4474_v28  ;;  %v2872_v24 = vshrl.u32 %v5537_v60, 16 }
  0xa3   : > { %4179 = vmatmul.mubr.msk.bf16.gmra.mrb[52].mxu0 %vm4745_vm4, %v4901_v36  ;;  %v4477_v36 = vld [vmem:[%s5935_s3 + $0x1a8] sm:$0xff]  }
  0xa4   : > { %4243 = vmatpush3.bf16.msra.mxu0 %v4471_v8  ;;  %4182 = vmatprep.mubr.bf16.mxu0 %v4943_v6  ;;  %v4479_v6 = vld [vmem:[%s5935_s3 + $0x1e0] sm:$0xff]  }
  0xa5   : > { %4244 = vmatprep.subr.bf16.mxu0 %v4473_v30  ;;  %4281 = vmatpush3.bf16.msra.mxu1 %v4474_v28 }
  0xa6   : > { %4282 = vmatprep.subr.bf16.mxu1 %v4476_v18 }
  0xa7   : > { %4219 = vmatmul.mubr.bf16.gmra.mrb[52].mxu1 %v5332_v4  ;;  %v4480_v4 = vld [vmem:[%s5935_s3 + $0x1b0] sm:$0xff]  }
  0xa8   : > { %4245 = vmatpush3.bf16.msra.mxu0 %v4473_v30  ;;  %4222 = vmatprep.mubr.bf16.mxu1 %v5346_v41  ;;  %v4483_v41 = vld [vmem:[%s5935_s3 + $0x1f0] sm:$0xff]  }
  0xa9   : > { %4246 = vmatprep.subr.bf16.mxu0 %v4475_v17  ;;  %4283 = vmatpush3.bf16.msra.mxu1 %v4476_v18  ;;  %v6074_v18 = vld [vmem:[#allocation25_spill] sm:$0xff] }
  0xaa   : > { %4284 = vmatprep.subr.bf16.mxu1 %v4478_v43 }
  0xab   : > { %4183 = vmatmul.mubr.bf16.gmra.mrb[56].mxu0 %v5027_v58  ;;  %v4481_v58 = vld [vmem:[%s5935_s3 + $0x1e8] sm:$0xff]  }
  0xac   : > { %4186 = vmatprep.mubr.msk.bf16.mxu0 %vm4745_vm4, %v5001_v29  ;;  %4247 = vmatpush3.bf16.msra.mxu0 %v4475_v17  ;;  %v4482_v29 = vld [vmem:[%s5935_s3 + $0x1b8] sm:$0xff]  }
  0xad   : > { %4248 = vmatprep.subr.bf16.mxu0 %v4477_v36  ;;  %4285 = vmatpush3.bf16.msra.mxu1 %v4478_v43 }
  0xae   : > { %4286 = vmatprep.subr.bf16.mxu1 %v4479_v6 }
  0xaf   : > { %4223 = vmatmul.mubr.bf16.gmra.mrb[56].mxu1 %v5349_v27  ;;  %v4485_v27 = vld [vmem:[%s5935_s3 + $0x200] sm:$0xff]  }
  0xb0   : > { %4249 = vmatpush3.bf16.msra.mxu0 %v4477_v36  ;;  %4226 = vmatprep.mubr.bf16.mxu1 %v5377_v0  ;;  %v4484_v0 = vld [vmem:[%s5935_s3 + $0x1f8] sm:$0xff]  }
  0xb1   : > { %4250 = vmatprep.subr.bf16.mxu0 %v4480_v4  ;;  %4287 = vmatpush3.bf16.msra.mxu1 %v4479_v6 }
  0xb2   : > { %4288 = vmatprep.subr.bf16.mxu1 %v4481_v58 }
  0xb3   : > { %4187 = vmatmul.mubr.bf16.gmra.mrb[60].mxu0 %v5082_v42  ;;  %v4486_v42 = vld [vmem:[%s5935_s3 + $0x208] sm:$0xff]  }
  0xb4   : > { %4190 = vmatprep.mubr.bf16.mxu0 %v5098_v13  ;;  %4251 = vmatpush3.bf16.msra.mxu0 %v4480_v4  ;;  %v6051_v13 = vld [vmem:[#allocation8_spill] sm:$0xff] }
  0xb5   : > { %4252 = vmatprep.subr.bf16.mxu0 %v4482_v29  ;;  %4289 = vmatpush3.bf16.msra.mxu1 %v4481_v58 }
  0xb6   : > { %4290 = vmatprep.subr.bf16.mxu1 %v4483_v41 }
  0xb7   : > { %4227 = vmatmul.mubr.bf16.gmra.mrb[60].mxu1 %v5402_v63  ;;  %v4488_v63 = vld [vmem:[%s5935_s3 + $0x218] sm:$0xff]  }
  0xb8   : > { %4253 = vmatpush3.bf16.msra.mxu0 %v4482_v29  ;;  %4230 = vmatprep.mubr.bf16.mxu1 %v5427_v49  ;;  %v6054_v49 = vld [vmem:[#allocation7_spill] sm:$0xff] }
  0xb9   : > { %4318 = vmatprep.subr.bf16.mxu0 %v4485_v27  ;;  %4291 = vmatpush3.bf16.msra.mxu1 %v4483_v41 }
  0xba   : > { %4292 = vmatprep.subr.bf16.mxu1 %v4484_v0 }
  0xbb   : > { %4191 = vmatmul.mubr.msk.bf16.gmra.mrb[64].mxu0 %vm4745_vm4, %v5086_v59  ;;  %v6050_v59 = vld [vmem:[#allocation4_spill] sm:$0xff] }
  0xbc   : > { %4194 = vmatprep.mubr.bf16.mxu0 %v5396_v53  ;;  %v6053_v53 = vld [vmem:[#allocation5_spill] sm:$0xff] }
  0xbd   : > { %4293 = vmatpush3.bf16.msra.mxu1 %v4484_v0 }
  0xbe   : > { %4358 = vmatprep.subr.bf16.mxu1 %v4485_v27 }
  0xbf   : > { %4231 = vmatmul.mubr.bf16.gmra.mrb[64].mxu1 %v5449_v52  ;;  %v6052_v52 = vld [vmem:[#allocation9_spill] sm:$0xff] }
  0xc0   : > { %4234 = vmatprep.mubr.bf16.mxu1 %v5487_v62  ;;  %v4489_v62 = vld [vmem:[%s5935_s3 + $0x220] sm:$0xff]  }
  0xc3   : > { %4195 = vmatmul.mubr.bf16.gmra.mrb[68].mxu0 %v5451_v39  ;;  %v6055_v39 = vld [vmem:[#allocation13_spill] sm:$0xff] }
  0xc4   : > { %4254 = vmatprep.mubr.bf16.mxu0 %v4951_v5  ;;  %v4487_v5 = vld [vmem:[%s5935_s3 + $0x210] sm:$0xff]  }
  0xc7   : > { %4235 = vmatmul.mubr.bf16.gmra.mrb[68].mxu1 %v5525_v3  ;;  %v6073_v3 = vld [vmem:[#allocation24_spill] sm:$0xff] }
  0xc8   : > { %4294 = vmatprep.mubr.msk.bf16.mxu1 %vm4745_vm4, %v6050_v59 }
  0xcb   : > { %4255 = vmatmul.mubr.bf16.vlgmr.msra.gmra.mrb[72].mxu0 %v6051_v13 }
  0xcc   : > { %4319 = vmatpush3.bf16.msra.mxu0 %v4485_v27  ;;  %4258 = vmatprep.mubr.bf16.mxu0 %v6052_v52 }
  0xcd   : > { %4320 = vmatprep.subr.bf16.mxu0 %v4486_v42 }
  0xcf   : > { %4295 = vmatmul.mubr.bf16.vlgmr.msra.gmra.mrb[72].mxu1 %v6053_v53 }
  0xd0   : > { %4321 = vmatpush3.bf16.msra.mxu0 %v4486_v42  ;;  %4298 = vmatprep.mubr.bf16.mxu1 %v6054_v49 }
  0xd1   : > { %4322 = vmatprep.subr.bf16.mxu0 %v4487_v5  ;;  %4366 = vmatpush3.bf16.msra.mxu1 %v4485_v27 }
  0xd2   : > { %4359 = vmatprep.subr.bf16.mxu1 %v4486_v42 }
  0xd3   : > { %4259 = vmatmul.mubr.bf16.gmra.mrb[76].mxu0 %v6055_v39 }
  0xd4   : > { %4323 = vmatpush3.bf16.msra.mxu0 %v4487_v5  ;;  %4262 = vmatprep.mubr.bf16.mxu0 %v6056_v19 }
  0xd5   : > { %4324 = vmatprep.subr.bf16.mxu0 %v4488_v63  ;;  %4367 = vmatpush3.bf16.msra.mxu1 %v4486_v42 }
  0xd6   : > { %4360 = vmatprep.subr.bf16.mxu1 %v4487_v5 }
  0xd7   : > { %4299 = vmatmul.mubr.msk.bf16.gmra.mrb[76].mxu1 %vm4745_vm4, %v6057_v46 }
  0xd8   : > { %4325 = vmatpush3.bf16.msra.mxu0 %v4488_v63  ;;  %4302 = vmatprep.mubr.bf16.mxu1 %v6058_v45 }
  0xd9   : > { %4326 = vmatprep.subr.bf16.mxu0 %v4489_v62  ;;  %4368 = vmatpush3.bf16.msra.mxu1 %v4487_v5 }
  0xda   : > { %4361 = vmatprep.subr.bf16.mxu1 %v4488_v63 }
  0xdb   : > { %4263 = vmatmul.mubr.bf16.gmra.mrb[80].mxu0 %v6059_v61 }
  0xdc   : > { %4266 = vmatprep.mubr.bf16.mxu0 %v6060_v44  ;;  %4327 = vmatpush3.bf16.msra.mxu0 %v4489_v62 }
  0xdd   : > { %4328 = vmatprep.subr.bf16.mxu0 %v4490_v22  ;;  %4369 = vmatpush3.bf16.msra.mxu1 %v4488_v63 }
  0xde   : > { %4362 = vmatprep.subr.bf16.mxu1 %v4489_v62 }
  0xdf   : > { %4303 = vmatmul.mubr.bf16.gmra.mrb[80].mxu1 %v6061_v47 }
  0xe0   : > { %4329 = vmatpush3.bf16.msra.mxu0 %v4490_v22  ;;  %4306 = vmatprep.mubr.msk.bf16.mxu1 %vm4745_vm4, %v6062_v35 }
  0xe1   : > { %4330 = vmatprep.subr.bf16.mxu0 %v4491_v50  ;;  %4370 = vmatpush3.bf16.msra.mxu1 %v4489_v62 }
  0xe2   : > { %4363 = vmatprep.subr.bf16.mxu1 %v4490_v22 }
  0xe3   : > { %4267 = vmatmul.mubr.bf16.gmra.mrb[84].mxu0 %v6063_v55 }
  0xe4   : > { %4270 = vmatprep.mubr.bf16.mxu0 %v5474_v54  ;;  %4331 = vmatpush3.bf16.msra.mxu0 %v4491_v50  ;;  %v2440_v54 = vor.u32 %v2439_v34, %v2436_v56 }
  0xe5   : > { %4332 = vmatprep.subr.bf16.mxu0 %v4492_v21  ;;  %4371 = vmatpush3.bf16.msra.mxu1 %v4490_v22 }
  0xe6   : > { %4364 = vmatprep.subr.bf16.mxu1 %v4491_v50  ;;  %v2441_v40 = vsel %vm1025_vm7, %v5514_v32, %v2440_v54  ;;  %v6071_v32 = vmov 0  }
  0xe7   : > { %4307 = vmatmul.mubr.bf16.gmra.mrb[84].mxu1 %v6064_v1  ;;  %v3682_v37 = vcombine.low %v6071_v32, %v6071_v32 }
  0xe8   : > { %4333 = vmatpush3.bf16.msra.mxu0 %v4492_v21  ;;  %4310 = vmatprep.mubr.bf16.mxu1 %v6065_v14 }
  0xe9   : > { %4372 = vmatpush3.bf16.msra.mxu1 %v4491_v50  ;;  %v2876_v2 = vshll.u32 %v3682_v37, 16 }
  0xea   : > { %4365 = vmatprep.subr.bf16.mxu1 %v4492_v21 }
  0xeb   : > { %4271 = vmatmul.mubr.bf16.gmra.mrb[88].mxu0 %v5498_v10  ;;  %v6068_v10 = vld [vmem:[#allocation26_spill] sm:$0xff] }
  0xec   : > { %4274 = vmatprep.mubr.bf16.mxu0 %v5529_v23 }
  0xed   : > { %4373 = vmatpush3.bf16.msra.mxu1 %v4492_v21 }
  0xef   : > { %4311 = vmatmul.mubr.msk.bf16.gmra.mrb[88].mxu1 %vm4745_vm4, %v6066_v26 }
  0xf0   : > { %4314 = vmatprep.mubr.bf16.mxu1 %v5501_v48 }
  0xf3   : > { %4275 = vmatmul.mubr.bf16.gmra.mrb[92].mxu0 %v2441_v40 }
  0xf4   : > { %4334 = vmatprep.mubr.bf16.mxu0 %v6067_v7 }
  0xf7   : > { %4315 = vmatmul.mubr.bf16.gmra.mrb[92].mxu1 %v5537_v60 }
  0xf8   : > { %4346 = vmatprep.mubr.bf16.mxu1 %v6068_v10 }
  0xfb   : > { %4335 = vmatmul.mubr.bf16.vlgmr.msra.gmra.mrb[96].mxu0 %v6069_v31 }
  0xfc   : > { %4338 = vmatprep.mubr.bf16.mxu0 %v6070_v20 }
  0xff   : > { %4347 = vmatmul.mubr.bf16.vlgmr.msra.gmra.mrb[96].mxu1 %v5357_v15  ;;  %v2874_v15 = vor.u32 %v2872_v24, %v5546_v12 }
 0x100   : > { %4350 = vmatprep.mubr.bf16.mxu1 %v5478_v25  ;;  %v2878_v25 = vrot.slane %v2876_v2, 1 }
 0x102   : > { %v2879_v41 = vsel %vm1341_vm8, %v2874_v15, %v2878_v25 }
 0x103   : > { %4339 = vmatmul.mubr.bf16.gmra.mrb[100].mxu0 %v6072_v33 }
 0x104   : > { %v4016_v48 = vpop.f32.mrb[0].mxu0  ;;  %4342 = vmatprep.mubr.bf16.mxu0 %v6073_v3 }
 0x105   : > { %v925_v23 = vpop.f32.mrb[1].mxu0 }
 0x106   : > { %v4017_v51 = vpop.f32.mrb[2].mxu0 }
 0x107   : > { %v928_v8 = vpop.f32.mrb[3].mxu0  ;;  %4351 = vmatmul.mubr.bf16.gmra.mrb[100].mxu1 %v5532_v16 }
 0x108   : > { %v4056_v28 = vpop.f32.mrb[0].mxu1  ;;  %4354 = vmatprep.mubr.bf16.mxu1 %v5553_v9 }
 0x109   : > { %v1236_v30 = vpop.f32.mrb[1].mxu1 }
 0x10a   : > { %v1237_v17 = vadd.f32 %v1236_v30, %v925_v23  ;;  %v4057_v43 = vpop.f32.mrb[2].mxu1 }
 0x10b   : > { %4343 = vmatmul.mubr.bf16.gmra.mrb[104].mxu0 %v6074_v18  ;;  %v1247_v6 = vadd.f32 %v4057_v43, %v4017_v51  ;;  %v1239_v4 = vpop.f32.mrb[3].mxu1 }
 0x10c   : > { %v4020_v36 = vpop.f32.mrb[4].mxu0  ;;  %v1240_v60 = vadd.f32 %v1239_v4, %v928_v8 }
 0x10d   : > { %v940_v58 = vpop.f32.mrb[5].mxu0 }
 0x10e   : > { %v4021_v29 = vpop.f32.mrb[6].mxu0 }
 0x10f   : > { %v943_v16 = vpop.f32.mrb[7].mxu0  ;;  %4355 = vmatmul.mubr.bf16.gmra.mrb[104].mxu1 %v2879_v41 }
 0x114   : > { %v4060_v27 = vpop.f32.mrb[4].mxu1 }
 0x115   : > { %v1259_v9 = vadd.f32 %v4060_v27, %v4020_v36  ;;  %v1251_v0 = vpop.f32.mrb[5].mxu1 }
 0x116   : > { %v1252_v42 = vadd.f32 %v1251_v0, %v940_v58  ;;  %v4061_v59 = vpop.f32.mrb[6].mxu1 }
 0x117   : > { %v4024_v12 = vpop.f32.mrb[8].mxu0  ;;  %v1262_v52 = vadd.f32 %v4061_v59, %v4021_v29  ;;  %v1254_v53 = vpop.f32.mrb[7].mxu1 }
 0x118   : > { %v955_v13 = vpop.f32.mrb[9].mxu0 }
 0x119   : > { %v4025_v5 = vpop.f32.mrb[10].mxu0 }
 0x11a   : > { %v957_v63 = vpop.f32.mrb[11].mxu0 }
 0x11c   : > { %v4064_v49 = vpop.f32.mrb[8].mxu1 }
 0x11d   : > { %v5690_v39 = vadd.f32 %v4064_v49, %v4024_v12  ;;  %v1266_v19 = vpop.f32.mrb[9].mxu1 }
 0x11e   : > { %v4065_v62 = vpop.f32.mrb[10].mxu1 }
 0x11f   : > { %v1268_v46 = vpop.f32.mrb[11].mxu1 }
 0x120   : > { %v4028_v22 = vpop.f32.mrb[12].mxu0  ;;  %v5692_v45 = vadd.f32 %v1268_v46, %v957_v63 }
 0x121   : > { %v969_v61 = vpop.f32.mrb[13].mxu0 }
 0x122   : > { %v4029_v44 = vpop.f32.mrb[14].mxu0 }
 0x123   : > { %v972_v50 = vpop.f32.mrb[15].mxu0 }
 0x128   : > { %v4068_v57 = vpop.f32.mrb[12].mxu1  ;;  %v4032_v47 = vpop.f32.mrb[16].mxu0 }
 0x129   : > { %v1280_v21 = vpop.f32.mrb[13].mxu1  ;;  %v984_v35 = vpop.f32.mrb[17].mxu0 }
 0x12a   : > { %v5694_v55 = vadd.f32 %v1280_v21, %v969_v61  ;;  %v4069_v11 = vpop.f32.mrb[14].mxu1  ;;  %v4033_v38 = vpop.f32.mrb[18].mxu0 }
 0x12b   : > { %v5696_v56 = vadd.f32 %v4069_v11, %v4029_v44  ;;  %v1283_v34 = vpop.f32.mrb[15].mxu1  ;;  %v987_v1 = vpop.f32.mrb[19].mxu0 }
 0x12c   : > { %v5698_v14 = vadd.f32 %v1283_v34, %v972_v50 }
 0x131   : > { %v4072_v54 = vpop.f32.mrb[16].mxu1 }
 0x132   : > { %v5700_v40 = vadd.f32 %v4072_v54, %v4032_v47  ;;  %v1295_v26 = vpop.f32.mrb[17].mxu1 }
 0x133   : > { %v5702_v7 = vadd.f32 %v1295_v26, %v984_v35  ;;  %v4073_v10 = vpop.f32.mrb[18].mxu1  ;;  %v4036_v31 = vpop.f32.mrb[20].mxu0 }
 0x134   : > { %v5704_v20 = vadd.f32 %v4073_v10, %v4033_v38  ;;  %v999_v32 = vpop.f32.mrb[21].mxu0  ;;  %v1298_v37 = vpop.f32.mrb[19].mxu1 }
 0x135   : > { %v4037_v33 = vpop.f32.mrb[22].mxu0 }
 0x136   : > { %v1001_v48 = vpop.f32.mrb[23].mxu0 }
 0x139   : > { %v4076_v3 = vpop.f32.mrb[20].mxu1 }
 0x13a   : > { %v5706_v23 = vadd.f32 %v4076_v3, %v4036_v31  ;;  %v1310_v51 = vpop.f32.mrb[21].mxu1 }
 0x13b   : > { %v4077_v24 = vpop.f32.mrb[22].mxu1  ;;  %v4096_v2 = vpop.f32.mrb[24].mxu0 }
 0x13c   : > { %v1312_v8 = vpop.f32.mrb[23].mxu1  ;;  %v1536_v28 = vpop.f32.mrb[25].mxu0 }
 0x13d   : > { %v5708_v15 = vadd.f32 %v1312_v8, %v1001_v48  ;;  %v1623_v25 = vadd.f32 %v1536_v28, %v1237_v17  ;;  %v4097_v30 = vpop.f32.mrb[26].mxu0 }
 0x13e   : > { %v1625_v18 = vadd.f32 %v4097_v30, %v1247_v6  ;;  %v1539_v43 = vpop.f32.mrb[27].mxu0 }
 0x13f   : > { %v1624_v36 = vadd.f32 %v1539_v43, %v1240_v60 }
 0x141   : > { %v4136_v4 = vpop.f32.mrb[24].mxu1 }
 0x142   : > { %v1813_v58 = vpop.f32.mrb[25].mxu1 }
 0x143   : > { %v5710_v29 = vadd.f32 %v1813_v58, %v1623_v25  ;;  %v4137_v41 = vpop.f32.mrb[26].mxu1  ;;  %v4100_v16 = vpop.f32.mrb[28].mxu0 }
 0x144   : > { %v5712_v27 = vadd.f32 %v4137_v41, %v1625_v18  ;;  %v1816_v0 = vpop.f32.mrb[27].mxu1  ;;  %v1627_v12 = vadd.f32 %v4100_v16, %v1259_v9  ;;  %v1551_v59 = vpop.f32.mrb[29].mxu0 }
 0x145   : > { %v5714_v13 = vadd.f32 %v1816_v0, %v1624_v36  ;;  %v1626_v5 = vadd.f32 %v1551_v59, %v1252_v42  ;;  %v4101_v53 = vpop.f32.mrb[30].mxu0 }
 0x146   : > { %v1628_v17 = vadd.f32 %v4101_v53, %v1262_v52  ;;  %v1554_v63 = vpop.f32.mrb[31].mxu0 }
 0x149   : > { %v4140_v6 = vpop.f32.mrb[28].mxu1 }
 0x14a   : > { %v5716_v49 = vadd.f32 %v4140_v6, %v1627_v12  ;;  %v1828_v60 = vpop.f32.mrb[29].mxu1 }
 0x14b   : > { %v5718_v19 = vadd.f32 %v1828_v60, %v1626_v5  ;;  %v4141_v62 = vpop.f32.mrb[30].mxu1  ;;  %v4104_v46 = vpop.f32.mrb[32].mxu0 }
 0x14c   : > { %v5720_v22 = vadd.f32 %v4141_v62, %v1628_v17  ;;  %v1630_v61 = vadd.f32 %v4104_v46, %v5690_v39  ;;  %v1566_v9 = vpop.f32.mrb[33].mxu0  ;;  %v1831_v44 = vpop.f32.mrb[31].mxu1 }
 0x14d   : > { %v4105_v50 = vpop.f32.mrb[34].mxu0 }
 0x14e   : > { %v1568_v57 = vpop.f32.mrb[35].mxu0 }
 0x14f   : > { %v1629_v42 = vadd.f32 %v1568_v57, %v5692_v45 }
 0x151   : > { %v4144_v52 = vpop.f32.mrb[32].mxu1 }
 0x152   : > { %v5724_v47 = vadd.f32 %v4144_v52, %v1630_v61  ;;  %v1843_v21 = vpop.f32.mrb[33].mxu1 }
 0x153   : > { %v4145_v35 = vpop.f32.mrb[34].mxu1  ;;  %v4108_v11 = vpop.f32.mrb[36].mxu0 }
 0x154   : > { %v1845_v38 = vpop.f32.mrb[35].mxu1  ;;  %v1580_v34 = vpop.f32.mrb[37].mxu0 }
 0x155   : > { %v5726_v1 = vadd.f32 %v1845_v38, %v1629_v42  ;;  %v1631_v54 = vadd.f32 %v1580_v34, %v5694_v55  ;;  %v4109_v26 = vpop.f32.mrb[38].mxu0 }
 0x156   : > { %v1633_v39 = vadd.f32 %v4109_v26, %v5696_v56  ;;  %v1583_v10 = vpop.f32.mrb[39].mxu0 }
 0x157   : > { %v1632_v31 = vadd.f32 %v1583_v10, %v5698_v14 }
 0x159   : > { %v4148_v32 = vpop.f32.mrb[36].mxu1 }
 0x15a   : > { %v1857_v45 = vpop.f32.mrb[37].mxu1 }
 0x15b   : > { %v5731_v37 = vadd.f32 %v1857_v45, %v1631_v54  ;;  %v4149_v33 = vpop.f32.mrb[38].mxu1  ;;  %v4112_v48 = vpop.f32.mrb[40].mxu0 }
 0x15c   : > { %v5733_v3 = vadd.f32 %v4149_v33, %v1633_v39  ;;  %v1860_v51 = vpop.f32.mrb[39].mxu1  ;;  %v1635_v24 = vadd.f32 %v4112_v48, %v5700_v40  ;;  %v1595_v2 = vpop.f32.mrb[41].mxu0 }
 0x15d   : > { %v5736_v8 = vadd.f32 %v1860_v51, %v1632_v31  ;;  %v1634_v55 = vadd.f32 %v1595_v2, %v5702_v7  ;;  %v4113_v56 = vpop.f32.mrb[42].mxu0 }
 0x15e   : > { %v1636_v14 = vadd.f32 %v4113_v56, %v5704_v20  ;;  %v1598_v28 = vpop.f32.mrb[43].mxu0 }
 0x161   : > { %v4152_v25 = vpop.f32.mrb[40].mxu1 }
 0x162   : > { %v5740_v30 = vadd.f32 %v4152_v25, %v1635_v24  ;;  %v1872_v18 = vpop.f32.mrb[41].mxu1 }
 0x163   : > { %v5742_v43 = vadd.f32 %v1872_v18, %v1634_v55  ;;  %v4153_v36 = vpop.f32.mrb[42].mxu1 }
 0x164   : > { %v5744_v4 = vadd.f32 %v4153_v36, %v1636_v14  ;;  %v1875_v41 = vpop.f32.mrb[43].mxu1 }
 0x166   : > { %v4116_v40 = vpop.f32.mrb[44].mxu0 }
 0x167   : > { %v1638_v58 = vadd.f32 %v4116_v40, %v5706_v23  ;;  %v1610_v7 = vpop.f32.mrb[45].mxu0 }
 0x168   : > { %v4117_v16 = vpop.f32.mrb[46].mxu0 }
 0x169   : > { %v1612_v0 = vpop.f32.mrb[47].mxu0 }
 0x16a   : > { %v1637_v20 = vadd.f32 %v1612_v0, %v5708_v15  ;;  %v4156_v12 = vpop.f32.mrb[44].mxu1 }
 0x16b   : > { %v5752_v59 = vadd.f32 %v4156_v12, %v1638_v58  ;;  %v1887_v5 = vpop.f32.mrb[45].mxu1 }
 0x16c   : > { %v4157_v53 = vpop.f32.mrb[46].mxu1 }
 0x16d   : > { %v1889_v63 = vpop.f32.mrb[47].mxu1 }
 0x16e   : > { %v4176_v17 = vpop.f32.mrb[48].mxu0  ;;  %v5756_v23 = vadd.f32 %v1889_v63, %v1637_v20 }
 0x16f   : > { %v2029_v6 = vpop.f32.mrb[49].mxu0 }
 0x170   : > { %v2116_v60 = vadd.f32 %v2029_v6, %v5710_v29  ;;  %v4177_v62 = vpop.f32.mrb[50].mxu0 }
 0x171   : > { %v2118_v46 = vadd.f32 %v4177_v62, %v5712_v27  ;;  %v2032_v61 = vpop.f32.mrb[51].mxu0 }
 0x172   : > { %v2117_v15 = vadd.f32 %v2032_v61, %v5714_v13  ;;  %v4216_v9 = vpop.f32.mrb[48].mxu1 }
 0x173   : > { %v2294_v44 = vpop.f32.mrb[49].mxu1 }
 0x174   : > { %v5761_v50 = vadd.f32 %v2294_v44, %v2116_v60  ;;  %v4217_v57 = vpop.f32.mrb[50].mxu1 }
 0x175   : > { %v5763_v52 = vadd.f32 %v4217_v57, %v2118_v46  ;;  %v2297_v21 = vpop.f32.mrb[51].mxu1 }
 0x176   : > { %v4180_v42 = vpop.f32.mrb[52].mxu0  ;;  %v5766_v38 = vadd.f32 %v2297_v21, %v2117_v15 }
 0x177   : > { %v2120_v35 = vadd.f32 %v4180_v42, %v5716_v49  ;;  %v2044_v11 = vpop.f32.mrb[53].mxu0 }
 0x178   : > { %v2119_v29 = vadd.f32 %v2044_v11, %v5718_v19  ;;  %v4181_v27 = vpop.f32.mrb[54].mxu0 }
 0x179   : > { %v2121_v34 = vadd.f32 %v4181_v27, %v5720_v22  ;;  %v2047_v13 = vpop.f32.mrb[55].mxu0 }
 0x17a   : > { %v4220_v54 = vpop.f32.mrb[52].mxu1 }
 0x17b   : > { %v5770_v26 = vadd.f32 %v4220_v54, %v2120_v35  ;;  %v2309_v39 = vpop.f32.mrb[53].mxu1 }
 0x17c   : > { %v5772_v10 = vadd.f32 %v2309_v39, %v2119_v29  ;;  %v4221_v31 = vpop.f32.mrb[54].mxu1 }
 0x17d   : > { %v5774_v45 = vadd.f32 %v4221_v31, %v2121_v34  ;;  %v2312_v48 = vpop.f32.mrb[55].mxu1 }
 0x17e   : > { %v4184_v32 = vpop.f32.mrb[56].mxu0 }
 0x17f   : > { %v2123_v49 = vadd.f32 %v4184_v32, %v5724_v47  ;;  %v2059_v33 = vpop.f32.mrb[57].mxu0 }
 0x180   : > { %v4185_v51 = vpop.f32.mrb[58].mxu0 }
 0x181   : > { %v2061_v19 = vpop.f32.mrb[59].mxu0 }
 0x182   : > { %v2122_v24 = vadd.f32 %v2061_v19, %v5726_v1  ;;  %v4224_v22 = vpop.f32.mrb[56].mxu1 }
 0x183   : > { %v5778_v2 = vadd.f32 %v4224_v22, %v2123_v49  ;;  %v2324_v55 = vpop.f32.mrb[57].mxu1 }
 0x184   : > { %v4225_v56 = vpop.f32.mrb[58].mxu1 }
 0x185   : > { %v2326_v28 = vpop.f32.mrb[59].mxu1 }
 0x186   : > { %v4188_v14 = vpop.f32.mrb[60].mxu0  ;;  %v5780_v18 = vadd.f32 %v2326_v28, %v2122_v24 }
 0x187   : > { %v2073_v25 = vpop.f32.mrb[61].mxu0 }
 0x188   : > { %v2124_v36 = vadd.f32 %v2073_v25, %v5731_v37  ;;  %v4189_v40 = vpop.f32.mrb[62].mxu0 }
 0x189   : > { %v2126_v47 = vadd.f32 %v4189_v40, %v5733_v3  ;;  %v2076_v58 = vpop.f32.mrb[63].mxu0 }
 0x18a   : > { %v2125_v7 = vadd.f32 %v2076_v58, %v5736_v8  ;;  %v4228_v41 = vpop.f32.mrb[60].mxu1 }
 0x18b   : > { %v2338_v1 = vpop.f32.mrb[61].mxu1 }
 0x18c   : > { %v5785_v16 = vadd.f32 %v2338_v1, %v2124_v36  ;;  %v4229_v0 = vpop.f32.mrb[62].mxu1 }
 0x18d   : > { %v5787_v12 = vadd.f32 %v4229_v0, %v2126_v47  ;;  %v2341_v5 = vpop.f32.mrb[63].mxu1 }
 0x18e   : > { %v4192_v20 = vpop.f32.mrb[64].mxu0  ;;  %v5790_v63 = vadd.f32 %v2341_v5, %v2125_v7 }
 0x18f   : > { %v2128_v53 = vadd.f32 %v4192_v20, %v5740_v30  ;;  %v2088_v17 = vpop.f32.mrb[65].mxu0 }
 0x190   : > { %v2127_v37 = vadd.f32 %v2088_v17, %v5742_v43  ;;  %v4193_v3 = vpop.f32.mrb[66].mxu0 }
 0x191   : > { %v2129_v6 = vadd.f32 %v4193_v3, %v5744_v4  ;;  %v2091_v8 = vpop.f32.mrb[67].mxu0 }
 0x192   : > { %v4232_v60 = vpop.f32.mrb[64].mxu1 }
 0x193   : > { %v5794_v62 = vadd.f32 %v4232_v60, %v2128_v53  ;;  %v2353_v46 = vpop.f32.mrb[65].mxu1 }
 0x194   : > { %v5796_v61 = vadd.f32 %v2353_v46, %v2127_v37  ;;  %v4233_v15 = vpop.f32.mrb[66].mxu1 }
 0x195   : > { %v5798_v44 = vadd.f32 %v4233_v15, %v2129_v6  ;;  %v2356_v42 = vpop.f32.mrb[67].mxu1 }
 0x196   : > { %v4196_v9 = vpop.f32.mrb[68].mxu0 }
 0x197   : > { %v2131_v30 = vadd.f32 %v4196_v9, %v5752_v59  ;;  %v2103_v57 = vpop.f32.mrb[69].mxu0 }
 0x198   : > { %v4197_v21 = vpop.f32.mrb[70].mxu0 }
 0x199   : > { %v2105_v43 = vpop.f32.mrb[71].mxu0 }
 0x19a   : > { %v2130_v35 = vadd.f32 %v2105_v43, %v5756_v23  ;;  %v4236_v4 = vpop.f32.mrb[68].mxu1 }
 0x19b   : > { %v5802_v11 = vadd.f32 %v4236_v4, %v2131_v30  ;;  %v2368_v29 = vpop.f32.mrb[69].mxu1 }
 0x19c   : > { %v4237_v27 = vpop.f32.mrb[70].mxu1 }
 0x19d   : > { %v2370_v13 = vpop.f32.mrb[71].mxu1 }
 0x19e   : > { %v4256_v34 = vpop.f32.mrb[72].mxu0  ;;  %v5804_v39 = vadd.f32 %v2370_v13, %v2130_v35 }
 0x19f   : > { %v2528_v54 = vpop.f32.mrb[73].mxu0 }
 0x1a0   : > { %v2615_v31 = vadd.f32 %v2528_v54, %v5761_v50  ;;  %v4257_v32 = vpop.f32.mrb[74].mxu0 }
 0x1a1   : > { %v2617_v59 = vadd.f32 %v4257_v32, %v5763_v52  ;;  %v2531_v49 = vpop.f32.mrb[75].mxu0 }
 0x1a2   : > { %v2616_v33 = vadd.f32 %v2531_v49, %v5766_v38  ;;  %v4296_v48 = vpop.f32.mrb[72].mxu1 }
 0x1a3   : > { %v2735_v23 = vpop.f32.mrb[73].mxu1 }
 0x1a4   : > { %v5809_v51 = vadd.f32 %v2735_v23, %v2615_v31  ;;  %v4297_v19 = vpop.f32.mrb[74].mxu1 }
 0x1a5   : > { %v5811_v22 = vadd.f32 %v4297_v19, %v2617_v59  ;;  %v2738_v55 = vpop.f32.mrb[75].mxu1 }
 0x1a6   : > { %v4260_v24 = vpop.f32.mrb[76].mxu0  ;;  %v5814_v28 = vadd.f32 %v2738_v55, %v2616_v33 }
 0x1a7   : > { %v2619_v56 = vadd.f32 %v4260_v24, %v5770_v26  ;;  %v2543_v14 = vpop.f32.mrb[77].mxu0 }
 0x1a8   : > { %v2618_v50 = vadd.f32 %v2543_v14, %v5772_v10  ;;  %v4261_v52 = vpop.f32.mrb[78].mxu0 }
 0x1a9   : > { %v2620_v25 = vadd.f32 %v4261_v52, %v5774_v45  ;;  %v2546_v38 = vpop.f32.mrb[79].mxu0 }
 0x1aa   : > { %v4300_v36 = vpop.f32.mrb[76].mxu1 }
 0x1ab   : > { %v5818_v40 = vadd.f32 %v4300_v36, %v2619_v56  ;;  %v2750_v47 = vpop.f32.mrb[77].mxu1 }
 0x1ac   : > { %v5820_v58 = vadd.f32 %v2750_v47, %v2618_v50  ;;  %v4301_v7 = vpop.f32.mrb[78].mxu1  ;;  %v5849_v47 = vld [vmem:[%s5936_s4] ss:$0 sm:$0xff] }
 0x1ad   : > { %v5822_v1 = vadd.f32 %v4301_v7, %v2620_v25  ;;  %v2753_v20 = vpop.f32.mrb[79].mxu1 }
 0x1ae   : > { %v4264_v41 = vpop.f32.mrb[80].mxu0 }
 0x1af   : > { %v2622_v26 = vadd.f32 %v4264_v41, %v5778_v2  ;;  %v2558_v0 = vpop.f32.mrb[81].mxu0 }
 0x1b0   : > { %v4265_v5 = vpop.f32.mrb[82].mxu0 }
 0x1b1   : > { %v2560_v10 = vpop.f32.mrb[83].mxu0 }
 0x1b2   : > { %v2621_v53 = vadd.f32 %v2560_v10, %v5780_v18  ;;  %v4304_v45 = vpop.f32.mrb[80].mxu1 }
 0x1b3   : > { %v5826_v17 = vadd.f32 %v4304_v45, %v2622_v26  ;;  %v2765_v37 = vpop.f32.mrb[81].mxu1 }
 0x1b4   : > { %v4305_v3 = vpop.f32.mrb[82].mxu1 }
 0x1b5   : > { %v2767_v8 = vpop.f32.mrb[83].mxu1 }
 0x1b6   : > { %v4268_v6 = vpop.f32.mrb[84].mxu0  ;;  %v5828_v46 = vadd.f32 %v2767_v8, %v2621_v53 }
 0x1b7   : > { %v2572_v60 = vpop.f32.mrb[85].mxu0 }
 0x1b8   : > { %v2623_v15 = vadd.f32 %v2572_v60, %v5785_v16  ;;  %v4269_v9 = vpop.f32.mrb[86].mxu0 }
 0x1b9   : > { %v2625_v2 = vadd.f32 %v4269_v9, %v5787_v12  ;;  %v2575_v30 = vpop.f32.mrb[87].mxu0 }
 0x1ba   : > { %v2624_v57 = vadd.f32 %v2575_v30, %v5790_v63  ;;  %v4308_v42 = vpop.f32.mrb[84].mxu1 }
 0x1bb   : > { %v2779_v18 = vpop.f32.mrb[85].mxu1 }
 0x1bc   : > { %v2830_v21 = vadd.f32 %v2779_v18, %v2623_v15  ;;  %v4309_v43 = vpop.f32.mrb[86].mxu1 }
 0x1bd   : > { %v2832_v4 = vadd.f32 %v4309_v43, %v2625_v2  ;;  %v2782_v29 = vpop.f32.mrb[87].mxu1 }
 0x1be   : > { %v4272_v35 = vpop.f32.mrb[88].mxu0  ;;  %v2831_v13 = vadd.f32 %v2782_v29, %v2624_v57 }
 0x1bf   : > { %v2627_v27 = vadd.f32 %v4272_v35, %v5794_v62  ;;  %v2587_v34 = vpop.f32.mrb[89].mxu0 }
 0x1c0   : > { %v2626_v54 = vadd.f32 %v2587_v34, %v5796_v61  ;;  %v4273_v16 = vpop.f32.mrb[90].mxu0 }
 0x1c1   : > { %v2628_v31 = vadd.f32 %v4273_v16, %v5798_v44  ;;  %v2590_v12 = vpop.f32.mrb[91].mxu0 }
 0x1c2   : > { %v4312_v32 = vpop.f32.mrb[88].mxu1 }
 0x1c3   : > { %v5836_v59 = vadd.f32 %v4312_v32, %v2627_v27  ;;  %v2794_v63 = vpop.f32.mrb[89].mxu1 }
 0x1c4   : > { %v5838_v49 = vadd.f32 %v2794_v63, %v2626_v54  ;;  %v4313_v33 = vpop.f32.mrb[90].mxu1 }
 0x1c5   : > { %v5840_v23 = vadd.f32 %v4313_v33, %v2628_v31  ;;  %v2797_v24 = vpop.f32.mrb[91].mxu1 }
 0x1c6   : > { %v4276_v48 = vpop.f32.mrb[92].mxu0 }
 0x1c7   : > { %v2630_v62 = vadd.f32 %v4276_v48, %v5802_v11  ;;  %v2602_v19 = vpop.f32.mrb[93].mxu0 }
 0x1c8   : > { %v4277_v55 = vpop.f32.mrb[94].mxu0 }
 0x1c9   : > { %v2604_v61 = vpop.f32.mrb[95].mxu0 }
 0x1ca   : > { %v2629_v56 = vadd.f32 %v2604_v61, %v5804_v39  ;;  %v4316_v44 = vpop.f32.mrb[92].mxu1 }
 0x1cb   : > { %v5844_v14 = vadd.f32 %v4316_v44, %v2630_v62  ;;  %v2809_v50 = vpop.f32.mrb[93].mxu1 }
 0x1cc   : > { %v4317_v52 = vpop.f32.mrb[94].mxu1 }
 0x1cd   : > { %v2811_v38 = vpop.f32.mrb[95].mxu1 }
 0x1ce   : > { %v4336_v25 = vpop.f32.mrb[96].mxu0  ;;  %v5851_v11 = vadd.f32 %v2811_v38, %v2629_v56 }
 0x1cf   : > { %v2966_v36 = vpop.f32.mrb[97].mxu0 }
 0x1d0   : > { %v3053_v7 = vadd.f32 %v2966_v36, %v5809_v51  ;;  %v4337_v41 = vpop.f32.mrb[98].mxu0 }
 0x1d1   : > { %v3055_v39 = vadd.f32 %v4337_v41, %v5811_v22  ;;  %v2969_v26 = vpop.f32.mrb[99].mxu0 }
 0x1d2   : > { %v3076_v0 = vadd.f32 %v5849_v47, %v3053_v7  ;;  %v3054_v20 = vadd.f32 %v2969_v26, %v5814_v28  ;;  %v4348_v53 = vpop.f32.mrb[96].mxu1 }
 0x1d3   : > { %v3078_v5 = vadd.f32 %v5849_v47, %v3055_v39  ;;  %v3010_v3 = vpop.f32.mrb[97].mxu1 }
 0x1d4   : > { %v3077_v10 = vadd.f32 %v5849_v47, %v3054_v20  ;;  %v3201_v45 = vmul.f32 %v3076_v0, %v3076_v0  ;;  %v3061_v60 = vadd.f32 %v3010_v3, %v2830_v21  ;;  %v4349_v22 = vpop.f32.mrb[98].mxu1 }
 0x1d5   : > { %v3714_v37 = vpack.c.bf16 %v3078_v5, %v3078_v5  ;;  %v3063_v9 = vadd.f32 %v4349_v22, %v2832_v4  ;;  %v3013_v2 = vpop.f32.mrb[99].mxu1  ;;  %v3203_v57 = vmul.f32 %v3078_v5, %v3078_v5 }
 0x1d6   : > { %v3787_v6 = vpack.c.bf16 %v3077_v10, %v3076_v0  ;;  %v3180_v51 = vadd.f32 %v3077_v10, %v3076_v0  ;;  %v3202_v8 = vmul.f32 %v3077_v10, %v3077_v10  ;;  %v4340_v15 = vpop.f32.mrb[100].mxu0  ;;  %v3062_v18 = vadd.f32 %v3013_v2, %v2831_v13 }
 0x1d7   : > { %3158 = vst [vmem:[%s4694_s18 + $0xc] sm:$0xf] %v3714_v37  ;;  %v3057_v28 = vadd.f32 %v4340_v15, %v5818_v40  ;;  %v2981_v30 = vpop.f32.mrb[101].mxu0  ;;  %v5864_v29 = vadd.f32 %v5849_v47, %v3063_v9  ;;  %v5868_v4 = vadd.f32 %v5849_v47, %v3061_v60 }
 0x1d8   : > { %3788 = vst [vmem:[%s4694_s18] sm:$0xff] %v3787_v6   ;;  %v3217_v42 = vadd.f32 %v3202_v8, %v3201_v45  ;;  %v3056_v43 = vadd.f32 %v2981_v30, %v5820_v58  ;;  %v4341_v35 = vpop.f32.mrb[102].mxu0  ;;  %v3181_v21 = vadd.f32 %v3180_v51, %v3078_v5  ;;  %v5871_v40 = vadd.f32 %v5849_v47, %v3062_v18 }
 0x1d9   : > { %v3058_v27 = vadd.f32 %v4341_v35, %v5822_v1  ;;  %v2984_v34 = vpop.f32.mrb[103].mxu0  ;;  %v3722_v54 = vpack.c.bf16 %v5864_v29, %v5864_v29  ;;  %v3080_v16 = vadd.f32 %v5849_v47, %v3057_v28 }
 0x1da   : > { %v3079_v13 = vadd.f32 %v5849_v47, %v3056_v43  ;;  %v3218_v58 = vadd.f32 %v3217_v42, %v3203_v57  ;;  %v3797_v1 = vpack.c.bf16 %v5871_v40, %v5868_v4  ;;  %v4352_v63 = vpop.f32.mrb[100].mxu1 }
 0x1db   : > { %v3081_v31 = vadd.f32 %v5849_v47, %v3058_v27  ;;  %3166 = vst [vmem:[%s4694_s18 + $0x3c] sm:$0xf] %v3722_v54  ;;  %v3065_v62 = vadd.f32 %v4352_v63, %v5836_v59  ;;  %v3025_v19 = vpop.f32.mrb[101].mxu1  ;;  %v3205_v44 = vmul.f32 %v3080_v16, %v3080_v16 }
 0x1dc   : > { %v3715_v12 = vpack.c.bf16 %v3079_v13, %v3079_v13  ;;  %v3182_v32 = vadd.f32 %v3181_v21, %v3079_v13  ;;  %v3204_v33 = vmul.f32 %v3079_v13, %v3079_v13  ;;  %3816 = vst [vmem:[%s4694_s18 + $0x30] sm:$0xff] %v3797_v1   ;;  %v3064_v55 = vadd.f32 %v3025_v19, %v5838_v49  ;;  %v4353_v61 = vpop.f32.mrb[102].mxu1 }
 0x1dd   : > { %v3792_v48 = vpack.c.bf16 %v3081_v31, %v3080_v16  ;;  %v3066_v52 = vadd.f32 %v4353_v61, %v5840_v23  ;;  %v3028_v36 = vpop.f32.mrb[103].mxu1  ;;  %v3206_v59 = vmul.f32 %v3081_v31, %v3081_v31  ;;  %v3088_v26 = vadd.f32 %v5849_v47, %v3065_v62 }
 0x1de   : > { %3159 = vst [vmem:[%s4694_s18 + $0x10] sm:$0xf] %v3715_v12  ;;  %v3183_v24 = vadd.f32 %v3182_v32, %v3080_v16  ;;  %v4344_v56 = vpop.f32.mrb[104].mxu0  ;;  %v3219_v50 = vadd.f32 %v3218_v58, %v3204_v33  ;;  %v3087_v41 = vadd.f32 %v5849_v47, %v3064_v55  ;;  %v3210_v21 = vmul.f32 %v5871_v40, %v5871_v40 }
 0x1df   : > { %3815 = vst [vmem:[%s4694_s18 + $0x18] sm:$0xff] %v3792_v48   ;;  %v3060_v25 = vadd.f32 %v4344_v56, %v5826_v17  ;;  %v2996_v38 = vpop.f32.mrb[105].mxu0  ;;  %v3089_v0 = vadd.f32 %v5849_v47, %v3066_v52  ;;  %v3213_v1 = vmul.f32 %v3088_v26, %v3088_v26 }
 0x1e0   : > { %v3184_v7 = vadd.f32 %v3183_v24, %v3081_v31  ;;  %v4345_v39 = vpop.f32.mrb[106].mxu0  ;;  %v3220_v49 = vadd.f32 %v3219_v50, %v3205_v44  ;;  %v3723_v5 = vpack.c.bf16 %v3087_v41, %v3087_v41  ;;  %v3212_v16 = vmul.f32 %v3087_v41, %v3087_v41 }
 0x1e1   : > { %v3083_v20 = vadd.f32 %v5849_v47, %v3060_v25  ;;  %v2998_v23 = vpop.f32.mrb[107].mxu0  ;;  %v3802_v53 = vpack.c.bf16 %v3089_v0, %v3088_v26  ;;  %v3214_v32 = vmul.f32 %v3089_v0, %v3089_v0 }
 0x1e2   : > { %v3059_v17 = vadd.f32 %v2998_v23, %v5828_v46  ;;  %v3221_v10 = vadd.f32 %v3220_v49, %v3206_v59  ;;  %3167 = vst [vmem:[%s4694_s18 + $0x40] sm:$0xf] %v3723_v5  ;;  %v4356_v3 = vpop.f32.mrb[104].mxu1 }
 0x1e3   : > { %v3719_v45 = vpack.c.bf16 %v3083_v20, %v3083_v20  ;;  %3817 = vst [vmem:[%s4694_s18 + $0x48] sm:$0xff] %v3802_v53   ;;  %v3068_v6 = vadd.f32 %v4356_v3, %v5844_v14  ;;  %v3040_v51 = vpop.f32.mrb[105].mxu1  ;;  %v3208_v2 = vmul.f32 %v3083_v20, %v3083_v20  ;;  %v3209_v14 = vmul.f32 %v5868_v4, %v5868_v4 }
 0x1e4   : > { %v3082_v37 = vadd.f32 %v5849_v47, %v3059_v17  ;;  %v4357_v15 = vpop.f32.mrb[106].mxu1 }
 0x1e5   : > { %3163 = vst [vmem:[%s4694_s18 + $0x28] sm:$0xf] %v3719_v45  ;;  %v3091_v46 = vadd.f32 %v5849_v47, %v3068_v6  ;;  %v3042_v9 = vpop.f32.mrb[107].mxu1 }
 0x1e6   : > { %v3718_v8 = vpack.c.bf16 %v3082_v37, %v3082_v37  ;;  %v3185_v60 = vadd.f32 %v3184_v7, %v3082_v37  ;;  %v3207_v22 = vmul.f32 %v3082_v37, %v3082_v37  ;;  %v3067_v57 = vadd.f32 %v3042_v9, %v5851_v11 }
 0x1e7   : > { %v3727_v42 = vpack.c.bf16 %v3091_v46, %v3091_v46  ;;  %v3211_v11 = vmul.f32 %v5864_v29, %v5864_v29  ;;  %v3216_v19 = vmul.f32 %v3091_v46, %v3091_v46 }
 0x1e8   : > { %3162 = vst [vmem:[%s4694_s18 + $0x24] sm:$0xf] %v3718_v8  ;;  %v3186_v28 = vadd.f32 %v3185_v60, %v3083_v20  ;;  %v3222_v30 = vadd.f32 %v3221_v10, %v3207_v22  ;;  %v3090_v35 = vadd.f32 %v5849_v47, %v3067_v57 }
 0x1e9   : > { %3171 = vst [vmem:[%s4694_s18 + $0x58] sm:$0xf] %v3727_v42 }
 0x1ea   : > { %v3187_v18 = vadd.f32 %v3186_v28, %v5868_v4  ;;  %v3223_v43 = vadd.f32 %v3222_v30, %v3208_v2  ;;  %v3726_v13 = vpack.c.bf16 %v3090_v35, %v3090_v35 }
 0x1ec   : > { %v3188_v27 = vadd.f32 %v3187_v18, %v5871_v40  ;;  %v3224_v34 = vadd.f32 %v3223_v43, %v3209_v14  ;;  %3170 = vst [vmem:[%s4694_s18 + $0x54] sm:$0xf] %v3726_v13  ;;  %v3215_v40 = vmul.f32 %v3090_v35, %v3090_v35  ;;  %s3458_s18 = sshll.u32 %s5754_s14, 1 }
 0x1ed   : > { %s494_s17 = scalar_lea.vmem %s5940_s8, %s3458_s18 }
 0x1ee   : > { %v3225_v58 = vadd.f32 %v3224_v34, %v3210_v21  ;;  %v3189_v54 = vadd.f32 %v3188_v27, %v5864_v29 }
 0x1f0   : > { %v3190_v4 = vadd.f32 %v3189_v54, %v3087_v41  ;;  %v3226_v31 = vadd.f32 %v3225_v58, %v3211_v11 }
 0x1f2   : > { %v3191_v47 = vadd.f32 %v3190_v4, %v3088_v26  ;;  %v3227_v12 = vadd.f32 %v3226_v31, %v3212_v16 }
 0x1f4   : > { %v3192_v63 = vadd.f32 %v3191_v47, %v3089_v0  ;;  %v3228_v33 = vadd.f32 %v3227_v12, %v3213_v1 }
 0x1f6   : > { %v3193_v48 = vadd.f32 %v3192_v63, %v3090_v35  ;;  %v3229_v62 = vadd.f32 %v3228_v33, %v3214_v32 }
 0x1f8   : > { %v3194_v24 = vadd.f32 %v3193_v48, %v3091_v46  ;;  %v3230_v55 = vadd.f32 %v3229_v62, %v3215_v40 }
 0x1fa   : > { %v3195_v61 = vrot.slane %v3194_v24, 4  ;;  %v3231_v56 = vadd.f32 %v3230_v55, %v3216_v19 }
 0x1fc   : > { %v3196_v44 = vadd.f32 %v3195_v61, %v3194_v24  ;;  %v3232_v29 = vrot.slane %v3231_v56, 4 }
 0x1fe   : > { %v3197_v50 = vrot.slane %v3196_v44, 2  ;;  %v3233_v52 = vadd.f32 %v3232_v29, %v3231_v56 }
 0x200   : > { %v3198_v25 = vadd.f32 %v3197_v50, %v3196_v44  ;;  %v3234_v38 = vrot.slane %v3233_v52, 2 }
 0x202   : > { %v3199_v36 = vrot.slane %v3198_v25, 1  ;;  %v3235_v7 = vadd.f32 %v3234_v38, %v3233_v52 }
 0x204   : > { %v3236_v59 = vrot.slane %v3235_v7, 1  ;;  %v3200_v41 = vadd.f32 %v3199_v36, %v3198_v25 }
 0x206   : > { %v3237_v39 = vadd.f32 %v3236_v59, %v3235_v7 }
 0x208   : > { %v3239_v49 = vsel %vm3238_vm10, %v3200_v41, %v3237_v39 }
 0x209   : > { %3240 = vst [vmem:[%s494_s17] sm:$0x3] %v3239_v49 }
 0x20a PF: > { %s19_s9 = sadd.s32 1, %s4533_s9   ;;  %s6075_s10 = sld [smem:[#allocation2_spill]] }
 0x20b   : > { %p16_p12 = scmp.ge.s32.totalorder %s19_s9, 6   ;;  %s6076_s13 = sld [smem:[#allocation3_spill]] }
 0x20c   : > { %s6077_s27 = smov %s4525_s29  ;;  %s6078_s28 = smov %s4529_s30 }
 0x20d   :  { %18 = sbr.rel (!%p16_p12) target bundleno = 3 (0x3), region = 104 }
 0x210   : > { %s6079_s29 = smov %s6075_s10 }
 0x211   : > { %s6080_s30 = smov %s6076_s13 }

</bundles_post_ra>
